<compile_context>
chip_gen: v6e
topology: v6e:2x2x1
jax: 0.10.0
libtpu: 0.0.40
codegen_flags: <defaults>
</compile_context>

<pallas_src>
import functools

import jax
import jax.numpy as jnp
from jax.experimental import pallas as pl
from jax.experimental.pallas import tpu as pltpu


LANE = 128
_VMEM_LIMIT = 32 * 1024 * 1024   # explicit; safe on v5e/v6e/v7x scoped defaults


def _round_up(x, m):
    return (x + m - 1) // m * m


def _pick_tm(m):
    # 256-row tiles are safe across v5e/v6e/v7x VMEM budgets (v6e could use
    # 512); if M isn't a tile multiple we pad it and mask rows in-kernel
    # instead of falling back to tiny tm=8 tiles.
    for tm in (256, 128):
        if m % tm == 0:
            return tm
    return 256


# ----------------------------- Pallas kernels -----------------------------

def _fused_mm_kernel(x_ref, w_ref, scale_ref, shift_ref,
                     y_ref, sum_ref, sq_ref, *, true_m, preact, mask_rows):
    """1x1-conv matmul with optional fused BN-affine+ReLU pre-activation and a
    per-channel sum / sum-of-squares epilogue (two-level reduction: per-tile
    partials here, final tiny reduction in JAX)."""
    tm = x_ref.shape[0]
    a = x_ref[...]
    if preact:                                   # previous stage's BN + ReLU
        a = jnp.maximum(a * scale_ref[...] + shift_ref[...], 0.0)
    if mask_rows:                                # padded rows -> 0 (keeps stats exact)
        row = (jax.lax.broadcasted_iota(jnp.int32, (tm, 1), 0)
               + pl.program_id(0) * tm)
        a = jnp.where(row < true_m, a, 0.0)
    y = jnp.dot(a, w_ref[...], preferred_element_type=jnp.float32)
    y_ref[...] = y
    s = jnp.sum(y, axis=0, keepdims=True)        # (1, C)
    q = jnp.sum(y * y, axis=0, keepdims=True)
    # (8, C) sublane/lane-dense partial-stat blocks; host consumes row 0.
    sum_ref[0] = jnp.broadcast_to(s, sum_ref.shape[1:])
    sq_ref[0] = jnp.broadcast_to(q, sq_ref.shape[1:])


def _conv3x3_kernel(y1_ref, scale_ref, shift_ref, w_ref,
                    y2_ref, sum_ref, sq_ref, pad_ref, acc_ref,
                    *, H, W, pad_rows):
    """3x3 / stride-1 / pad-1 conv on one image: 9 shifted MXU dots over a
    zero-padded flattened activation held in VMEM (no 9x im2col in HBM).
    BN1+ReLU of the previous stage is fused into the input load, and
    per-channel sum/sumsq partials are emitted as an epilogue."""
    hw = H * W
    # fused BN-affine + ReLU of the previous stage
    a = jnp.maximum(y1_ref[0] * scale_ref[...] + shift_ref[...], 0.0)  # (HW, Cin)
    # zero-padded copy so row shifts past the top/bottom border read zeros
    pad_ref[...] = jnp.zeros_like(pad_ref)
    pad_ref[pad_rows:pad_rows + hw, :] = a       # aligned store (pad_rows % 8 == 0)
    acc_ref[...] = jnp.zeros_like(acc_ref)
    col = jax.lax.broadcasted_iota(jnp.int32, (hw, 1), 0) % W
    for dy in range(3):
        for dx in range(3):
            off = (dy - 1) * W + (dx - 1)
            src = pad_ref[pad_rows + off:pad_rows + off + hw, :]
            if dx == 0:                          # left column has no left neighbour
                src = jnp.where(col >= 1, src, 0.0)
            elif dx == 2:                        # right column has no right neighbour
                src = jnp.where(col <= W - 2, src, 0.0)
            acc_ref[...] += jnp.dot(src, w_ref[dy * 3 + dx],
                                    preferred_element_type=jnp.float32)
    y2 = acc_ref[...]
    y2_ref[0] = y2
    s = jnp.sum(y2, axis=0, keepdims=True)
    q = jnp.sum(y2 * y2, axis=0, keepdims=True)
    sum_ref[0] = jnp.broadcast_to(s, sum_ref.shape[1:])
    sq_ref[0] = jnp.broadcast_to(q, sq_ref.shape[1:])


def _bn_add_relu_kernel(y_ref, scale_ref, shift_ref, res_ref, o_ref):
    o_ref[...] = jnp.maximum(
        y_ref[...] * scale_ref[...] + shift_ref[...] + res_ref[...], 0.0)


# ----------------------------- Pallas wrappers -----------------------------

def fused_matmul_stats(x, w, scale, shift, *, preact, true_m, tm):
    mp, k = x.shape
    nout = w.shape[1]
    nblk = mp // tm
    kern = functools.partial(_fused_mm_kernel, true_m=true_m, preact=preact,
                             mask_rows=(true_m != mp))
    y, s, q = pl.pallas_call(
        kern,
        out_shape=(jax.ShapeDtypeStruct((mp, nout), jnp.float32),
                   jax.ShapeDtypeStruct((nblk, 8, nout), jnp.float32),
                   jax.ShapeDtypeStruct((nblk, 8, nout), jnp.float32)),
        grid=(nblk,),
        in_specs=[pl.BlockSpec((tm, k), lambda i: (i, 0)),
                  pl.BlockSpec((k, nout), lambda i: (0, 0)),
                  pl.BlockSpec((1, k), lambda i: (0, 0)),
                  pl.BlockSpec((1, k), lambda i: (0, 0))],
        out_specs=(pl.BlockSpec((tm, nout), lambda i: (i, 0)),
                   pl.BlockSpec((1, 8, nout), lambda i: (i, 0, 0)),
                   pl.BlockSpec((1, 8, nout), lambda i: (i, 0, 0))),
        compiler_params=pltpu.CompilerParams(
            dimension_semantics=("parallel",),
            vmem_limit_bytes=_VMEM_LIMIT),
        cost_estimate=pl.CostEstimate(
            flops=2 * mp * k * nout, transcendentals=0,
            bytes_accessed=4 * (mp * k + k * nout + mp * nout)),
    )(x, w, scale, shift)
    return y, jnp.sum(s[:, 0, :], axis=0), jnp.sum(q[:, 0, :], axis=0)


def conv3x3_stats(y1_img, scale, shift, w_taps, h, w):
    n, hw, cin = y1_img.shape
    cout = w_taps.shape[-1]
    pad_rows = _round_up(w + 1, 8)               # front/back zero halo (8-aligned)
    kern = functools.partial(_conv3x3_kernel, H=h, W=w, pad_rows=pad_rows)
    y2, s, q = pl.pallas_call(
        kern,
        out_shape=(jax.ShapeDtypeStruct((n, hw, cout), jnp.float32),
                   jax.ShapeDtypeStruct((n, 8, cout), jnp.float32),
                   jax.ShapeDtypeStruct((n, 8, cout), jnp.float32)),
        grid=(n,),
        in_specs=[pl.BlockSpec((1, hw, cin), lambda i: (i, 0, 0)),
                  pl.BlockSpec((1, cin), lambda i: (0, 0)),
                  pl.BlockSpec((1, cin), lambda i: (0, 0)),
                  pl.BlockSpec((9, cin, cout), lambda i: (0, 0, 0))],
        out_specs=(pl.BlockSpec((1, hw, cout), lambda i: (i, 0, 0)),
                   pl.BlockSpec((1, 8, cout), lambda i: (i, 0, 0)),
                   pl.BlockSpec((1, 8, cout), lambda i: (i, 0, 0))),
        scratch_shapes=[pltpu.VMEM((hw + 2 * pad_rows, cin), jnp.float32),
                        pltpu.VMEM((hw, cout), jnp.float32)],
        compiler_params=pltpu.CompilerParams(
            dimension_semantics=("parallel",),
            vmem_limit_bytes=_VMEM_LIMIT),
        cost_estimate=pl.CostEstimate(
            flops=2 * 9 * n * hw * cin * cout, transcendentals=0,
            bytes_accessed=4 * (n * hw * cin + 9 * cin * cout + n * hw * cout)),
    )(y1_img, scale, shift, w_taps)
    return y2, jnp.sum(s[:, 0, :], axis=0), jnp.sum(q[:, 0, :], axis=0)


def bn_add_relu(y, scale, shift, res, *, tm):
    mp, c = y.shape
    return pl.pallas_call(
        _bn_add_relu_kernel,
        out_shape=jax.ShapeDtypeStruct((mp, c), jnp.float32),
        grid=(mp // tm,),
        in_specs=[pl.BlockSpec((tm, c), lambda i: (i, 0)),
                  pl.BlockSpec((1, c), lambda i: (0, 0)),
                  pl.BlockSpec((1, c), lambda i: (0, 0)),
                  pl.BlockSpec((tm, c), lambda i: (i, 0))],
        out_specs=pl.BlockSpec((tm, c), lambda i: (i, 0)),
        input_output_aliases={0: 0},             # reuse the conv3 output buffer
        compiler_params=pltpu.CompilerParams(
            dimension_semantics=("parallel",),
            vmem_limit_bytes=_VMEM_LIMIT),
    )(y, scale, shift, res)


# ------------------------------- glue (JAX) -------------------------------

def _bn_scale_shift(s, q, gamma, beta, count, eps):
    # Training-mode BN from fused per-channel sums: batch mean, biased variance
    # (PyTorch semantics).  E[x^2]-E[x]^2 in f32 is fine at this scale; a
    # shifted/Welford accumulation would be preferable for huge activations.
    mean = s / count
    var = jnp.maximum(q / count - mean * mean, 0.0)
    inv = jax.lax.rsqrt(var + eps)
    scale = gamma * inv
    shift = beta - mean * scale
    return (scale[None, :].astype(jnp.float32),
            shift[None, :].astype(jnp.float32))


def bottleneck_forward(x_nchw, w1, g1, b1, w2, g2, b2, w3, g3, b3,
                       stride=1, eps=1e-5):
    # TODO(synk): only the stride=1 / downsample=None configuration of the
    # module is implemented (the optional downsample submodule is None here).
    assert stride == 1, "stride != 1 requires the downsample path"
    n, cin, h, w = x_nchw.shape
    planes = w1.shape[0]
    cout = planes * 4
    assert cin == cout, "identity residual requires inplanes == planes * 4"

    c_in_p = _round_up(cin, LANE)
    c_mid_p = _round_up(planes, LANE)
    c_out_p = _round_up(cout, LANE)              # == c_in_p since cin == cout

    hw = h * w
    m = n * hw
    tm = _pick_tm(m)
    mp = _round_up(m, tm)

    # channel-last, lane-padded activations & weights (layout plumbing in JAX)
    x_flat = jnp.transpose(x_nchw, (0, 2, 3, 1)).astype(jnp.float32).reshape(m, cin)
    x_flat = jnp.pad(x_flat, ((0, mp - m), (0, c_in_p - cin)))

    w1m = jnp.pad(jnp.transpose(w1.reshape(planes, cin)).astype(jnp.float32),
                  ((0, c_in_p - cin), (0, c_mid_p - planes)))
    w2t = jnp.transpose(w2, (2, 3, 1, 0)).reshape(9, planes, planes).astype(jnp.float32)
    w2t = jnp.pad(w2t, ((0, 0), (0, c_mid_p - planes), (0, c_mid_p - planes)))
    w3m = jnp.pad(jnp.transpose(w3.reshape(cout, planes)).astype(jnp.float32),
                  ((0, c_mid_p - planes), (0, c_out_p - cout)))

    g1p = jnp.pad(g1.astype(jnp.float32), (0, c_mid_p - planes))
    b1p = jnp.pad(b1.astype(jnp.float32), (0, c_mid_p - planes))
    g2p = jnp.pad(g2.astype(jnp.float32), (0, c_mid_p - planes))
    b2p = jnp.pad(b2.astype(jnp.float32), (0, c_mid_p - planes))
    g3p = jnp.pad(g3.astype(jnp.float32), (0, c_out_p - cout))
    b3p = jnp.pad(b3.astype(jnp.float32), (0, c_out_p - cout))

    ident_s = jnp.ones((1, c_in_p), jnp.float32)
    ident_b = jnp.zeros((1, c_in_p), jnp.float32)

    # stage 1: conv1 (1x1) + fused BN1 statistics
    y1, s1, q1 = fused_matmul_stats(x_flat, w1m, ident_s, ident_b,
                                    preact=False, true_m=m, tm=tm)
    scale1, shift1 = _bn_scale_shift(s1, q1, g1p, b1p, m, eps)

    # stage 2: conv2 (3x3 halo conv) with fused BN1+ReLU, + fused BN2 statistics
    y1_img = y1[:m].reshape(n, hw, c_mid_p)
    y2, s2, q2 = conv3x3_stats(y1_img, scale1, shift1, w2t, h, w)
    scale2, shift2 = _bn_scale_shift(s2, q2, g2p, b2p, m, eps)

    # stage 3: conv3 (1x1) with fused BN2+ReLU, + fused BN3 statistics
    y2_flat = jnp.pad(y2.reshape(m, c_mid_p), ((0, mp - m), (0, 0)))
    y3, s3, q3 = fused_matmul_stats(y2_flat, w3m, scale2, shift2,
                                    preact=True, true_m=m, tm=tm)
    scale3, shift3 = _bn_scale_shift(s3, q3, g3p, b3p, m, eps)

    # stage 4: BN3 affine + identity residual + final ReLU
    out = bn_add_relu(y3, scale3, shift3, x_flat, tm=tm)

    out = out[:m, :cout].reshape(n, h, w, cout)
    return jnp.transpose(out, (0, 3, 1, 2))      # back to NCHW


# --------------------------- pure-JAX reference ---------------------------

def _ref_bn(y_nchw, gamma, beta, eps=1e-5):
    mean = jnp.mean(y_nchw, axis=(0, 2, 3), keepdims=True)
    var = jnp.mean((y_nchw - mean) ** 2, axis=(0, 2, 3), keepdims=True)
    return ((y_nchw - mean) * jax.lax.rsqrt(var + eps)
            * gamma[None, :, None, None] + beta[None, :, None, None])


def reference_forward(x, w1, g1, b1, w2, g2, b2, w3, g3, b3, stride=1):
    conv = functools.partial(
        jax.lax.conv_general_dilated,
        dimension_numbers=("NCHW", "OIHW", "NCHW"),
        precision=jax.lax.Precision.HIGHEST)
    out = conv(x, w1, (1, 1), "VALID")
    out = jax.nn.relu(_ref_bn(out, g1, b1))
    out = conv(out, w2, (stride, stride), ((1, 1), (1, 1)))
    out = jax.nn.relu(_ref_bn(out, g2, b2))
    out = conv(out, w3, (1, 1), "VALID")
    out = _ref_bn(out, g3, b3)
    out = out + x
    return jax.nn.relu(out)


# ---------------------------------- main ----------------------------------

if __name__ == "__main__":
    key = jax.random.PRNGKey(0)
    k1, k2, k3, kx = jax.random.split(key, 4)

    # Bottleneck(inplanes=16, planes=4) -> identity residual is valid.
    N, H, W = 2, 16, 16
    planes = 4
    inplanes = planes * 4  # 16

    # PyTorch layout (OIHW) conv weights; BatchNorm2d default init (1, 0).
    w1 = jax.random.normal(k1, (planes, inplanes, 1, 1), jnp.float32) * 0.1
    w2 = jax.random.normal(k2, (planes, planes, 3, 3), jnp.float32) * 0.1
    w3 = jax.random.normal(k3, (planes * 4, planes, 1, 1), jnp.float32) * 0.1
    g1, b1 = jnp.ones((planes,), jnp.float32), jnp.zeros((planes,), jnp.float32)
    g2, b2 = jnp.ones((planes,), jnp.float32), jnp.zeros((planes,), jnp.float32)
    g3, b3 = (jnp.ones((planes * 4,), jnp.float32),
              jnp.zeros((planes * 4,), jnp.float32))

    x = jax.random.normal(kx, (N, inplanes, H, W), jnp.float32)

    fwd = jax.jit(bottleneck_forward)
    out = jax.block_until_ready(fwd(x, w1, g1, b1, w2, g2, b2, w3, g3, b3))

    ref = jax.block_until_ready(
        reference_forward(x, w1, g1, b1, w2, g2, b2, w3, g3, b3, stride=1))

    assert out.shape == (N, planes * 4, H, W), out.shape
    max_err = float(jnp.max(jnp.abs(out - ref)))
    assert jnp.allclose(out, ref, atol=2e-3, rtol=2e-3), max_err

    print("KERNEL_OK")
</pallas_src>

<mosaic_0001>
module attributes {stable_mosaic.version = 11 : i64} {
  func.func @_fused_mm_kernel(%arg0: i32, %arg1: memref<256x128xf32, #tpu.memory_space<vmem>>, %arg2: memref<128x128xf32, #tpu.memory_space<vmem>>, %arg3: memref<1x128xf32, #tpu.memory_space<vmem>>, %arg4: memref<1x128xf32, #tpu.memory_space<vmem>>, %arg5: memref<256x128xf32, #tpu.memory_space<vmem>>, %arg6: memref<1x8x128xf32, #tpu.memory_space<vmem>>, %arg7: memref<1x8x128xf32, #tpu.memory_space<vmem>>) attributes {dimension_semantics = [#tpu.dimension_semantics<parallel>], iteration_bounds = array<i64: 2>, scalar_prefetch = 0 : i64, scratch_operands = 0 : i64, tpu.core_type = #tpu.core_type<tc>, window_params = [{transform_indices = @transform_0, window_bounds = array<i64: 256, 128>}, {pipeline_mode = #tpu.pipeline_mode<synchronous>, transform_indices = @transform_1, window_bounds = array<i64: 128, 128>}, {pipeline_mode = #tpu.pipeline_mode<synchronous>, transform_indices = @transform_2, window_bounds = array<i64: 1, 128>}, {pipeline_mode = #tpu.pipeline_mode<synchronous>, transform_indices = @transform_3, window_bounds = array<i64: 1, 128>}, {transform_indices = @transform_4, window_bounds = array<i64: 256, 128>}, {transform_indices = @transform_5, window_bounds = array<i64: 1, 8, 128>}, {transform_indices = @transform_6, window_bounds = array<i64: 1, 8, 128>}]} {
    %c0 = arith.constant 0 : index
    %c0_0 = arith.constant 0 : index
    %0 = vector.load %arg1[%c0, %c0_0] : memref<256x128xf32, #tpu.memory_space<vmem>>, vector<256x128xf32>
    %c0_1 = arith.constant 0 : index
    %c0_2 = arith.constant 0 : index
    %1 = vector.load %arg2[%c0_1, %c0_2] : memref<128x128xf32, #tpu.memory_space<vmem>>, vector<128x128xf32>
    %cst = arith.constant dense<0.000000e+00> : vector<256x128xf32>
    %2 = tpu.matmul %0, %1, %cst {dimension_numbers = #tpu.dot_dimension_numbers<[1], [0], [0], [1], [0, 0, 1, 1], [], []>} : vector<256x128xf32>, vector<128x128xf32>, vector<256x128xf32> -> vector<256x128xf32>
    %c0_3 = arith.constant 0 : index
    %c0_4 = arith.constant 0 : index
    %3 = vector.load %arg5[%c0_3, %c0_4] : memref<256x128xf32, #tpu.memory_space<vmem>>, vector<256x128xf32>
    tpu.vector_store %arg5[%c0_3, %c0_4], %2 {strides = array<i32>} : memref<256x128xf32, #tpu.memory_space<vmem>>, vector<256x128xf32>,
    %cst_5 = arith.constant dense<0.000000e+00> : vector<128xf32>
    %4 = vector.multi_reduction <add>, %2, %cst_5 [0] : vector<256x128xf32> to vector<128xf32>
    %5 = vector.shape_cast %4 : vector<128xf32> to vector<1x128xf32>
    %6 = arith.mulf %2, %2 : vector<256x128xf32>
    %cst_6 = arith.constant dense<0.000000e+00> : vector<128xf32>
    %7 = vector.multi_reduction <add>, %6, %cst_6 [0] : vector<256x128xf32> to vector<128xf32>
    %8 = vector.shape_cast %7 : vector<128xf32> to vector<1x128xf32>
    %9 = vector.shape_cast %5 : vector<1x128xf32> to vector<1x128xf32>
    %10 = vector.broadcast %9 : vector<1x128xf32> to vector<8x128xf32>
    %c0_7 = arith.constant 0 : index
    %c0_8 = arith.constant 0 : index
    %c0_9 = arith.constant 0 : index
    %11 = vector.load %arg6[%c0_7, %c0_8, %c0_9] : memref<1x8x128xf32, #tpu.memory_space<vmem>>, vector<1x8x128xf32>
    %12 = vector.shape_cast %11 : vector<1x8x128xf32> to vector<8x128xf32>
    %13 = vector.shape_cast %10 : vector<8x128xf32> to vector<1x8x128xf32>
    tpu.vector_store %arg6[%c0_7, %c0_8, %c0_9], %13 {strides = array<i32>} : memref<1x8x128xf32, #tpu.memory_space<vmem>>, vector<1x8x128xf32>,
    %14 = vector.shape_cast %8 : vector<1x128xf32> to vector<1x128xf32>
    %15 = vector.broadcast %14 : vector<1x128xf32> to vector<8x128xf32>
    %c0_10 = arith.constant 0 : index
    %c0_11 = arith.constant 0 : index
    %c0_12 = arith.constant 0 : index
    %16 = vector.load %arg7[%c0_10, %c0_11, %c0_12] : memref<1x8x128xf32, #tpu.memory_space<vmem>>, vector<1x8x128xf32>
    %17 = vector.shape_cast %16 : vector<1x8x128xf32> to vector<8x128xf32>
    %18 = vector.shape_cast %15 : vector<8x128xf32> to vector<1x8x128xf32>
    tpu.vector_store %arg7[%c0_10, %c0_11, %c0_12], %18 {strides = array<i32>} : memref<1x8x128xf32, #tpu.memory_space<vmem>>, vector<1x8x128xf32>,
    return
  }
  func.func @transform_0(%arg0: i32) -> (i32, i32) {
    %c0_i32 = arith.constant 0 : i32
    %c0_i32_0 = arith.constant 0 : i32
    return %arg0, %c0_i32 : i32, i32
  }
  func.func @transform_1(%arg0: i32) -> (i32, i32) {
    %c0_i32 = arith.constant 0 : i32
    %c0_i32_0 = arith.constant 0 : i32
    %c0_i32_1 = arith.constant 0 : i32
    return %c0_i32, %c0_i32_0 : i32, i32
  }
  func.func @transform_2(%arg0: i32) -> (i32, i32) {
    %c0_i32 = arith.constant 0 : i32
    %c0_i32_0 = arith.constant 0 : i32
    %c0_i32_1 = arith.constant 0 : i32
    return %c0_i32, %c0_i32_0 : i32, i32
  }
  func.func @transform_3(%arg0: i32) -> (i32, i32) {
    %c0_i32 = arith.constant 0 : i32
    %c0_i32_0 = arith.constant 0 : i32
    %c0_i32_1 = arith.constant 0 : i32
    return %c0_i32, %c0_i32_0 : i32, i32
  }
  func.func @transform_4(%arg0: i32) -> (i32, i32) {
    %c0_i32 = arith.constant 0 : i32
    %c0_i32_0 = arith.constant 0 : i32
    return %arg0, %c0_i32 : i32, i32
  }
  func.func @transform_5(%arg0: i32) -> (i32, i32, i32) {
    %c0_i32 = arith.constant 0 : i32
    %c0_i32_0 = arith.constant 0 : i32
    %c0_i32_1 = arith.constant 0 : i32
    return %arg0, %c0_i32, %c0_i32_0 : i32, i32, i32
  }
  func.func @transform_6(%arg0: i32) -> (i32, i32, i32) {
    %c0_i32 = arith.constant 0 : i32
    %c0_i32_0 = arith.constant 0 : i32
    %c0_i32_1 = arith.constant 0 : i32
    return %arg0, %c0_i32, %c0_i32_0 : i32, i32, i32
  }
}

module attributes {stable_mosaic.version = 11 : i64} {
  func.func @_conv3x3_kernel(%arg0: i32, %arg1: memref<1x256x128xf32, #tpu.memory_space<vmem>>, %arg2: memref<1x128xf32, #tpu.memory_space<vmem>>, %arg3: memref<1x128xf32, #tpu.memory_space<vmem>>, %arg4: memref<9x128x128xf32, #tpu.memory_space<vmem>>, %arg5: memref<1x256x128xf32, #tpu.memory_space<vmem>>, %arg6: memref<1x8x128xf32, #tpu.memory_space<vmem>>, %arg7: memref<1x8x128xf32, #tpu.memory_space<vmem>>, %arg8: memref<304x128xf32, #tpu.memory_space<vmem>>, %arg9: memref<256x128xf32, #tpu.memory_space<vmem>>) attributes {dimension_semantics = [#tpu.dimension_semantics<parallel>], iteration_bounds = array<i64: 2>, scalar_prefetch = 0 : i64, scratch_operands = 2 : i64, tpu.core_type = #tpu.core_type<tc>, window_params = [{transform_indices = @transform_0, window_bounds = array<i64: 1, 256, 128>}, {pipeline_mode = #tpu.pipeline_mode<synchronous>, transform_indices = @transform_1, window_bounds = array<i64: 1, 128>}, {pipeline_mode = #tpu.pipeline_mode<synchronous>, transform_indices = @transform_2, window_bounds = array<i64: 1, 128>}, {pipeline_mode = #tpu.pipeline_mode<synchronous>, transform_indices = @transform_3, window_bounds = array<i64: 9, 128, 128>}, {transform_indices = @transform_4, window_bounds = array<i64: 1, 256, 128>}, {transform_indices = @transform_5, window_bounds = array<i64: 1, 8, 128>}, {transform_indices = @transform_6, window_bounds = array<i64: 1, 8, 128>}]} {
    %c0 = arith.constant 0 : index
    %c0_0 = arith.constant 0 : index
    %c0_1 = arith.constant 0 : index
    %0 = vector.load %arg1[%c0, %c0_0, %c0_1] : memref<1x256x128xf32, #tpu.memory_space<vmem>>, vector<1x256x128xf32>
    %1 = vector.shape_cast %0 : vector<1x256x128xf32> to vector<256x128xf32>
    %c0_2 = arith.constant 0 : index
    %c0_3 = arith.constant 0 : index
    %2 = vector.load %arg2[%c0_2, %c0_3] : memref<1x128xf32, #tpu.memory_space<vmem>>, vector<1x128xf32>
    %3 = vector.broadcast %2 : vector<1x128xf32> to vector<256x128xf32>
    %4 = arith.mulf %1, %3 : vector<256x128xf32>
    %c0_4 = arith.constant 0 : index
    %c0_5 = arith.constant 0 : index
    %5 = vector.load %arg3[%c0_4, %c0_5] : memref<1x128xf32, #tpu.memory_space<vmem>>, vector<1x128xf32>
    %6 = vector.broadcast %5 : vector<1x128xf32> to vector<256x128xf32>
    %7 = arith.addf %4, %6 : vector<256x128xf32>
    %cst = arith.constant 0.000000e+00 : f32
    %8 = vector.broadcast %cst : f32 to vector<256x128xf32>
    %9 = arith.maximumf %7, %8 : vector<256x128xf32>
    %cst_6 = arith.constant 0.000000e+00 : f32
    %10 = vector.broadcast %cst_6 : f32 to vector<304x128xf32>
    %c0_7 = arith.constant 0 : index
    %c0_8 = arith.constant 0 : index
    %11 = vector.load %arg8[%c0_7, %c0_8] : memref<304x128xf32, #tpu.memory_space<vmem>>, vector<304x128xf32>
    tpu.vector_store %arg8[%c0_7, %c0_8], %10 {strides = array<i32>} : memref<304x128xf32, #tpu.memory_space<vmem>>, vector<304x128xf32>,
    %c24 = arith.constant 24 : index
    %c0_9 = arith.constant 0 : index
    %12 = vector.load %arg8[%c24, %c0_9] : memref<304x128xf32, #tpu.memory_space<vmem>>, vector<256x128xf32>
    tpu.vector_store %arg8[%c24, %c0_9], %9 {strides = array<i32>} : memref<304x128xf32, #tpu.memory_space<vmem>>, vector<256x128xf32>,
    %cst_10 = arith.constant 0.000000e+00 : f32
    %13 = vector.broadcast %cst_10 : f32 to vector<256x128xf32>
    %c0_11 = arith.constant 0 : index
    %c0_12 = arith.constant 0 : index
    %14 = vector.load %arg9[%c0_11, %c0_12] : memref<256x128xf32, #tpu.memory_space<vmem>>, vector<256x128xf32>
    tpu.vector_store %arg9[%c0_11, %c0_12], %13 {strides = array<i32>} : memref<256x128xf32, #tpu.memory_space<vmem>>, vector<256x128xf32>,
    %15 = tpu.iota {dimensions = array<i32: 0>} : vector<256x1xi32>
    %c16_i32 = arith.constant 16 : i32
    %c0_i32 = arith.constant 0 : i32
    %16 = arith.cmpi eq, %c16_i32, %c0_i32 : i32
    %c1_i32 = arith.constant 1 : i32
    %17 = arith.select %16, %c1_i32, %c16_i32 : i32
    %18 = vector.broadcast %17 : i32 to vector<256x1xi32>
    %19 = arith.remsi %15, %18 : vector<256x1xi32>
    %c0_i32_13 = arith.constant 0 : i32
    %20 = vector.broadcast %c0_i32_13 : i32 to vector<256x1xi32>
    %21 = arith.cmpi ne, %19, %20 : vector<256x1xi32>
    %c0_i32_14 = arith.constant 0 : i32
    %22 = vector.broadcast %c0_i32_14 : i32 to vector<256x1xi32>
    %23 = arith.cmpi slt, %19, %22 : vector<256x1xi32>
    %c0_i32_15 = arith.constant 0 : i32
    %24 = arith.cmpi slt, %17, %c0_i32_15 : i32
    %25 = vector.broadcast %24 : i1 to vector<256x1xi1>
    %26 = vector.broadcast %25 : vector<256x1xi1> to vector<256x1xi1>
    %27 = arith.xori %23, %26 : vector<256x1xi1>
    %28 = arith.andi %27, %21 : vector<256x1xi1>
    %29 = vector.broadcast %17 : i32 to vector<256x1xi32>
    %30 = arith.addi %19, %29 : vector<256x1xi32>
    %31 = arith.select %28, %30, %19 : vector<256x1xi1>, vector<256x1xi32>
    %c7 = arith.constant 7 : index
    %c0_16 = arith.constant 0 : index
    %32 = vector.load %arg8[%c7, %c0_16] : memref<304x128xf32, #tpu.memory_space<vmem>>, vector<256x128xf32>
    %c1_i32_17 = arith.constant 1 : i32
    %33 = vector.broadcast %c1_i32_17 : i32 to vector<256x1xi32>
    %34 = arith.cmpi sge, %31, %33 : vector<256x1xi32>
    %cst_18 = arith.constant 0.000000e+00 : f32
    %35 = vector.shape_cast %34 : vector<256x1xi1> to vector<256x1xi1>
    %36 = vector.broadcast %35 : vector<256x1xi1> to vector<256x128xi1>
    %37 = vector.broadcast %cst_18 : f32 to vector<256x128xf32>
    %38 = arith.select %36, %32, %37 : vector<256x128xi1>, vector<256x128xf32>
    %c0_19 = arith.constant 0 : index
    %c0_20 = arith.constant 0 : index
    %39 = vector.load %arg9[%c0_19, %c0_20] : memref<256x128xf32, #tpu.memory_space<vmem>>, vector<256x128xf32>
    %c0_21 = arith.constant 0 : index
    %c0_22 = arith.constant 0 : index
    %c0_23 = arith.constant 0 : index
    %40 = vector.load %arg4[%c0_21, %c0_22, %c0_23] : memref<9x128x128xf32, #tpu.memory_space<vmem>>, vector<1x128x128xf32>
    %41 = vector.shape_cast %40 : vector<1x128x128xf32> to vector<128x128xf32>
    %cst_24 = arith.constant dense<0.000000e+00> : vector<256x128xf32>
    %42 = tpu.matmul %38, %41, %cst_24 {dimension_numbers = #tpu.dot_dimension_numbers<[1], [0], [0], [1], [0, 0, 1, 1], [], []>} : vector<256x128xf32>, vector<128x128xf32>, vector<256x128xf32> -> vector<256x128xf32>
    %43 = arith.addf %39, %42 : vector<256x128xf32>
    %c0_25 = arith.constant 0 : index
    %c0_26 = arith.constant 0 : index
    %44 = vector.load %arg9[%c0_25, %c0_26] : memref<256x128xf32, #tpu.memory_space<vmem>>, vector<256x128xf32>
    tpu.vector_store %arg9[%c0_25, %c0_26], %43 {strides = array<i32>} : memref<256x128xf32, #tpu.memory_space<vmem>>, vector<256x128xf32>,
    %c8 = arith.constant 8 : index
    %c0_27 = arith.constant 0 : index
    %45 = vector.load %arg8[%c8, %c0_27] : memref<304x128xf32, #tpu.memory_space<vmem>>, vector<256x128xf32>
    %c0_28 = arith.constant 0 : index
    %c0_29 = arith.constant 0 : index
    %46 = vector.load %arg9[%c0_28, %c0_29] : memref<256x128xf32, #tpu.memory_space<vmem>>, vector<256x128xf32>
    %c1 = arith.constant 1 : index
    %c0_30 = arith.constant 0 : index
    %c0_31 = arith.constant 0 : index
    %47 = vector.load %arg4[%c1, %c0_30, %c0_31] : memref<9x128x128xf32, #tpu.memory_space<vmem>>, vector<1x128x128xf32>
    %48 = vector.shape_cast %47 : vector<1x128x128xf32> to vector<128x128xf32>
    %cst_32 = arith.constant dense<0.000000e+00> : vector<256x128xf32>
    %49 = tpu.matmul %45, %48, %cst_32 {dimension_numbers = #tpu.dot_dimension_numbers<[1], [0], [0], [1], [0, 0, 1, 1], [], []>} : vector<256x128xf32>, vector<128x128xf32>, vector<256x128xf32> -> vector<256x128xf32>
    %50 = arith.addf %46, %49 : vector<256x128xf32>
    %c0_33 = arith.constant 0 : index
    %c0_34 = arith.constant 0 : index
    %51 = vector.load %arg9[%c0_33, %c0_34] : memref<256x128xf32, #tpu.memory_space<vmem>>, vector<256x128xf32>
    tpu.vector_store %arg9[%c0_33, %c0_34], %50 {strides = array<i32>} : memref<256x128xf32, #tpu.memory_space<vmem>>, vector<256x128xf32>,
    %c9 = arith.constant 9 : index
    %c0_35 = arith.constant 0 : index
    %52 = vector.load %arg8[%c9, %c0_35] : memref<304x128xf32, #tpu.memory_space<vmem>>, vector<256x128xf32>
    %c14_i32 = arith.constant 14 : i32
    %53 = vector.broadcast %c14_i32 : i32 to vector<256x1xi32>
    %54 = arith.cmpi sle, %31, %53 : vector<256x1xi32>
    %cst_36 = arith.constant 0.000000e+00 : f32
    %55 = vector.shape_cast %54 : vector<256x1xi1> to vector<256x1xi1>
    %56 = vector.broadcast %55 : vector<256x1xi1> to vector<256x128xi1>
    %57 = vector.broadcast %cst_36 : f32 to vector<256x128xf32>
    %58 = arith.select %56, %52, %57 : vector<256x128xi1>, vector<256x128xf32>
    %c0_37 = arith.constant 0 : index
    %c0_38 = arith.constant 0 : index
    %59 = vector.load %arg9[%c0_37, %c0_38] : memref<256x128xf32, #tpu.memory_space<vmem>>, vector<256x128xf32>
    %c2 = arith.constant 2 : index
    %c0_39 = arith.constant 0 : index
    %c0_40 = arith.constant 0 : index
    %60 = vector.load %arg4[%c2, %c0_39, %c0_40] : memref<9x128x128xf32, #tpu.memory_space<vmem>>, vector<1x128x128xf32>
    %61 = vector.shape_cast %60 : vector<1x128x128xf32> to vector<128x128xf32>
    %cst_41 = arith.constant dense<0.000000e+00> : vector<256x128xf32>
    %62 = tpu.matmul %58, %61, %cst_41 {dimension_numbers = #tpu.dot_dimension_numbers<[1], [0], [0], [1], [0, 0, 1, 1], [], []>} : vector<256x128xf32>, vector<128x128xf32>, vector<256x128xf32> -> vector<256x128xf32>
    %63 = arith.addf %59, %62 : vector<256x128xf32>
    %c0_42 = arith.constant 0 : index
    %c0_43 = arith.constant 0 : index
    %64 = vector.load %arg9[%c0_42, %c0_43] : memref<256x128xf32, #tpu.memory_space<vmem>>, vector<256x128xf32>
    tpu.vector_store %arg9[%c0_42, %c0_43], %63 {strides = array<i32>} : memref<256x128xf32, #tpu.memory_space<vmem>>, vector<256x128xf32>,
    %c23 = arith.constant 23 : index
    %c0_44 = arith.constant 0 : index
    %65 = vector.load %arg8[%c23, %c0_44] : memref<304x128xf32, #tpu.memory_space<vmem>>, vector<256x128xf32>
    %c1_i32_45 = arith.constant 1 : i32
    %66 = vector.broadcast %c1_i32_45 : i32 to vector<256x1xi32>
    %67 = arith.cmpi sge, %31, %66 : vector<256x1xi32>
    %cst_46 = arith.constant 0.000000e+00 : f32
    %68 = vector.shape_cast %67 : vector<256x1xi1> to vector<256x1xi1>
    %69 = vector.broadcast %68 : vector<256x1xi1> to vector<256x128xi1>
    %70 = vector.broadcast %cst_46 : f32 to vector<256x128xf32>
    %71 = arith.select %69, %65, %70 : vector<256x128xi1>, vector<256x128xf32>
    %c0_47 = arith.constant 0 : index
    %c0_48 = arith.constant 0 : index
    %72 = vector.load %arg9[%c0_47, %c0_48] : memref<256x128xf32, #tpu.memory_space<vmem>>, vector<256x128xf32>
    %c3 = arith.constant 3 : index
    %c0_49 = arith.constant 0 : index
    %c0_50 = arith.constant 0 : index
    %73 = vector.load %arg4[%c3, %c0_49, %c0_50] : memref<9x128x128xf32, #tpu.memory_space<vmem>>, vector<1x128x128xf32>
    %74 = vector.shape_cast %73 : vector<1x128x128xf32> to vector<128x128xf32>
    %cst_51 = arith.constant dense<0.000000e+00> : vector<256x128xf32>
    %75 = tpu.matmul %71, %74, %cst_51 {dimension_numbers = #tpu.dot_dimension_numbers<[1], [0], [0], [1], [0, 0, 1, 1], [], []>} : vector<256x128xf32>, vector<128x128xf32>, vector<256x128xf32> -> vector<256x128xf32>
    %76 = arith.addf %72, %75 : vector<256x128xf32>
    %c0_52 = arith.constant 0 : index
    %c0_53 = arith.constant 0 : index
    %77 = vector.load %arg9[%c0_52, %c0_53] : memref<256x128xf32, #tpu.memory_space<vmem>>, vector<256x128xf32>
    tpu.vector_store %arg9[%c0_52, %c0_53], %76 {strides = array<i32>} : memref<256x128xf32, #tpu.memory_space<vmem>>, vector<256x128xf32>,
    %c24_54 = arith.constant 24 : index
    %c0_55 = arith.constant 0 : index
    %78 = vector.load %arg8[%c24_54, %c0_55] : memref<304x128xf32, #tpu.memory_space<vmem>>, vector<256x128xf32>
    %c0_56 = arith.constant 0 : index
    %c0_57 = arith.constant 0 : index
    %79 = vector.load %arg9[%c0_56, %c0_57] : memref<256x128xf32, #tpu.memory_space<vmem>>, vector<256x128xf32>
    %c4 = arith.constant 4 : index
    %c0_58 = arith.constant 0 : index
    %c0_59 = arith.constant 0 : index
    %80 = vector.load %arg4[%c4, %c0_58, %c0_59] : memref<9x128x128xf32, #tpu.memory_space<vmem>>, vector<1x128x128xf32>
    %81 = vector.shape_cast %80 : vector<1x128x128xf32> to vector<128x128xf32>
    %cst_60 = arith.constant dense<0.000000e+00> : vector<256x128xf32>
    %82 = tpu.matmul %78, %81, %cst_60 {dimension_numbers = #tpu.dot_dimension_numbers<[1], [0], [0], [1], [0, 0, 1, 1], [], []>} : vector<256x128xf32>, vector<128x128xf32>, vector<256x128xf32> -> vector<256x128xf32>
    %83 = arith.addf %79, %82 : vector<256x128xf32>
    %c0_61 = arith.constant 0 : index
    %c0_62 = arith.constant 0 : index
    %84 = vector.load %arg9[%c0_61, %c0_62] : memref<256x128xf32, #tpu.memory_space<vmem>>, vector<256x128xf32>
    tpu.vector_store %arg9[%c0_61, %c0_62], %83 {strides = array<i32>} : memref<256x128xf32, #tpu.memory_space<vmem>>, vector<256x128xf32>,
    %c25 = arith.constant 25 : index
    %c0_63 = arith.constant 0 : index
    %85 = vector.load %arg8[%c25, %c0_63] : memref<304x128xf32, #tpu.memory_space<vmem>>, vector<256x128xf32>
    %c14_i32_64 = arith.constant 14 : i32
    %86 = vector.broadcast %c14_i32_64 : i32 to vector<256x1xi32>
    %87 = arith.cmpi sle, %31, %86 : vector<256x1xi32>
    %cst_65 = arith.constant 0.000000e+00 : f32
    %88 = vector.shape_cast %87 : vector<256x1xi1> to vector<256x1xi1>
    %89 = vector.broadcast %88 : vector<256x1xi1> to vector<256x128xi1>
    %90 = vector.broadcast %cst_65 : f32 to vector<256x128xf32>
    %91 = arith.select %89, %85, %90 : vector<256x128xi1>, vector<256x128xf32>
    %c0_66 = arith.constant 0 : index
    %c0_67 = arith.constant 0 : index
    %92 = vector.load %arg9[%c0_66, %c0_67] : memref<256x128xf32, #tpu.memory_space<vmem>>, vector<256x128xf32>
    %c5 = arith.constant 5 : index
    %c0_68 = arith.constant 0 : index
    %c0_69 = arith.constant 0 : index
    %93 = vector.load %arg4[%c5, %c0_68, %c0_69] : memref<9x128x128xf32, #tpu.memory_space<vmem>>, vector<1x128x128xf32>
    %94 = vector.shape_cast %93 : vector<1x128x128xf32> to vector<128x128xf32>
    %cst_70 = arith.constant dense<0.000000e+00> : vector<256x128xf32>
    %95 = tpu.matmul %91, %94, %cst_70 {dimension_numbers = #tpu.dot_dimension_numbers<[1], [0], [0], [1], [0, 0, 1, 1], [], []>} : vector<256x128xf32>, vector<128x128xf32>, vector<256x128xf32> -> vector<256x128xf32>
    %96 = arith.addf %92, %95 : vector<256x128xf32>
    %c0_71 = arith.constant 0 : index
    %c0_72 = arith.constant 0 : index
    %97 = vector.load %arg9[%c0_71, %c0_72] : memref<256x128xf32, #tpu.memory_space<vmem>>, vector<256x128xf32>
    tpu.vector_store %arg9[%c0_71, %c0_72], %96 {strides = array<i32>} : memref<256x128xf32, #tpu.memory_space<vmem>>, vector<256x128xf32>,
    %c39 = arith.constant 39 : index
    %c0_73 = arith.constant 0 : index
    %98 = vector.load %arg8[%c39, %c0_73] : memref<304x128xf32, #tpu.memory_space<vmem>>, vector<256x128xf32>
    %c1_i32_74 = arith.constant 1 : i32
    %99 = vector.broadcast %c1_i32_74 : i32 to vector<256x1xi32>
    %100 = arith.cmpi sge, %31, %99 : vector<256x1xi32>
    %cst_75 = arith.constant 0.000000e+00 : f32
    %101 = vector.shape_cast %100 : vector<256x1xi1> to vector<256x1xi1>
    %102 = vector.broadcast %101 : vector<256x1xi1> to vector<256x128xi1>
    %103 = vector.broadcast %cst_75 : f32 to vector<256x128xf32>
    %104 = arith.select %102, %98, %103 : vector<256x128xi1>, vector<256x128xf32>
    %c0_76 = arith.constant 0 : index
    %c0_77 = arith.constant 0 : index
    %105 = vector.load %arg9[%c0_76, %c0_77] : memref<256x128xf32, #tpu.memory_space<vmem>>, vector<256x128xf32>
    %c6 = arith.constant 6 : index
    %c0_78 = arith.constant 0 : index
    %c0_79 = arith.constant 0 : index
    %106 = vector.load %arg4[%c6, %c0_78, %c0_79] : memref<9x128x128xf32, #tpu.memory_space<vmem>>, vector<1x128x128xf32>
    %107 = vector.shape_cast %106 : vector<1x128x128xf32> to vector<128x128xf32>
    %cst_80 = arith.constant dense<0.000000e+00> : vector<256x128xf32>
    %108 = tpu.matmul %104, %107, %cst_80 {dimension_numbers = #tpu.dot_dimension_numbers<[1], [0], [0], [1], [0, 0, 1, 1], [], []>} : vector<256x128xf32>, vector<128x128xf32>, vector<256x128xf32> -> vector<256x128xf32>
    %109 = arith.addf %105, %108 : vector<256x128xf32>
    %c0_81 = arith.constant 0 : index
    %c0_82 = arith.constant 0 : index
    %110 = vector.load %arg9[%c0_81, %c0_82] : memref<256x128xf32, #tpu.memory_space<vmem>>, vector<256x128xf32>
    tpu.vector_store %arg9[%c0_81, %c0_82], %109 {strides = array<i32>} : memref<256x128xf32, #tpu.memory_space<vmem>>, vector<256x128xf32>,
    %c40 = arith.constant 40 : index
    %c0_83 = arith.constant 0 : index
    %111 = vector.load %arg8[%c40, %c0_83] : memref<304x128xf32, #tpu.memory_space<vmem>>, vector<256x128xf32>
    %c0_84 = arith.constant 0 : index
    %c0_85 = arith.constant 0 : index
    %112 = vector.load %arg9[%c0_84, %c0_85] : memref<256x128xf32, #tpu.memory_space<vmem>>, vector<256x128xf32>
    %c7_86 = arith.constant 7 : index
    %c0_87 = arith.constant 0 : index
    %c0_88 = arith.constant 0 : index
    %113 = vector.load %arg4[%c7_86, %c0_87, %c0_88] : memref<9x128x128xf32, #tpu.memory_space<vmem>>, vector<1x128x128xf32>
    %114 = vector.shape_cast %113 : vector<1x128x128xf32> to vector<128x128xf32>
    %cst_89 = arith.constant dense<0.000000e+00> : vector<256x128xf32>
    %115 = tpu.matmul %111, %114, %cst_89 {dimension_numbers = #tpu.dot_dimension_numbers<[1], [0], [0], [1], [0, 0, 1, 1], [], []>} : vector<256x128xf32>, vector<128x128xf32>, vector<256x128xf32> -> vector<256x128xf32>
    %116 = arith.addf %112, %115 : vector<256x128xf32>
    %c0_90 = arith.constant 0 : index
    %c0_91 = arith.constant 0 : index
    %117 = vector.load %arg9[%c0_90, %c0_91] : memref<256x128xf32, #tpu.memory_space<vmem>>, vector<256x128xf32>
    tpu.vector_store %arg9[%c0_90, %c0_91], %116 {strides = array<i32>} : memref<256x128xf32, #tpu.memory_space<vmem>>, vector<256x128xf32>,
    %c41 = arith.constant 41 : index
    %c0_92 = arith.constant 0 : index
    %118 = vector.load %arg8[%c41, %c0_92] : memref<304x128xf32, #tpu.memory_space<vmem>>, vector<256x128xf32>
    %c14_i32_93 = arith.constant 14 : i32
    %119 = vector.broadcast %c14_i32_93 : i32 to vector<256x1xi32>
    %120 = arith.cmpi sle, %31, %119 : vector<256x1xi32>
    %cst_94 = arith.constant 0.000000e+00 : f32
    %121 = vector.shape_cast %120 : vector<256x1xi1> to vector<256x1xi1>
    %122 = vector.broadcast %121 : vector<256x1xi1> to vector<256x128xi1>
    %123 = vector.broadcast %cst_94 : f32 to vector<256x128xf32>
    %124 = arith.select %122, %118, %123 : vector<256x128xi1>, vector<256x128xf32>
    %c0_95 = arith.constant 0 : index
    %c0_96 = arith.constant 0 : index
    %125 = vector.load %arg9[%c0_95, %c0_96] : memref<256x128xf32, #tpu.memory_space<vmem>>, vector<256x128xf32>
    %c8_97 = arith.constant 8 : index
    %c0_98 = arith.constant 0 : index
    %c0_99 = arith.constant 0 : index
    %126 = vector.load %arg4[%c8_97, %c0_98, %c0_99] : memref<9x128x128xf32, #tpu.memory_space<vmem>>, vector<1x128x128xf32>
    %127 = vector.shape_cast %126 : vector<1x128x128xf32> to vector<128x128xf32>
    %cst_100 = arith.constant dense<0.000000e+00> : vector<256x128xf32>
    %128 = tpu.matmul %124, %127, %cst_100 {dimension_numbers = #tpu.dot_dimension_numbers<[1], [0], [0], [1], [0, 0, 1, 1], [], []>} : vector<256x128xf32>, vector<128x128xf32>, vector<256x128xf32> -> vector<256x128xf32>
    %129 = arith.addf %125, %128 : vector<256x128xf32>
    %c0_101 = arith.constant 0 : index
    %c0_102 = arith.constant 0 : index
    %130 = vector.load %arg9[%c0_101, %c0_102] : memref<256x128xf32, #tpu.memory_space<vmem>>, vector<256x128xf32>
    tpu.vector_store %arg9[%c0_101, %c0_102], %129 {strides = array<i32>} : memref<256x128xf32, #tpu.memory_space<vmem>>, vector<256x128xf32>,
    %c0_103 = arith.constant 0 : index
    %c0_104 = arith.constant 0 : index
    %131 = vector.load %arg9[%c0_103, %c0_104] : memref<256x128xf32, #tpu.memory_space<vmem>>, vector<256x128xf32>
    %c0_105 = arith.constant 0 : index
    %c0_106 = arith.constant 0 : index
    %c0_107 = arith.constant 0 : index
    %132 = vector.load %arg5[%c0_105, %c0_106, %c0_107] : memref<1x256x128xf32, #tpu.memory_space<vmem>>, vector<1x256x128xf32>
    %133 = vector.shape_cast %132 : vector<1x256x128xf32> to vector<256x128xf32>
    %134 = vector.shape_cast %131 : vector<256x128xf32> to vector<1x256x128xf32>
    tpu.vector_store %arg5[%c0_105, %c0_106, %c0_107], %134 {strides = array<i32>} : memref<1x256x128xf32, #tpu.memory_space<vmem>>, vector<1x256x128xf32>,
    %cst_108 = arith.constant dense<0.000000e+00> : vector<128xf32>
    %135 = vector.multi_reduction <add>, %131, %cst_108 [0] : vector<256x128xf32> to vector<128xf32>
    %136 = vector.shape_cast %135 : vector<128xf32> to vector<1x128xf32>
    %137 = arith.mulf %131, %131 : vector<256x128xf32>
    %cst_109 = arith.constant dense<0.000000e+00> : vector<128xf32>
    %138 = vector.multi_reduction <add>, %137, %cst_109 [0] : vector<256x128xf32> to vector<128xf32>
    %139 = vector.shape_cast %138 : vector<128xf32> to vector<1x128xf32>
    %140 = vector.shape_cast %136 : vector<1x128xf32> to vector<1x128xf32>
    %141 = vector.broadcast %140 : vector<1x128xf32> to vector<8x128xf32>
    %c0_110 = arith.constant 0 : index
    %c0_111 = arith.constant 0 : index
    %c0_112 = arith.constant 0 : index
    %142 = vector.load %arg6[%c0_110, %c0_111, %c0_112] : memref<1x8x128xf32, #tpu.memory_space<vmem>>, vector<1x8x128xf32>
    %143 = vector.shape_cast %142 : vector<1x8x128xf32> to vector<8x128xf32>
    %144 = vector.shape_cast %141 : vector<8x128xf32> to vector<1x8x128xf32>
    tpu.vector_store %arg6[%c0_110, %c0_111, %c0_112], %144 {strides = array<i32>} : memref<1x8x128xf32, #tpu.memory_space<vmem>>, vector<1x8x128xf32>,
    %145 = vector.shape_cast %139 : vector<1x128xf32> to vector<1x128xf32>
    %146 = vector.broadcast %145 : vector<1x128xf32> to vector<8x128xf32>
    %c0_113 = arith.constant 0 : index
    %c0_114 = arith.constant 0 : index
    %c0_115 = arith.constant 0 : index
    %147 = vector.load %arg7[%c0_113, %c0_114, %c0_115] : memref<1x8x128xf32, #tpu.memory_space<vmem>>, vector<1x8x128xf32>
    %148 = vector.shape_cast %147 : vector<1x8x128xf32> to vector<8x128xf32>
    %149 = vector.shape_cast %146 : vector<8x128xf32> to vector<1x8x128xf32>
    tpu.vector_store %arg7[%c0_113, %c0_114, %c0_115], %149 {strides = array<i32>} : memref<1x8x128xf32, #tpu.memory_space<vmem>>, vector<1x8x128xf32>,
    return
  }
  func.func @transform_0(%arg0: i32) -> (i32, i32, i32) {
    %c0_i32 = arith.constant 0 : i32
    %c0_i32_0 = arith.constant 0 : i32
    %c0_i32_1 = arith.constant 0 : i32
    return %arg0, %c0_i32, %c0_i32_0 : i32, i32, i32
  }
  func.func @transform_1(%arg0: i32) -> (i32, i32) {
    %c0_i32 = arith.constant 0 : i32
    %c0_i32_0 = arith.constant 0 : i32
    %c0_i32_1 = arith.constant 0 : i32
    return %c0_i32, %c0_i32_0 : i32, i32
  }
  func.func @transform_2(%arg0: i32) -> (i32, i32) {
    %c0_i32 = arith.constant 0 : i32
    %c0_i32_0 = arith.constant 0 : i32
    %c0_i32_1 = arith.constant 0 : i32
    return %c0_i32, %c0_i32_0 : i32, i32
  }
  func.func @transform_3(%arg0: i32) -> (i32, i32, i32) {
    %c0_i32 = arith.constant 0 : i32
    %c0_i32_0 = arith.constant 0 : i32
    %c0_i32_1 = arith.constant 0 : i32
    %c0_i32_2 = arith.constant 0 : i32
    return %c0_i32, %c0_i32_0, %c0_i32_1 : i32, i32, i32
  }
  func.func @transform_4(%arg0: i32) -> (i32, i32, i32) {
    %c0_i32 = arith.constant 0 : i32
    %c0_i32_0 = arith.constant 0 : i32
    %c0_i32_1 = arith.constant 0 : i32
    return %arg0, %c0_i32, %c0_i32_0 : i32, i32, i32
  }
  func.func @transform_5(%arg0: i32) -> (i32, i32, i32) {
    %c0_i32 = arith.constant 0 : i32
    %c0_i32_0 = arith.constant 0 : i32
    %c0_i32_1 = arith.constant 0 : i32
    return %arg0, %c0_i32, %c0_i32_0 : i32, i32, i32
  }
  func.func @transform_6(%arg0: i32) -> (i32, i32, i32) {
    %c0_i32 = arith.constant 0 : i32
    %c0_i32_0 = arith.constant 0 : i32
    %c0_i32_1 = arith.constant 0 : i32
    return %arg0, %c0_i32, %c0_i32_0 : i32, i32, i32
  }
}

module attributes {stable_mosaic.version = 11 : i64} {
  func.func @_fused_mm_kernel(%arg0: i32, %arg1: memref<256x128xf32, #tpu.memory_space<vmem>>, %arg2: memref<128x128xf32, #tpu.memory_space<vmem>>, %arg3: memref<1x128xf32, #tpu.memory_space<vmem>>, %arg4: memref<1x128xf32, #tpu.memory_space<vmem>>, %arg5: memref<256x128xf32, #tpu.memory_space<vmem>>, %arg6: memref<1x8x128xf32, #tpu.memory_space<vmem>>, %arg7: memref<1x8x128xf32, #tpu.memory_space<vmem>>) attributes {dimension_semantics = [#tpu.dimension_semantics<parallel>], iteration_bounds = array<i64: 2>, scalar_prefetch = 0 : i64, scratch_operands = 0 : i64, tpu.core_type = #tpu.core_type<tc>, window_params = [{transform_indices = @transform_0, window_bounds = array<i64: 256, 128>}, {pipeline_mode = #tpu.pipeline_mode<synchronous>, transform_indices = @transform_1, window_bounds = array<i64: 128, 128>}, {pipeline_mode = #tpu.pipeline_mode<synchronous>, transform_indices = @transform_2, window_bounds = array<i64: 1, 128>}, {pipeline_mode = #tpu.pipeline_mode<synchronous>, transform_indices = @transform_3, window_bounds = array<i64: 1, 128>}, {transform_indices = @transform_4, window_bounds = array<i64: 256, 128>}, {transform_indices = @transform_5, window_bounds = array<i64: 1, 8, 128>}, {transform_indices = @transform_6, window_bounds = array<i64: 1, 8, 128>}]} {
    %c0 = arith.constant 0 : index
    %c0_0 = arith.constant 0 : index
    %0 = vector.load %arg1[%c0, %c0_0] : memref<256x128xf32, #tpu.memory_space<vmem>>, vector<256x128xf32>
    %c0_1 = arith.constant 0 : index
    %c0_2 = arith.constant 0 : index
    %1 = vector.load %arg3[%c0_1, %c0_2] : memref<1x128xf32, #tpu.memory_space<vmem>>, vector<1x128xf32>
    %2 = vector.broadcast %1 : vector<1x128xf32> to vector<256x128xf32>
    %3 = arith.mulf %0, %2 : vector<256x128xf32>
    %c0_3 = arith.constant 0 : index
    %c0_4 = arith.constant 0 : index
    %4 = vector.load %arg4[%c0_3, %c0_4] : memref<1x128xf32, #tpu.memory_space<vmem>>, vector<1x128xf32>
    %5 = vector.broadcast %4 : vector<1x128xf32> to vector<256x128xf32>
    %6 = arith.addf %3, %5 : vector<256x128xf32>
    %cst = arith.constant 0.000000e+00 : f32
    %7 = vector.broadcast %cst : f32 to vector<256x128xf32>
    %8 = arith.maximumf %6, %7 : vector<256x128xf32>
    %c0_5 = arith.constant 0 : index
    %c0_6 = arith.constant 0 : index
    %9 = vector.load %arg2[%c0_5, %c0_6] : memref<128x128xf32, #tpu.memory_space<vmem>>, vector<128x128xf32>
    %cst_7 = arith.constant dense<0.000000e+00> : vector<256x128xf32>
    %10 = tpu.matmul %8, %9, %cst_7 {dimension_numbers = #tpu.dot_dimension_numbers<[1], [0], [0], [1], [0, 0, 1, 1], [], []>} : vector<256x128xf32>, vector<128x128xf32>, vector<256x128xf32> -> vector<256x128xf32>
    %c0_8 = arith.constant 0 : index
    %c0_9 = arith.constant 0 : index
    %11 = vector.load %arg5[%c0_8, %c0_9] : memref<256x128xf32, #tpu.memory_space<vmem>>, vector<256x128xf32>
    tpu.vector_store %arg5[%c0_8, %c0_9], %10 {strides = array<i32>} : memref<256x128xf32, #tpu.memory_space<vmem>>, vector<256x128xf32>,
    %cst_10 = arith.constant dense<0.000000e+00> : vector<128xf32>
    %12 = vector.multi_reduction <add>, %10, %cst_10 [0] : vector<256x128xf32> to vector<128xf32>
    %13 = vector.shape_cast %12 : vector<128xf32> to vector<1x128xf32>
    %14 = arith.mulf %10, %10 : vector<256x128xf32>
    %cst_11 = arith.constant dense<0.000000e+00> : vector<128xf32>
    %15 = vector.multi_reduction <add>, %14, %cst_11 [0] : vector<256x128xf32> to vector<128xf32>
    %16 = vector.shape_cast %15 : vector<128xf32> to vector<1x128xf32>
    %17 = vector.shape_cast %13 : vector<1x128xf32> to vector<1x128xf32>
    %18 = vector.broadcast %17 : vector<1x128xf32> to vector<8x128xf32>
    %c0_12 = arith.constant 0 : index
    %c0_13 = arith.constant 0 : index
    %c0_14 = arith.constant 0 : index
    %19 = vector.load %arg6[%c0_12, %c0_13, %c0_14] : memref<1x8x128xf32, #tpu.memory_space<vmem>>, vector<1x8x128xf32>
    %20 = vector.shape_cast %19 : vector<1x8x128xf32> to vector<8x128xf32>
    %21 = vector.shape_cast %18 : vector<8x128xf32> to vector<1x8x128xf32>
    tpu.vector_store %arg6[%c0_12, %c0_13, %c0_14], %21 {strides = array<i32>} : memref<1x8x128xf32, #tpu.memory_space<vmem>>, vector<1x8x128xf32>,
    %22 = vector.shape_cast %16 : vector<1x128xf32> to vector<1x128xf32>
    %23 = vector.broadcast %22 : vector<1x128xf32> to vector<8x128xf32>
    %c0_15 = arith.constant 0 : index
    %c0_16 = arith.constant 0 : index
    %c0_17 = arith.constant 0 : index
    %24 = vector.load %arg7[%c0_15, %c0_16, %c0_17] : memref<1x8x128xf32, #tpu.memory_space<vmem>>, vector<1x8x128xf32>
    %25 = vector.shape_cast %24 : vector<1x8x128xf32> to vector<8x128xf32>
    %26 = vector.shape_cast %23 : vector<8x128xf32> to vector<1x8x128xf32>
    tpu.vector_store %arg7[%c0_15, %c0_16, %c0_17], %26 {strides = array<i32>} : memref<1x8x128xf32, #tpu.memory_space<vmem>>, vector<1x8x128xf32>,
    return
  }
  func.func @transform_0(%arg0: i32) -> (i32, i32) {
    %c0_i32 = arith.constant 0 : i32
    %c0_i32_0 = arith.constant 0 : i32
    return %arg0, %c0_i32 : i32, i32
  }
  func.func @transform_1(%arg0: i32) -> (i32, i32) {
    %c0_i32 = arith.constant 0 : i32
    %c0_i32_0 = arith.constant 0 : i32
    %c0_i32_1 = arith.constant 0 : i32
    return %c0_i32, %c0_i32_0 : i32, i32
  }
  func.func @transform_2(%arg0: i32) -> (i32, i32) {
    %c0_i32 = arith.constant 0 : i32
    %c0_i32_0 = arith.constant 0 : i32
    %c0_i32_1 = arith.constant 0 : i32
    return %c0_i32, %c0_i32_0 : i32, i32
  }
  func.func @transform_3(%arg0: i32) -> (i32, i32) {
    %c0_i32 = arith.constant 0 : i32
    %c0_i32_0 = arith.constant 0 : i32
    %c0_i32_1 = arith.constant 0 : i32
    return %c0_i32, %c0_i32_0 : i32, i32
  }
  func.func @transform_4(%arg0: i32) -> (i32, i32) {
    %c0_i32 = arith.constant 0 : i32
    %c0_i32_0 = arith.constant 0 : i32
    return %arg0, %c0_i32 : i32, i32
  }
  func.func @transform_5(%arg0: i32) -> (i32, i32, i32) {
    %c0_i32 = arith.constant 0 : i32
    %c0_i32_0 = arith.constant 0 : i32
    %c0_i32_1 = arith.constant 0 : i32
    return %arg0, %c0_i32, %c0_i32_0 : i32, i32, i32
  }
  func.func @transform_6(%arg0: i32) -> (i32, i32, i32) {
    %c0_i32 = arith.constant 0 : i32
    %c0_i32_0 = arith.constant 0 : i32
    %c0_i32_1 = arith.constant 0 : i32
    return %arg0, %c0_i32, %c0_i32_0 : i32, i32, i32
  }
}

module attributes {stable_mosaic.version = 11 : i64} {
  func.func @_bn_add_relu_kernel(%arg0: i32, %arg1: memref<256x128xf32, #tpu.memory_space<vmem>>, %arg2: memref<1x128xf32, #tpu.memory_space<vmem>>, %arg3: memref<1x128xf32, #tpu.memory_space<vmem>>, %arg4: memref<256x128xf32, #tpu.memory_space<vmem>>, %arg5: memref<256x128xf32, #tpu.memory_space<vmem>>) attributes {dimension_semantics = [#tpu.dimension_semantics<parallel>], iteration_bounds = array<i64: 2>, scalar_prefetch = 0 : i64, scratch_operands = 0 : i64, tpu.core_type = #tpu.core_type<tc>, window_params = [{transform_indices = @transform_0, window_bounds = array<i64: 256, 128>}, {pipeline_mode = #tpu.pipeline_mode<synchronous>, transform_indices = @transform_1, window_bounds = array<i64: 1, 128>}, {pipeline_mode = #tpu.pipeline_mode<synchronous>, transform_indices = @transform_2, window_bounds = array<i64: 1, 128>}, {transform_indices = @transform_3, window_bounds = array<i64: 256, 128>}, {transform_indices = @transform_4, window_bounds = array<i64: 256, 128>}]} {
    %c0 = arith.constant 0 : index
    %c0_0 = arith.constant 0 : index
    %0 = vector.load %arg1[%c0, %c0_0] : memref<256x128xf32, #tpu.memory_space<vmem>>, vector<256x128xf32>
    %c0_1 = arith.constant 0 : index
    %c0_2 = arith.constant 0 : index
    %1 = vector.load %arg2[%c0_1, %c0_2] : memref<1x128xf32, #tpu.memory_space<vmem>>, vector<1x128xf32>
    %2 = vector.broadcast %1 : vector<1x128xf32> to vector<256x128xf32>
    %3 = arith.mulf %0, %2 : vector<256x128xf32>
    %c0_3 = arith.constant 0 : index
    %c0_4 = arith.constant 0 : index
    %4 = vector.load %arg3[%c0_3, %c0_4] : memref<1x128xf32, #tpu.memory_space<vmem>>, vector<1x128xf32>
    %5 = vector.broadcast %4 : vector<1x128xf32> to vector<256x128xf32>
    %6 = arith.addf %3, %5 : vector<256x128xf32>
    %c0_5 = arith.constant 0 : index
    %c0_6 = arith.constant 0 : index
    %7 = vector.load %arg4[%c0_5, %c0_6] : memref<256x128xf32, #tpu.memory_space<vmem>>, vector<256x128xf32>
    %8 = arith.addf %6, %7 : vector<256x128xf32>
    %cst = arith.constant 0.000000e+00 : f32
    %9 = vector.broadcast %cst : f32 to vector<256x128xf32>
    %10 = arith.maximumf %8, %9 : vector<256x128xf32>
    %c0_7 = arith.constant 0 : index
    %c0_8 = arith.constant 0 : index
    %11 = vector.load %arg5[%c0_7, %c0_8] : memref<256x128xf32, #tpu.memory_space<vmem>>, vector<256x128xf32>
    tpu.vector_store %arg5[%c0_7, %c0_8], %10 {strides = array<i32>} : memref<256x128xf32, #tpu.memory_space<vmem>>, vector<256x128xf32>,
    return
  }
  func.func @transform_0(%arg0: i32) -> (i32, i32) {
    %c0_i32 = arith.constant 0 : i32
    %c0_i32_0 = arith.constant 0 : i32
    return %arg0, %c0_i32 : i32, i32
  }
  func.func @transform_1(%arg0: i32) -> (i32, i32) {
    %c0_i32 = arith.constant 0 : i32
    %c0_i32_0 = arith.constant 0 : i32
    %c0_i32_1 = arith.constant 0 : i32
    return %c0_i32, %c0_i32_0 : i32, i32
  }
  func.func @transform_2(%arg0: i32) -> (i32, i32) {
    %c0_i32 = arith.constant 0 : i32
    %c0_i32_0 = arith.constant 0 : i32
    %c0_i32_1 = arith.constant 0 : i32
    return %c0_i32, %c0_i32_0 : i32, i32
  }
  func.func @transform_3(%arg0: i32) -> (i32, i32) {
    %c0_i32 = arith.constant 0 : i32
    %c0_i32_0 = arith.constant 0 : i32
    return %arg0, %c0_i32 : i32, i32
  }
  func.func @transform_4(%arg0: i32) -> (i32, i32) {
    %c0_i32 = arith.constant 0 : i32
    %c0_i32_0 = arith.constant 0 : i32
    return %arg0, %c0_i32 : i32, i32
  }
}

</mosaic_0001>

<bundles_post_ra>
// kernel: bottleneck_forward.4
= control target key start
LH: loop header
LB: loop body
LE: loop exit
PB: predicated region body
PF: predicated region fallthrough
CT: control target
= control target key end

     0   :  { %s1031_s21 = smov 0   ;;  %s1254_s0 = inlined_call_operand.vmem [shape: f32[512,128], index: 0, kind: input, shape index: {}]   ;;  %s1255_s1 = inlined_call_operand.vmem [shape: f32[128,128], index: 1, kind: input, shape index: {}]   ;;  %s1256_s2 = inlined_call_operand.vmem [shape: f32[1,128], index: 2, kind: input, shape index: {}]   ;;  %s1257_s3 = inlined_call_operand.vmem [shape: f32[1,128], index: 3, kind: input, shape index: {}]   ;;  %s1258_s4 = inlined_call_operand.vmem [shape: f32[512,128], index: 4, kind: output, shape index: {0}]   ;;  %s1259_s5 = inlined_call_operand.vmem [shape: f32[2,8,128], index: 5, kind: output, shape index: {1}]   ;;  %s1260_s6 = inlined_call_operand.vmem [shape: f32[2,8,128], index: 6, kind: output, shape index: {2}]  }
   0x1 LB: > { %s1037_s2 = sadd.s32 4294967295, %s994_s21   ;;  %p811_p0 = scmp.ge.s32.totalorder %s994_s21, 1  ;;  %s994_s21 = sphi %s1031_s21, %s17_s21  }
   0x2   : > { %p218_p1 = scmp.lt.s32.totalorder %s994_s21, 3 }
   0x4   : > { %p219_p2 = pnand %p811_p0, %p218_p1 }
   0x5   : > { %s812_s25 = sshll.u32 (!%p219_p2), %s1037_s2, 5  ;;  %p268_p4 = scmp.lt.s32.totalorder (!%p219_p2), %s1037_s2, 1 }
   0x6   : > { %222 = sbr.rel (%p219_p2) target bundleno = 318 (0x13e), region = 36  ;;  %p257_p3 = scmp.lt.s32.totalorder (!%p219_p2), %s812_s25, 63 }
   0xb   : > { %v323_v0 = vld [vmem:[%s1255_s1 + $0x78] sm:$0xff]  ;;  %v322_v1 = vld [vmem:[%s1255_s1 + $0x70] sm:$0xff]  ;;  %v321_v2 = vld [vmem:[%s1255_s1 + $0x68] sm:$0xff]  ;;  %s1262_s25 = smov (!%p257_p3, %s812_s25), 63  ;;  %s1264_s2 = smov (!%p268_p4, %s1037_s2), 1 }
   0xc   : > { %868 = vmatprep.subr.mxu0 %v323_v0  ;;  %948 = vmatprep.subr.mxu1 %v323_v0  ;;  %v320_v3 = vld [vmem:[%s1255_s1 + $0x60] sm:$0xff]  ;;  %s813_s30 = sshll.u32 %s1262_s25, 3  ;;  %v319_v4 = vld [vmem:[%s1255_s1 + $0x58] sm:$0xff]  ;;  %v318_v6 = vld [vmem:[%s1255_s1 + $0x50] sm:$0xff]  ;;  %s816_s25 = sshll.u32 %s1264_s2, 3 }
   0xd   : > { %869 = vmatpush3.msra.mxu0 %v323_v0  ;;  %964 = vmatpush3.msra.mxu1 %v323_v0  ;;  %s1065_s11 = scalar_lea.vmem %s1254_s0, %s813_s30  ;;  %v317_v7 = vld [vmem:[%s1255_s1 + $0x48] sm:$0xff]  ;;  %v316_v8 = vld [vmem:[%s1255_s1 + $0x40] sm:$0xff]  ;;  %v315_v9 = vld [vmem:[%s1255_s1 + $0x38] sm:$0xff]  ;;  %s1137_s15 = scalar_lea.vmem %s1258_s4, %s813_s30 }
   0xe   : > { %870 = vmatprep.subr.mxu0 %v322_v1  ;;  %949 = vmatprep.subr.mxu1 %v322_v1  ;;  %v276_v5 = vld [vmem:[%s1065_s11] sm:$0xff]  ;;  %v314_v10 = vld [vmem:[%s1255_s1 + $0x30] sm:$0xff]  ;;  %v313_v11 = vld [vmem:[%s1255_s1 + $0x28] sm:$0xff]  ;;  %s271_s16 = scalar_lea.vmem %s1259_s5, %s816_s25  ;;  %s275_s19 = scalar_lea.vmem %s1260_s6, %s816_s25 }
   0xf   : > { %871 = vmatpush3.msra.mxu0 %v322_v1  ;;  %965 = vmatpush3.msra.mxu1 %v322_v1  ;;  %v312_v12 = vld [vmem:[%s1255_s1 + $0x20] sm:$0xff]  ;;  %v311_v13 = vld [vmem:[%s1255_s1 + $0x18] sm:$0xff]  ;;  %v310_v14 = vld [vmem:[%s1255_s1 + $0x10] sm:$0xff] }
  0x10   : > { %872 = vmatprep.subr.mxu0 %v321_v2  ;;  %950 = vmatprep.subr.mxu1 %v321_v2  ;;  %v309_v15 = vld [vmem:[%s1255_s1 + $0x8] sm:$0xff]  ;;  %v308_v16 = vld [vmem:[%s1255_s1] sm:$0xff]  ;;  %v278_v18 = vld [vmem:[%s1065_s11 + $0x10] sm:$0xff] }
  0x11   : > { %873 = vmatpush3.msra.mxu0 %v321_v2  ;;  %966 = vmatpush3.msra.mxu1 %v321_v2  ;;  %v277_v17 = vld [vmem:[%s1065_s11 + $0x8] sm:$0xff]  ;;  %v292_v19 = vld [vmem:[%s1065_s11 + $0x80] sm:$0xff]  ;;  %v294_v21 = vld [vmem:[%s1065_s11 + $0x90] sm:$0xff] }
  0x12   : > { %874 = vmatprep.subr.mxu0 %v320_v3  ;;  %951 = vmatprep.subr.mxu1 %v320_v3  ;;  %v293_v20 = vld [vmem:[%s1065_s11 + $0x88] sm:$0xff]  ;;  %v279_v22 = vld [vmem:[%s1065_s11 + $0x18] sm:$0xff]  ;;  %v280_v23 = vld [vmem:[%s1065_s11 + $0x20] sm:$0xff] }
  0x13   : > { %875 = vmatpush3.msra.mxu0 %v320_v3  ;;  %900 = vmatprep.mubr.f32.mxu0 %v276_v5  ;;  %v295_v24 = vld [vmem:[%s1065_s11 + $0x98] sm:$0xff]  ;;  %v296_v25 = vld [vmem:[%s1065_s11 + $0xa0] sm:$0xff]  ;;  %v281_v26 = vld [vmem:[%s1065_s11 + $0x28] sm:$0xff] }
  0x14   : > { %876 = vmatprep.subr.mxu0 %v319_v4  ;;  %967 = vmatpush3.msra.mxu1 %v320_v3  ;;  %v282_v27 = vld [vmem:[%s1065_s11 + $0x30] sm:$0xff]  ;;  %v297_v28 = vld [vmem:[%s1065_s11 + $0xa8] sm:$0xff]  ;;  %v283_v30 = vld [vmem:[%s1065_s11 + $0x38] sm:$0xff] }
  0x15   : > { %877 = vmatpush3.msra.mxu0 %v319_v4  ;;  %952 = vmatprep.subr.mxu1 %v319_v4  ;;  %v298_v29 = vld [vmem:[%s1065_s11 + $0xb0] sm:$0xff]  ;;  %v284_v31 = vld [vmem:[%s1065_s11 + $0x40] sm:$0xff]  ;;  %v299_v32 = vld [vmem:[%s1065_s11 + $0xb8] sm:$0xff] }
  0x16   : > { %878 = vmatprep.subr.mxu0 %v318_v6  ;;  %968 = vmatpush3.msra.mxu1 %v319_v4  ;;  %v300_v33 = vld [vmem:[%s1065_s11 + $0xc0] sm:$0xff]  ;;  %v285_v34 = vld [vmem:[%s1065_s11 + $0x48] sm:$0xff]  ;;  %v286_v35 = vld [vmem:[%s1065_s11 + $0x50] sm:$0xff] }
  0x17   : > { %879 = vmatpush3.msra.mxu0 %v318_v6  ;;  %953 = vmatprep.subr.mxu1 %v318_v6  ;;  %v301_v36 = vld [vmem:[%s1065_s11 + $0xc8] sm:$0xff]  ;;  %v302_v37 = vld [vmem:[%s1065_s11 + $0xd0] sm:$0xff]  ;;  %v287_v38 = vld [vmem:[%s1065_s11 + $0x58] sm:$0xff] }
  0x18   : > { %880 = vmatprep.subr.mxu0 %v317_v7  ;;  %969 = vmatpush3.msra.mxu1 %v318_v6  ;;  %v288_v39 = vld [vmem:[%s1065_s11 + $0x60] sm:$0xff]  ;;  %v303_v40 = vld [vmem:[%s1065_s11 + $0xd8] sm:$0xff]  ;;  %v289_v42 = vld [vmem:[%s1065_s11 + $0x68] sm:$0xff] }
  0x19   : > { %881 = vmatpush3.msra.mxu0 %v317_v7  ;;  %954 = vmatprep.subr.mxu1 %v317_v7  ;;  %v304_v41 = vld [vmem:[%s1065_s11 + $0xe0] sm:$0xff]  ;;  %v290_v43 = vld [vmem:[%s1065_s11 + $0x70] sm:$0xff]  ;;  %v305_v44 = vld [vmem:[%s1065_s11 + $0xe8] sm:$0xff] }
  0x1a   : > { %882 = vmatprep.subr.mxu0 %v316_v8  ;;  %970 = vmatpush3.msra.mxu1 %v317_v7  ;;  %v306_v45 = vld [vmem:[%s1065_s11 + $0xf0] sm:$0xff]  ;;  %v291_v46 = vld [vmem:[%s1065_s11 + $0x78] sm:$0xff] }
  0x1b   : > { %883 = vmatpush3.msra.mxu0 %v316_v8  ;;  %955 = vmatprep.subr.mxu1 %v316_v8  ;;  %v307_v47 = vld [vmem:[%s1065_s11 + $0xf8] sm:$0xff] }
  0x1c   : > { %884 = vmatprep.subr.mxu0 %v315_v9  ;;  %971 = vmatpush3.msra.mxu1 %v316_v8 }
  0x1d   : > { %885 = vmatpush3.msra.mxu0 %v315_v9  ;;  %956 = vmatprep.subr.mxu1 %v315_v9 }
  0x1e   : > { %886 = vmatprep.subr.mxu0 %v314_v10  ;;  %972 = vmatpush3.msra.mxu1 %v315_v9 }
  0x1f   : > { %887 = vmatpush3.msra.mxu0 %v314_v10  ;;  %957 = vmatprep.subr.mxu1 %v314_v10 }
  0x20   : > { %888 = vmatprep.subr.mxu0 %v313_v11  ;;  %973 = vmatpush3.msra.mxu1 %v314_v10 }
  0x21   : > { %889 = vmatpush3.msra.mxu0 %v313_v11  ;;  %958 = vmatprep.subr.mxu1 %v313_v11 }
  0x22   : > { %890 = vmatprep.subr.mxu0 %v312_v12  ;;  %974 = vmatpush3.msra.mxu1 %v313_v11 }
  0x23   : > { %891 = vmatpush3.msra.mxu0 %v312_v12  ;;  %959 = vmatprep.subr.mxu1 %v312_v12 }
  0x24   : > { %892 = vmatprep.subr.mxu0 %v311_v13  ;;  %975 = vmatpush3.msra.mxu1 %v312_v12 }
  0x25   : > { %893 = vmatpush3.msra.mxu0 %v311_v13  ;;  %960 = vmatprep.subr.mxu1 %v311_v13 }
  0x26   : > { %894 = vmatprep.subr.mxu0 %v310_v14  ;;  %976 = vmatpush3.msra.mxu1 %v311_v13 }
  0x27   : > { %895 = vmatpush3.msra.mxu0 %v310_v14  ;;  %961 = vmatprep.subr.mxu1 %v310_v14 }
  0x28   : > { %896 = vmatprep.subr.mxu0 %v309_v15  ;;  %977 = vmatpush3.msra.mxu1 %v310_v14 }
  0x29   : > { %897 = vmatpush3.msra.mxu0 %v309_v15  ;;  %962 = vmatprep.subr.mxu1 %v309_v15 }
  0x2a   : > { %898 = vmatprep.subr.mxu0 %v308_v16  ;;  %978 = vmatpush3.msra.mxu1 %v309_v15 }
  0x2b   : > { %899 = vmatpush3.msra.mxu0 %v308_v16  ;;  %963 = vmatprep.subr.mxu1 %v308_v16 }
  0x2c   : > { %901 = vmatmul.mubr.f32.vlgmr.msra.gmra.mxu0 %v277_v17  ;;  %979 = vmatpush3.msra.mxu1 %v308_v16 }
  0x2d   : > { %903 = vmatprep.mubr.f32.mxu0 %v278_v18  ;;  %924 = vmatprep.mubr.f32.mxu1 %v292_v19 }
  0x2e   : > { %925 = vmatmul.mubr.f32.vlgmr.msra.gmra.mxu1 %v293_v20 }
  0x2f   : > { %927 = vmatprep.mubr.f32.mxu1 %v294_v21 }
  0x30   : > { %904 = vmatmul.mubr.f32.gmra.mxu0 %v279_v22 }
  0x31   : > { %906 = vmatprep.mubr.f32.mxu0 %v280_v23 }
  0x32   : > { %928 = vmatmul.mubr.f32.gmra.mxu1 %v295_v24 }
  0x33   : > { %930 = vmatprep.mubr.f32.mxu1 %v296_v25 }
  0x34   : > { %907 = vmatmul.mubr.f32.gmra.mxu0 %v281_v26 }
  0x35   : > { %909 = vmatprep.mubr.f32.mxu0 %v282_v27 }
  0x36   : > { %931 = vmatmul.mubr.f32.gmra.mxu1 %v297_v28 }
  0x37   : > { %933 = vmatprep.mubr.f32.mxu1 %v298_v29 }
  0x38   : > { %910 = vmatmul.mubr.f32.gmra.mxu0 %v283_v30 }
  0x39   : > { %912 = vmatprep.mubr.f32.mxu0 %v284_v31 }
  0x3a   : > { %934 = vmatmul.mubr.f32.gmra.mxu1 %v299_v32 }
  0x3b   : > { %936 = vmatprep.mubr.f32.mxu1 %v300_v33 }
  0x3c   : > { %913 = vmatmul.mubr.f32.gmra.mxu0 %v285_v34 }
  0x3d   : > { %915 = vmatprep.mubr.f32.mxu0 %v286_v35 }
  0x3e   : > { %937 = vmatmul.mubr.f32.gmra.mxu1 %v301_v36 }
  0x3f   : > { %939 = vmatprep.mubr.f32.mxu1 %v302_v37 }
  0x40   : > { %916 = vmatmul.mubr.f32.gmra.mxu0 %v287_v38 }
  0x41   : > { %918 = vmatprep.mubr.f32.mxu0 %v288_v39 }
  0x42   : > { %940 = vmatmul.mubr.f32.gmra.mxu1 %v303_v40 }
  0x43   : > { %942 = vmatprep.mubr.f32.mxu1 %v304_v41 }
  0x44   : > { %919 = vmatmul.mubr.f32.gmra.mxu0 %v289_v42 }
  0x45   : > { %921 = vmatprep.mubr.f32.mxu0 %v290_v43 }
  0x46   : > { %943 = vmatmul.mubr.f32.gmra.mxu1 %v305_v44 }
  0x47   : > { %945 = vmatprep.mubr.f32.mxu1 %v306_v45 }
  0x48   : > { %922 = vmatmul.mubr.f32.gmra.mxu0 %v291_v46 }
  0x4a   : > { %946 = vmatmul.mubr.f32.gmra.mxu1 %v307_v47 }
  0xec   : > { %v902_v48 = vpop.f32.mrf.mxu0 }
  0xed   : > { %550 = vst [vmem:[%s1137_s15 + $0x8] sm:$0xff] %v902_v48  ;;  %v619_v54 = vmul.f32 %v902_v48, %v902_v48 }
  0xee   : > { %v390_v49 = vpop.f32.mrf.mxu0  ;;  %v1140_v50 = vpop.f32.mrf.mxu1 }
  0xef   : > { %549 = vst [vmem:[%s1137_s15] sm:$0xff] %v390_v49  ;;  %v618_v51 = vmul.f32 %v390_v49, %v390_v49  ;;  %566 = vst [vmem:[%s1137_s15 + $0x88] sm:$0xff] %v1140_v50  ;;  %v581_v55 = vadd.f32 %v902_v48, %v390_v49 }
  0xf0   : > { %v905_v52 = vpop.f32.mrf.mxu0  ;;  %v1145_v53 = vpop.f32.mrf.mxu1 }
  0xf1   : > { %552 = vst [vmem:[%s1137_s15 + $0x18] sm:$0xff] %v905_v52  ;;  %565 = vst [vmem:[%s1137_s15 + $0x80] sm:$0xff] %v1145_v53  ;;  %v650_v58 = vadd.f32 %v619_v54, %v618_v51  ;;  %v621_v63 = vmul.f32 %v905_v52, %v905_v52 }
  0xf2   : > { %v400_v56 = vpop.f32.mrf.mxu0  ;;  %v1150_v57 = vpop.f32.mrf.mxu1 }
  0xf3   : > { %551 = vst [vmem:[%s1137_s15 + $0x10] sm:$0xff] %v400_v56  ;;  %v582_v59 = vadd.f32 %v581_v55, %v400_v56  ;;  %v620_v60 = vmul.f32 %v400_v56, %v400_v56  ;;  %568 = vst [vmem:[%s1137_s15 + $0x98] sm:$0xff] %v1150_v57 }
  0xf4   : > { %v908_v61 = vpop.f32.mrf.mxu0  ;;  %v1155_v62 = vpop.f32.mrf.mxu1 }
  0xf5   : > { %v651_v0 = vadd.f32 %v650_v58, %v620_v60  ;;  %554 = vst [vmem:[%s1137_s15 + $0x28] sm:$0xff] %v908_v61  ;;  %v583_v1 = vadd.f32 %v905_v52, %v582_v59  ;;  %567 = vst [vmem:[%s1137_s15 + $0x90] sm:$0xff] %v1155_v62  ;;  %v623_v9 = vmul.f32 %v908_v61, %v908_v61 }
  0xf6   : > { %v410_v2 = vpop.f32.mrf.mxu0  ;;  %v1160_v3 = vpop.f32.mrf.mxu1 }
  0xf7   : > { %553 = vst [vmem:[%s1137_s15 + $0x20] sm:$0xff] %v410_v2  ;;  %v584_v4 = vadd.f32 %v583_v1, %v410_v2  ;;  %v622_v5 = vmul.f32 %v410_v2, %v410_v2  ;;  %v652_v6 = vadd.f32 %v651_v0, %v621_v63  ;;  %570 = vst [vmem:[%s1137_s15 + $0xa8] sm:$0xff] %v1160_v3 }
  0xf8   : > { %v911_v7 = vpop.f32.mrf.mxu0  ;;  %v1165_v8 = vpop.f32.mrf.mxu1 }
  0xf9   : > { %v653_v10 = vadd.f32 %v652_v6, %v622_v5  ;;  %556 = vst [vmem:[%s1137_s15 + $0x38] sm:$0xff] %v911_v7  ;;  %v585_v11 = vadd.f32 %v908_v61, %v584_v4  ;;  %569 = vst [vmem:[%s1137_s15 + $0xa0] sm:$0xff] %v1165_v8  ;;  %v625_v19 = vmul.f32 %v911_v7, %v911_v7 }
  0xfa   : > { %v420_v12 = vpop.f32.mrf.mxu0  ;;  %v1170_v13 = vpop.f32.mrf.mxu1  ;;  %v634_v4 = vmul.f32 %v1145_v53, %v1145_v53  ;;  %v635_v5 = vmul.f32 %v1140_v50, %v1140_v50 }
  0xfb   : > { %555 = vst [vmem:[%s1137_s15 + $0x30] sm:$0xff] %v420_v12  ;;  %v586_v14 = vadd.f32 %v585_v11, %v420_v12  ;;  %v624_v15 = vmul.f32 %v420_v12, %v420_v12  ;;  %v654_v16 = vadd.f32 %v653_v10, %v623_v9  ;;  %572 = vst [vmem:[%s1137_s15 + $0xb8] sm:$0xff] %v1170_v13 }
  0xfc   : > { %v914_v17 = vpop.f32.mrf.mxu0  ;;  %v1175_v18 = vpop.f32.mrf.mxu1  ;;  %v636_v10 = vmul.f32 %v1155_v62, %v1155_v62  ;;  %v637_v12 = vmul.f32 %v1150_v57, %v1150_v57 }
  0xfd   : > { %v655_v20 = vadd.f32 %v654_v16, %v624_v15  ;;  %558 = vst [vmem:[%s1137_s15 + $0x48] sm:$0xff] %v914_v17  ;;  %v587_v21 = vadd.f32 %v911_v7, %v586_v14  ;;  %571 = vst [vmem:[%s1137_s15 + $0xb0] sm:$0xff] %v1175_v18  ;;  %v627_v29 = vmul.f32 %v914_v17, %v914_v17 }
  0xfe   : > { %v430_v22 = vpop.f32.mrf.mxu0  ;;  %v1180_v23 = vpop.f32.mrf.mxu1  ;;  %v638_v16 = vmul.f32 %v1165_v8, %v1165_v8 }
  0xff   : > { %557 = vst [vmem:[%s1137_s15 + $0x40] sm:$0xff] %v430_v22  ;;  %v588_v24 = vadd.f32 %v587_v21, %v430_v22  ;;  %v626_v25 = vmul.f32 %v430_v22, %v430_v22  ;;  %v656_v26 = vadd.f32 %v655_v20, %v625_v19  ;;  %574 = vst [vmem:[%s1137_s15 + $0xc8] sm:$0xff] %v1180_v23 }
 0x100   : > { %v917_v27 = vpop.f32.mrf.mxu0  ;;  %v1185_v28 = vpop.f32.mrf.mxu1  ;;  %v640_v21 = vmul.f32 %v1175_v18, %v1175_v18 }
 0x101   : > { %v657_v30 = vadd.f32 %v656_v26, %v626_v25  ;;  %560 = vst [vmem:[%s1137_s15 + $0x58] sm:$0xff] %v917_v27  ;;  %v589_v31 = vadd.f32 %v914_v17, %v588_v24  ;;  %573 = vst [vmem:[%s1137_s15 + $0xc0] sm:$0xff] %v1185_v28  ;;  %v629_v39 = vmul.f32 %v917_v27, %v917_v27 }
 0x102   : > { %v440_v32 = vpop.f32.mrf.mxu0  ;;  %v1190_v33 = vpop.f32.mrf.mxu1  ;;  %v642_v26 = vmul.f32 %v1185_v28, %v1185_v28 }
 0x103   : > { %559 = vst [vmem:[%s1137_s15 + $0x50] sm:$0xff] %v440_v32  ;;  %v590_v34 = vadd.f32 %v589_v31, %v440_v32  ;;  %v628_v35 = vmul.f32 %v440_v32, %v440_v32  ;;  %v658_v36 = vadd.f32 %v657_v30, %v627_v29  ;;  %576 = vst [vmem:[%s1137_s15 + $0xd8] sm:$0xff] %v1190_v33 }
 0x104   : > { %v920_v37 = vpop.f32.mrf.mxu0  ;;  %v520_v38 = vpop.f32.mrf.mxu1 }
 0x105   : > { %v659_v40 = vadd.f32 %v658_v36, %v628_v35  ;;  %562 = vst [vmem:[%s1137_s15 + $0x68] sm:$0xff] %v920_v37  ;;  %v591_v41 = vadd.f32 %v917_v27, %v590_v34  ;;  %575 = vst [vmem:[%s1137_s15 + $0xd0] sm:$0xff] %v520_v38  ;;  %v631_v49 = vmul.f32 %v920_v37, %v920_v37 }
 0x106   : > { %v450_v42 = vpop.f32.mrf.mxu0  ;;  %v1197_v43 = vpop.f32.mrf.mxu1  ;;  %v644_v31 = vmul.f32 %v520_v38, %v520_v38  ;;  %v645_v34 = vmul.f32 %v1190_v33, %v1190_v33 }
 0x107   : > { %561 = vst [vmem:[%s1137_s15 + $0x60] sm:$0xff] %v450_v42  ;;  %v592_v44 = vadd.f32 %v591_v41, %v450_v42  ;;  %v630_v45 = vmul.f32 %v450_v42, %v450_v42  ;;  %v660_v46 = vadd.f32 %v659_v40, %v629_v39  ;;  %578 = vst [vmem:[%s1137_s15 + $0xe8] sm:$0xff] %v1197_v43 }
 0x108   : > { %v923_v47 = vpop.f32.mrf.mxu0  ;;  %v530_v48 = vpop.f32.mrf.mxu1  ;;  %v647_v39 = vmul.f32 %v1197_v43, %v1197_v43 }
 0x109   : > { %v661_v51 = vadd.f32 %v660_v46, %v630_v45  ;;  %564 = vst [vmem:[%s1137_s15 + $0x78] sm:$0xff] %v923_v47  ;;  %v593_v52 = vadd.f32 %v920_v37, %v592_v44  ;;  %577 = vst [vmem:[%s1137_s15 + $0xe0] sm:$0xff] %v530_v48  ;;  %v633_v61 = vmul.f32 %v923_v47, %v923_v47 }
 0x10a   : > { %v460_v54 = vpop.f32.mrf.mxu0  ;;  %v947_v55 = vpop.f32.mrf.mxu1 }
 0x10b   : > { %563 = vst [vmem:[%s1137_s15 + $0x70] sm:$0xff] %v460_v54  ;;  %v594_v56 = vadd.f32 %v593_v52, %v460_v54  ;;  %v632_v58 = vmul.f32 %v460_v54, %v460_v54  ;;  %v662_v59 = vadd.f32 %v661_v51, %v631_v49  ;;  %580 = vst [vmem:[%s1137_s15 + $0xf8] sm:$0xff] %v947_v55 }
 0x10c   : > { %v540_v60 = vpop.f32.mrf.mxu1  ;;  %v649_v44 = vmul.f32 %v947_v55, %v947_v55 }
 0x10d   : > { %v595_v63 = vadd.f32 %v923_v47, %v594_v56  ;;  %v663_v0 = vadd.f32 %v662_v59, %v632_v58  ;;  %579 = vst [vmem:[%s1137_s15 + $0xf0] sm:$0xff] %v540_v60  ;;  %v648_v42 = vmul.f32 %v540_v60, %v540_v60 }
 0x10f   : > { %v664_v1 = vadd.f32 %v663_v0, %v633_v61  ;;  %v596_v2 = vadd.f32 %v595_v63, %v1145_v53 }
 0x111   : > { %v665_v6 = vadd.f32 %v664_v1, %v634_v4  ;;  %v597_v7 = vadd.f32 %v1140_v50, %v596_v2  ;;  %v639_v50 = vmul.f32 %v1160_v3, %v1160_v3 }
 0x113   : > { %v598_v9 = vadd.f32 %v597_v7, %v1155_v62  ;;  %v666_v11 = vadd.f32 %v665_v6, %v635_v5 }
 0x115   : > { %v667_v14 = vadd.f32 %v666_v11, %v636_v10  ;;  %v599_v15 = vadd.f32 %v1150_v57, %v598_v9  ;;  %v641_v57 = vmul.f32 %v1170_v13, %v1170_v13 }
 0x117   : > { %v600_v53 = vadd.f32 %v599_v15, %v1165_v8  ;;  %v668_v17 = vadd.f32 %v667_v14, %v637_v12 }
 0x119   : > { %v669_v19 = vadd.f32 %v668_v17, %v638_v16  ;;  %v601_v20 = vadd.f32 %v1160_v3, %v600_v53  ;;  %v643_v3 = vmul.f32 %v1180_v23, %v1180_v23 }
 0x11b   : > { %v602_v62 = vadd.f32 %v601_v20, %v1175_v18  ;;  %v670_v22 = vadd.f32 %v669_v19, %v639_v50 }
 0x11d   : > { %v671_v24 = vadd.f32 %v670_v22, %v640_v21  ;;  %v603_v25 = vadd.f32 %v1170_v13, %v602_v62 }
 0x11f   : > { %v604_v8 = vadd.f32 %v603_v25, %v1185_v28  ;;  %v672_v27 = vadd.f32 %v671_v24, %v641_v57  ;;  %v646_v28 = vmul.f32 %v530_v48, %v530_v48 }
 0x121   : > { %v673_v29 = vadd.f32 %v672_v27, %v642_v26  ;;  %v605_v30 = vadd.f32 %v1180_v23, %v604_v8 }
 0x123   : > { %v606_v18 = vadd.f32 %v605_v30, %v520_v38  ;;  %v674_v32 = vadd.f32 %v673_v29, %v643_v3 }
 0x125   : > { %v675_v13 = vadd.f32 %v674_v32, %v644_v31  ;;  %v607_v35 = vadd.f32 %v1190_v33, %v606_v18 }
 0x127   : > { %v608_v36 = vadd.f32 %v607_v35, %v530_v48  ;;  %v676_v37 = vadd.f32 %v675_v13, %v645_v34 }
 0x129   : > { %v677_v40 = vadd.f32 %v676_v37, %v646_v28  ;;  %v609_v23 = vadd.f32 %v1197_v43, %v608_v36 }
 0x12b   : > { %v610_v41 = vadd.f32 %v609_v23, %v540_v60  ;;  %v678_v38 = vadd.f32 %v677_v40, %v647_v39 }
 0x12d   : > { %v611_v45 = vadd.f32 %v947_v55, %v610_v41  ;;  %v679_v46 = vadd.f32 %v678_v38, %v648_v42 }
 0x12f   : > { %v612_v47 = vrot.slane %v611_v45, 4  ;;  %v680_v49 = vadd.f32 %v679_v46, %v649_v44 }
 0x131   : > { %v613_v33 = vadd.f32 %v612_v47, %v611_v45  ;;  %v681_v51 = vrot.slane %v680_v49, 4 }
 0x133   : > { %v614_v48 = vrot.slane %v613_v33, 2  ;;  %v682_v52 = vadd.f32 %v681_v51, %v680_v49 }
 0x135   : > { %v615_v54 = vadd.f32 %v614_v48, %v613_v33  ;;  %v683_v56 = vrot.slane %v682_v52, 2 }
 0x137   : > { %v616_v58 = vrot.slane %v615_v54, 1  ;;  %v684_v59 = vadd.f32 %v683_v56, %v682_v52 }
 0x139   : > { %v617_v43 = vadd.f32 %v616_v58, %v615_v54  ;;  %v685_v60 = vrot.slane %v684_v59, 1 }
 0x13b   : > { %v686_v55 = vadd.f32 %v685_v60, %v684_v59  ;;  %687 = vst [vmem:[%s271_s16] sm:$0xff] %v617_v43 }
 0x13d   : > { %688 = vst [vmem:[%s275_s19] sm:$0xff] %v686_v55 }
 0x13e PF: > { %s17_s21 = sadd.s32 1, %s994_s21  }
 0x13f   : > { %p14_p5 = scmp.ge.s32.totalorder %s17_s21, 4  }
 0x141   :  { %16 = sbr.rel (!%p14_p5) target bundleno = 1 (0x1), region = 90 }

// kernel: bottleneck_forward.6
= control target key start
LH: loop header
LB: loop body
LE: loop exit
PB: predicated region body
PF: predicated region fallthrough
CT: control target
= control target key end

     0   :  { %s1143_s21 = smov 0   ;;  %s1440_s0 = inlined_call_operand.vmem [shape: f32[512,128], index: 0, kind: input, shape index: {}]   ;;  %s1441_s1 = inlined_call_operand.vmem [shape: f32[128,128], index: 1, kind: input, shape index: {}]   ;;  %s1442_s2 = inlined_call_operand.vmem [shape: f32[1,128], index: 2, kind: input, shape index: {}]   ;;  %s1443_s3 = inlined_call_operand.vmem [shape: f32[1,128], index: 3, kind: input, shape index: {}]   ;;  %s1444_s4 = inlined_call_operand.vmem [shape: f32[512,128], index: 4, kind: output, shape index: {0}]   ;;  %s1445_s5 = inlined_call_operand.vmem [shape: f32[2,8,128], index: 5, kind: output, shape index: {1}]   ;;  %s1446_s6 = inlined_call_operand.vmem [shape: f32[2,8,128], index: 6, kind: output, shape index: {2}]  }
   0x1 LB: > { %s1149_s22 = sadd.s32 4294967295, %s1106_s21   ;;  %p921_p0 = scmp.ge.s32.totalorder %s1106_s21, 1  ;;  %s1106_s21 = sphi %s1143_s21, %s17_s21  }
   0x2   : > { %p218_p1 = scmp.lt.s32.totalorder %s1106_s21, 3 }
   0x4   : > { %p219_p2 = pnand %p921_p0, %p218_p1 }
   0x5   : > { %s922_s27 = sshll.u32 (!%p219_p2), %s1149_s22, 5  ;;  %p268_p4 = scmp.lt.s32.totalorder (!%p219_p2), %s1149_s22, 1 }
   0x6   : > { %222 = sbr.rel (%p219_p2) target bundleno = 318 (0x13e), region = 36  ;;  %p257_p3 = scmp.lt.s32.totalorder (!%p219_p2), %s922_s27, 63 }
   0xb   : > { %v433_v0 = vld [vmem:[%s1441_s1 + $0x78] sm:$0xff]  ;;  %v432_v1 = vld [vmem:[%s1441_s1 + $0x70] sm:$0xff]  ;;  %v431_v2 = vld [vmem:[%s1441_s1 + $0x68] sm:$0xff]  ;;  %s1448_s27 = smov (!%p257_p3, %s922_s27), 63  ;;  %s1450_s22 = smov (!%p268_p4, %s1149_s22), 1 }
   0xc   : > { %980 = vmatprep.subr.mxu0 %v433_v0  ;;  %1060 = vmatprep.subr.mxu1 %v433_v0  ;;  %v430_v3 = vld [vmem:[%s1441_s1 + $0x60] sm:$0xff]  ;;  %s923_s8 = sshll.u32 %s1448_s27, 3  ;;  %v429_v5 = vld [vmem:[%s1441_s1 + $0x58] sm:$0xff]  ;;  %v428_v8 = vld [vmem:[%s1441_s1 + $0x50] sm:$0xff]  ;;  %s926_s27 = sshll.u32 %s1450_s22, 3 }
   0xd   : > { %981 = vmatpush3.msra.mxu0 %v433_v0  ;;  %1076 = vmatpush3.msra.mxu1 %v433_v0  ;;  %v1172_v4 = vld [vmem:[%s1442_s2] ss:$0 sm:$0xff]  ;;  %s1182_s15 = scalar_lea.vmem %s1440_s0, %s923_s8  ;;  %v427_v10 = vld [vmem:[%s1441_s1 + $0x48] sm:$0xff]  ;;  %v425_v14 = vld [vmem:[%s1441_s1 + $0x38] sm:$0xff]  ;;  %s1323_s24 = scalar_lea.vmem %s1444_s4, %s923_s8 }
   0xe   : > { %982 = vmatprep.subr.mxu0 %v432_v1  ;;  %1061 = vmatprep.subr.mxu1 %v432_v1  ;;  %v276_v6 = vld [vmem:[%s1182_s15] sm:$0xff]  ;;  %v424_v15 = vld [vmem:[%s1441_s1 + $0x30] sm:$0xff]  ;;  %v423_v16 = vld [vmem:[%s1441_s1 + $0x28] sm:$0xff]  ;;  %s271_s26 = scalar_lea.vmem %s1445_s5, %s926_s27  ;;  %s275_s30 = scalar_lea.vmem %s1446_s6, %s926_s27 }
   0xf   : > { %983 = vmatpush3.msra.mxu0 %v432_v1  ;;  %1077 = vmatpush3.msra.mxu1 %v432_v1  ;;  %v1188_v7 = vld [vmem:[%s1443_s3] ss:$0 sm:$0xff]  ;;  %v315_v9 = vmul.f32 %v1172_v4, %v276_v6  ;;  %v277_v17 = vld [vmem:[%s1182_s15 + $0x8] sm:$0xff]  ;;  %v278_v18 = vld [vmem:[%s1182_s15 + $0x10] sm:$0xff] }
  0x10   : > { %984 = vmatprep.subr.mxu0 %v431_v2  ;;  %1062 = vmatprep.subr.mxu1 %v431_v2  ;;  %v426_v12 = vld [vmem:[%s1441_s1 + $0x40] sm:$0xff]  ;;  %v293_v21 = vld [vmem:[%s1182_s15 + $0x88] sm:$0xff]  ;;  %v316_v22 = vmul.f32 %v1172_v4, %v277_v17  ;;  %v294_v23 = vld [vmem:[%s1182_s15 + $0x90] sm:$0xff]  ;;  %v317_v25 = vmul.f32 %v1172_v4, %v278_v18 }
  0x11   : > { %985 = vmatpush3.msra.mxu0 %v431_v2  ;;  %1078 = vmatpush3.msra.mxu1 %v431_v2  ;;  %v354_v11 = vadd.f32 %v1188_v7, %v315_v9  ;;  %v292_v19 = vld [vmem:[%s1182_s15 + $0x80] sm:$0xff]  ;;  %v421_v24 = vld [vmem:[%s1441_s1 + $0x18] sm:$0xff]  ;;  %v332_v29 = vmul.f32 %v1172_v4, %v293_v21  ;;  %v420_v30 = vld [vmem:[%s1441_s1 + $0x10] sm:$0xff]  ;;  %v333_v31 = vmul.f32 %v1172_v4, %v294_v23 }
  0x12   : > { %986 = vmatprep.subr.mxu0 %v430_v3  ;;  %1063 = vmatprep.subr.mxu1 %v430_v3  ;;  %v422_v20 = vld [vmem:[%s1441_s1 + $0x20] sm:$0xff]  ;;  %v279_v26 = vld [vmem:[%s1182_s15 + $0x18] sm:$0xff]  ;;  %v331_v27 = vmul.f32 %v1172_v4, %v292_v19  ;;  %v355_v33 = vadd.f32 %v1188_v7, %v316_v22  ;;  %v419_v36 = vld [vmem:[%s1441_s1 + $0x8] sm:$0xff]  ;;  %v356_v37 = vadd.f32 %v1188_v7, %v317_v25 }
  0x13   : > { %987 = vmatpush3.msra.mxu0 %v430_v3  ;;  %1079 = vmatpush3.msra.mxu1 %v430_v3  ;;  %v386_v13 = vmax.f32 %v354_v11, 0.0  ;;  %v280_v28 = vld [vmem:[%s1182_s15 + $0x20] sm:$0xff]  ;;  %v295_v32 = vld [vmem:[%s1182_s15 + $0x98] sm:$0xff]  ;;  %v318_v34 = vmul.f32 %v1172_v4, %v279_v26  ;;  %v281_v39 = vld [vmem:[%s1182_s15 + $0x28] sm:$0xff]  ;;  %v371_v42 = vadd.f32 %v1188_v7, %v332_v29  ;;  %v372_v45 = vadd.f32 %v1188_v7, %v333_v31 }
  0x14   : > { %988 = vmatprep.subr.mxu0 %v429_v5  ;;  %1064 = vmatprep.subr.mxu1 %v429_v5  ;;  %v296_v35 = vld [vmem:[%s1182_s15 + $0xa0] sm:$0xff]  ;;  %v319_v38 = vmul.f32 %v1172_v4, %v280_v28  ;;  %v370_v40 = vadd.f32 %v1188_v7, %v331_v27  ;;  %v282_v41 = vld [vmem:[%s1182_s15 + $0x30] sm:$0xff]  ;;  %v334_v43 = vmul.f32 %v1172_v4, %v295_v32  ;;  %v297_v47 = vld [vmem:[%s1182_s15 + $0xa8] sm:$0xff]  ;;  %v387_v48 = vmax.f32 %v355_v33, 0.0 }
  0x15   : > { %989 = vmatpush3.msra.mxu0 %v429_v5  ;;  %1080 = vmatpush3.msra.mxu1 %v429_v5  ;;  %v418_v44 = vld [vmem:[%s1441_s1] sm:$0xff]  ;;  %v335_v46 = vmul.f32 %v1172_v4, %v296_v35  ;;  %v357_v49 = vadd.f32 %v1188_v7, %v318_v34  ;;  %v320_v50 = vmul.f32 %v1172_v4, %v281_v39  ;;  %v298_v51 = vld [vmem:[%s1182_s15 + $0xb0] sm:$0xff]  ;;  %v388_v52 = vmax.f32 %v356_v37, 0.0  ;;  %v283_v55 = vld [vmem:[%s1182_s15 + $0x38] sm:$0xff] }
  0x16   : > { %990 = vmatprep.subr.mxu0 %v428_v8  ;;  %1065 = vmatprep.subr.mxu1 %v428_v8  ;;  %v358_v53 = vadd.f32 %v1188_v7, %v319_v38  ;;  %v321_v54 = vmul.f32 %v1172_v4, %v282_v41  ;;  %v402_v56 = vmax.f32 %v370_v40, 0.0  ;;  %v284_v57 = vld [vmem:[%s1182_s15 + $0x40] sm:$0xff]  ;;  %v403_v58 = vmax.f32 %v371_v42, 0.0  ;;  %v299_v0 = vld [vmem:[%s1182_s15 + $0xb8] sm:$0xff]  ;;  %v286_v11 = vld [vmem:[%s1182_s15 + $0x50] sm:$0xff] }
  0x17   : > { %991 = vmatpush3.msra.mxu0 %v428_v8  ;;  %1081 = vmatpush3.msra.mxu1 %v428_v8  ;;  %v373_v59 = vadd.f32 %v1188_v7, %v334_v43  ;;  %v336_v60 = vmul.f32 %v1172_v4, %v297_v47  ;;  %v404_v61 = vmax.f32 %v372_v45, 0.0  ;;  %v374_v62 = vadd.f32 %v1188_v7, %v335_v46  ;;  %v300_v5 = vld [vmem:[%s1182_s15 + $0xc0] sm:$0xff]  ;;  %v301_v18 = vld [vmem:[%s1182_s15 + $0xc8] sm:$0xff]  ;;  %v302_v22 = vld [vmem:[%s1182_s15 + $0xd0] sm:$0xff] }
  0x18   : > { %992 = vmatprep.subr.mxu0 %v427_v10  ;;  %1066 = vmatprep.subr.mxu1 %v427_v10  ;;  %v337_v63 = vmul.f32 %v1172_v4, %v298_v51  ;;  %v389_v1 = vmax.f32 %v357_v49, 0.0  ;;  %v359_v2 = vadd.f32 %v1188_v7, %v320_v50  ;;  %v322_v3 = vmul.f32 %v1172_v4, %v283_v55  ;;  %v287_v26 = vld [vmem:[%s1182_s15 + $0x58] sm:$0xff]  ;;  %v288_v27 = vld [vmem:[%s1182_s15 + $0x60] sm:$0xff]  ;;  %v289_v42 = vld [vmem:[%s1182_s15 + $0x68] sm:$0xff] }
  0x19   : > { %993 = vmatpush3.msra.mxu0 %v427_v10  ;;  %1012 = vmatprep.mubr.f32.mxu0 %v386_v13  ;;  %v390_v6 = vmax.f32 %v358_v53, 0.0  ;;  %v360_v8 = vadd.f32 %v1188_v7, %v321_v54  ;;  %v323_v9 = vmul.f32 %v1172_v4, %v284_v57  ;;  %v375_v13 = vadd.f32 %v1188_v7, %v336_v60  ;;  %v303_v34 = vld [vmem:[%s1182_s15 + $0xd8] sm:$0xff]  ;;  %v304_v38 = vld [vmem:[%s1182_s15 + $0xe0] sm:$0xff]  ;;  %v290_v43 = vld [vmem:[%s1182_s15 + $0x70] sm:$0xff] }
  0x1a   : > { %994 = vmatprep.subr.mxu0 %v426_v12  ;;  %1082 = vmatpush3.msra.mxu1 %v427_v10  ;;  %v285_v10 = vld [vmem:[%s1182_s15 + $0x48] sm:$0xff]  ;;  %v339_v17 = vmul.f32 %v1172_v4, %v300_v5  ;;  %v391_v19 = vmax.f32 %v359_v2, 0.0  ;;  %v325_v25 = vmul.f32 %v1172_v4, %v286_v11  ;;  %v341_v33 = vmul.f32 %v1172_v4, %v302_v22  ;;  %v306_v54 = vld [vmem:[%s1182_s15 + $0xf0] sm:$0xff] }
  0x1b   : > { %995 = vmatpush3.msra.mxu0 %v426_v12  ;;  %1067 = vmatprep.subr.mxu1 %v426_v12  ;;  %v324_v21 = vmul.f32 %v1172_v4, %v285_v10  ;;  %v392_v23 = vmax.f32 %v360_v8, 0.0  ;;  %v407_v28 = vmax.f32 %v375_v13, 0.0  ;;  %v326_v37 = vmul.f32 %v1172_v4, %v287_v26  ;;  %v305_v50 = vld [vmem:[%s1182_s15 + $0xe8] sm:$0xff] }
  0x1c   : > { %996 = vmatprep.subr.mxu0 %v425_v14  ;;  %1083 = vmatpush3.msra.mxu1 %v426_v12  ;;  %v405_v12 = vmax.f32 %v373_v59, 0.0  ;;  %v378_v32 = vadd.f32 %v1188_v7, %v339_v17  ;;  %v364_v40 = vadd.f32 %v1188_v7, %v325_v25  ;;  %v327_v41 = vmul.f32 %v1172_v4, %v288_v27 }
  0x1d   : > { %997 = vmatpush3.msra.mxu0 %v425_v14  ;;  %1068 = vmatprep.subr.mxu1 %v425_v14  ;;  %v342_v46 = vmul.f32 %v1172_v4, %v303_v34  ;;  %v343_v49 = vmul.f32 %v1172_v4, %v304_v38  ;;  %v328_v53 = vmul.f32 %v1172_v4, %v289_v42 }
  0x1e   : > { %998 = vmatprep.subr.mxu0 %v424_v15  ;;  %1084 = vmatpush3.msra.mxu1 %v425_v14  ;;  %v338_v14 = vmul.f32 %v1172_v4, %v299_v0  ;;  %v410_v47 = vmax.f32 %v378_v32, 0.0  ;;  %v396_v55 = vmax.f32 %v364_v40, 0.0  ;;  %v329_v57 = vmul.f32 %v1172_v4, %v290_v43 }
  0x1f   : > { %999 = vmatpush3.msra.mxu0 %v424_v15  ;;  %1069 = vmatprep.subr.mxu1 %v424_v15  ;;  %v381_v60 = vadd.f32 %v1188_v7, %v342_v46  ;;  %v345_v0 = vmul.f32 %v1172_v4, %v306_v54 }
  0x20   : > { %1000 = vmatprep.subr.mxu0 %v423_v16  ;;  %1085 = vmatpush3.msra.mxu1 %v424_v15  ;;  %v406_v15 = vmax.f32 %v374_v62, 0.0  ;;  %v377_v29 = vadd.f32 %v1188_v7, %v338_v14  ;;  %v368_v8 = vadd.f32 %v1188_v7, %v329_v57 }
  0x21   : > { %1001 = vmatpush3.msra.mxu0 %v423_v16  ;;  %1070 = vmatprep.subr.mxu1 %v423_v16  ;;  %v384_v13 = vadd.f32 %v1188_v7, %v345_v0 }
  0x22   : > { %1002 = vmatprep.subr.mxu0 %v422_v20  ;;  %1086 = vmatpush3.msra.mxu1 %v423_v16  ;;  %v376_v16 = vadd.f32 %v1188_v7, %v337_v63  ;;  %v382_v63 = vadd.f32 %v1188_v7, %v343_v49 }
  0x23   : > { %1003 = vmatpush3.msra.mxu0 %v422_v20  ;;  %1071 = vmatprep.subr.mxu1 %v422_v20 }
  0x24   : > { %1004 = vmatprep.subr.mxu0 %v421_v24  ;;  %1087 = vmatpush3.msra.mxu1 %v422_v20  ;;  %v361_v20 = vadd.f32 %v1188_v7, %v322_v3  ;;  %v408_v31 = vmax.f32 %v376_v16, 0.0  ;;  %v367_v3 = vadd.f32 %v1188_v7, %v328_v53  ;;  %v400_v16 = vmax.f32 %v368_v8, 0.0 }
  0x25   : > { %1005 = vmatpush3.msra.mxu0 %v421_v24  ;;  %1072 = vmatprep.subr.mxu1 %v421_v24 }
  0x26   : > { %1006 = vmatprep.subr.mxu0 %v420_v30  ;;  %1088 = vmatpush3.msra.mxu1 %v421_v24  ;;  %v362_v24 = vadd.f32 %v1188_v7, %v323_v9  ;;  %v393_v35 = vmax.f32 %v361_v20, 0.0  ;;  %v413_v9 = vmax.f32 %v381_v60, 0.0  ;;  %v399_v14 = vmax.f32 %v367_v3, 0.0 }
  0x27   : > { %1007 = vmatpush3.msra.mxu0 %v420_v30  ;;  %1073 = vmatprep.subr.mxu1 %v420_v30 }
  0x28   : > { %1008 = vmatprep.subr.mxu0 %v419_v36  ;;  %1089 = vmatpush3.msra.mxu1 %v420_v30  ;;  %v340_v30 = vmul.f32 %v1172_v4, %v301_v18  ;;  %v394_v39 = vmax.f32 %v362_v24, 0.0 }
  0x29   : > { %1009 = vmatpush3.msra.mxu0 %v419_v36  ;;  %1074 = vmatprep.subr.mxu1 %v419_v36 }
  0x2a   : > { %1010 = vmatprep.subr.mxu0 %v418_v44  ;;  %1090 = vmatpush3.msra.mxu1 %v419_v36  ;;  %v363_v36 = vadd.f32 %v1188_v7, %v324_v21  ;;  %v379_v45 = vadd.f32 %v1188_v7, %v340_v30 }
  0x2b   : > { %1011 = vmatpush3.msra.mxu0 %v418_v44  ;;  %1075 = vmatprep.subr.mxu1 %v418_v44 }
  0x2c   : > { %1013 = vmatmul.mubr.f32.vlgmr.msra.gmra.mxu0 %v387_v48  ;;  %1091 = vmatpush3.msra.mxu1 %v418_v44  ;;  %v409_v44 = vmax.f32 %v377_v29, 0.0  ;;  %v380_v48 = vadd.f32 %v1188_v7, %v341_v33  ;;  %v395_v51 = vmax.f32 %v363_v36, 0.0  ;;  %v411_v59 = vmax.f32 %v379_v45, 0.0 }
  0x2d   : > { %1015 = vmatprep.mubr.f32.mxu0 %v388_v52  ;;  %1036 = vmatprep.mubr.f32.mxu1 %v402_v56  ;;  %v365_v52 = vadd.f32 %v1188_v7, %v326_v37  ;;  %v366_v56 = vadd.f32 %v1188_v7, %v327_v41 }
  0x2e   : > { %1037 = vmatmul.mubr.f32.vlgmr.msra.gmra.mxu1 %v403_v58  ;;  %v291_v58 = vld [vmem:[%s1182_s15 + $0x78] sm:$0xff]  ;;  %v412_v62 = vmax.f32 %v380_v48, 0.0 }
  0x2f   : > { %1039 = vmatprep.mubr.f32.mxu1 %v404_v61  ;;  %v344_v61 = vmul.f32 %v1172_v4, %v305_v50  ;;  %v397_v2 = vmax.f32 %v365_v52, 0.0  ;;  %v330_v5 = vmul.f32 %v1172_v4, %v291_v58 }
  0x30   : > { %1016 = vmatmul.mubr.f32.gmra.mxu0 %v389_v1  ;;  %v307_v1 = vld [vmem:[%s1182_s15 + $0xf8] sm:$0xff] }
  0x31   : > { %1018 = vmatprep.mubr.f32.mxu0 %v390_v6  ;;  %v398_v6 = vmax.f32 %v366_v56, 0.0  ;;  %v383_v10 = vadd.f32 %v1188_v7, %v344_v61  ;;  %v346_v11 = vmul.f32 %v1172_v4, %v307_v1 }
  0x32   : > { %1040 = vmatmul.mubr.f32.gmra.mxu1 %v405_v12  ;;  %v414_v12 = vmax.f32 %v382_v63, 0.0 }
  0x33   : > { %1042 = vmatprep.mubr.f32.mxu1 %v406_v15  ;;  %v369_v15 = vadd.f32 %v1188_v7, %v330_v5  ;;  %v415_v17 = vmax.f32 %v383_v10, 0.0  ;;  %v385_v18 = vadd.f32 %v1188_v7, %v346_v11 }
  0x34   : > { %1019 = vmatmul.mubr.f32.gmra.mxu0 %v391_v19  ;;  %v416_v19 = vmax.f32 %v384_v13, 0.0 }
  0x35   : > { %1021 = vmatprep.mubr.f32.mxu0 %v392_v23  ;;  %v401_v20 = vmax.f32 %v369_v15, 0.0  ;;  %v417_v4 = vmax.f32 %v385_v18, 0.0 }
  0x36   : > { %1043 = vmatmul.mubr.f32.gmra.mxu1 %v407_v28 }
  0x37   : > { %1045 = vmatprep.mubr.f32.mxu1 %v408_v31 }
  0x38   : > { %1022 = vmatmul.mubr.f32.gmra.mxu0 %v393_v35 }
  0x39   : > { %1024 = vmatprep.mubr.f32.mxu0 %v394_v39 }
  0x3a   : > { %1046 = vmatmul.mubr.f32.gmra.mxu1 %v409_v44 }
  0x3b   : > { %1048 = vmatprep.mubr.f32.mxu1 %v410_v47 }
  0x3c   : > { %1025 = vmatmul.mubr.f32.gmra.mxu0 %v395_v51 }
  0x3d   : > { %1027 = vmatprep.mubr.f32.mxu0 %v396_v55 }
  0x3e   : > { %1049 = vmatmul.mubr.f32.gmra.mxu1 %v411_v59 }
  0x3f   : > { %1051 = vmatprep.mubr.f32.mxu1 %v412_v62 }
  0x40   : > { %1028 = vmatmul.mubr.f32.gmra.mxu0 %v397_v2 }
  0x41   : > { %1030 = vmatprep.mubr.f32.mxu0 %v398_v6 }
  0x42   : > { %1052 = vmatmul.mubr.f32.gmra.mxu1 %v413_v9 }
  0x43   : > { %1054 = vmatprep.mubr.f32.mxu1 %v414_v12 }
  0x44   : > { %1031 = vmatmul.mubr.f32.gmra.mxu0 %v399_v14 }
  0x45   : > { %1033 = vmatprep.mubr.f32.mxu0 %v400_v16 }
  0x46   : > { %1055 = vmatmul.mubr.f32.gmra.mxu1 %v415_v17 }
  0x47   : > { %1057 = vmatprep.mubr.f32.mxu1 %v416_v19 }
  0x48   : > { %1034 = vmatmul.mubr.f32.gmra.mxu0 %v401_v20 }
  0x4a   : > { %1058 = vmatmul.mubr.f32.gmra.mxu1 %v417_v4 }
  0xec   : > { %v1014_v7 = vpop.f32.mrf.mxu0 }
  0xed   : > { %660 = vst [vmem:[%s1323_s24 + $0x8] sm:$0xff] %v1014_v7  ;;  %v729_v26 = vmul.f32 %v1014_v7, %v1014_v7 }
  0xee   : > { %v500_v21 = vpop.f32.mrf.mxu0  ;;  %v1326_v22 = vpop.f32.mrf.mxu1 }
  0xef   : > { %659 = vst [vmem:[%s1323_s24] sm:$0xff] %v500_v21  ;;  %v728_v23 = vmul.f32 %v500_v21, %v500_v21  ;;  %676 = vst [vmem:[%s1323_s24 + $0x88] sm:$0xff] %v1326_v22  ;;  %v691_v27 = vadd.f32 %v1014_v7, %v500_v21 }
  0xf0   : > { %v1017_v24 = vpop.f32.mrf.mxu0  ;;  %v1331_v25 = vpop.f32.mrf.mxu1 }
  0xf1   : > { %662 = vst [vmem:[%s1323_s24 + $0x18] sm:$0xff] %v1017_v24  ;;  %675 = vst [vmem:[%s1323_s24 + $0x80] sm:$0xff] %v1331_v25  ;;  %v760_v30 = vadd.f32 %v729_v26, %v728_v23  ;;  %v731_v35 = vmul.f32 %v1017_v24, %v1017_v24 }
  0xf2   : > { %v510_v28 = vpop.f32.mrf.mxu0  ;;  %v1336_v29 = vpop.f32.mrf.mxu1 }
  0xf3   : > { %661 = vst [vmem:[%s1323_s24 + $0x10] sm:$0xff] %v510_v28  ;;  %v692_v31 = vadd.f32 %v691_v27, %v510_v28  ;;  %v730_v32 = vmul.f32 %v510_v28, %v510_v28  ;;  %678 = vst [vmem:[%s1323_s24 + $0x98] sm:$0xff] %v1336_v29 }
  0xf4   : > { %v1020_v33 = vpop.f32.mrf.mxu0  ;;  %v1341_v34 = vpop.f32.mrf.mxu1 }
  0xf5   : > { %v761_v36 = vadd.f32 %v760_v30, %v730_v32  ;;  %664 = vst [vmem:[%s1323_s24 + $0x28] sm:$0xff] %v1020_v33  ;;  %v693_v37 = vadd.f32 %v1017_v24, %v692_v31  ;;  %677 = vst [vmem:[%s1323_s24 + $0x90] sm:$0xff] %v1341_v34  ;;  %v733_v45 = vmul.f32 %v1020_v33, %v1020_v33 }
  0xf6   : > { %v520_v38 = vpop.f32.mrf.mxu0  ;;  %v1346_v39 = vpop.f32.mrf.mxu1 }
  0xf7   : > { %663 = vst [vmem:[%s1323_s24 + $0x20] sm:$0xff] %v520_v38  ;;  %v694_v40 = vadd.f32 %v693_v37, %v520_v38  ;;  %v732_v41 = vmul.f32 %v520_v38, %v520_v38  ;;  %v762_v42 = vadd.f32 %v761_v36, %v731_v35  ;;  %680 = vst [vmem:[%s1323_s24 + $0xa8] sm:$0xff] %v1346_v39 }
  0xf8   : > { %v1023_v43 = vpop.f32.mrf.mxu0  ;;  %v1351_v44 = vpop.f32.mrf.mxu1 }
  0xf9   : > { %v763_v46 = vadd.f32 %v762_v42, %v732_v41  ;;  %666 = vst [vmem:[%s1323_s24 + $0x38] sm:$0xff] %v1023_v43  ;;  %v695_v47 = vadd.f32 %v1020_v33, %v694_v40  ;;  %679 = vst [vmem:[%s1323_s24 + $0xa0] sm:$0xff] %v1351_v44  ;;  %v735_v55 = vmul.f32 %v1023_v43, %v1023_v43 }
  0xfa   : > { %v530_v48 = vpop.f32.mrf.mxu0  ;;  %v1356_v49 = vpop.f32.mrf.mxu1  ;;  %v744_v40 = vmul.f32 %v1331_v25, %v1331_v25  ;;  %v745_v41 = vmul.f32 %v1326_v22, %v1326_v22 }
  0xfb   : > { %665 = vst [vmem:[%s1323_s24 + $0x30] sm:$0xff] %v530_v48  ;;  %v696_v50 = vadd.f32 %v695_v47, %v530_v48  ;;  %v734_v51 = vmul.f32 %v530_v48, %v530_v48  ;;  %v764_v52 = vadd.f32 %v763_v46, %v733_v45  ;;  %682 = vst [vmem:[%s1323_s24 + $0xb8] sm:$0xff] %v1356_v49 }
  0xfc   : > { %v1026_v53 = vpop.f32.mrf.mxu0  ;;  %v1361_v54 = vpop.f32.mrf.mxu1  ;;  %v746_v46 = vmul.f32 %v1341_v34, %v1341_v34  ;;  %v747_v48 = vmul.f32 %v1336_v29, %v1336_v29 }
  0xfd   : > { %v765_v56 = vadd.f32 %v764_v52, %v734_v51  ;;  %668 = vst [vmem:[%s1323_s24 + $0x48] sm:$0xff] %v1026_v53  ;;  %v697_v57 = vadd.f32 %v1023_v43, %v696_v50  ;;  %681 = vst [vmem:[%s1323_s24 + $0xb0] sm:$0xff] %v1361_v54  ;;  %v737_v1 = vmul.f32 %v1026_v53, %v1026_v53 }
  0xfe   : > { %v540_v58 = vpop.f32.mrf.mxu0  ;;  %v1366_v59 = vpop.f32.mrf.mxu1  ;;  %v748_v52 = vmul.f32 %v1351_v44, %v1351_v44 }
  0xff   : > { %667 = vst [vmem:[%s1323_s24 + $0x40] sm:$0xff] %v540_v58  ;;  %v698_v60 = vadd.f32 %v697_v57, %v540_v58  ;;  %v736_v61 = vmul.f32 %v540_v58, %v540_v58  ;;  %v766_v62 = vadd.f32 %v765_v56, %v735_v55  ;;  %684 = vst [vmem:[%s1323_s24 + $0xc8] sm:$0xff] %v1366_v59 }
 0x100   : > { %v1029_v63 = vpop.f32.mrf.mxu0  ;;  %v1371_v0 = vpop.f32.mrf.mxu1  ;;  %v750_v57 = vmul.f32 %v1361_v54, %v1361_v54 }
 0x101   : > { %v767_v2 = vadd.f32 %v766_v62, %v736_v61  ;;  %670 = vst [vmem:[%s1323_s24 + $0x58] sm:$0xff] %v1029_v63  ;;  %v699_v3 = vadd.f32 %v1026_v53, %v698_v60  ;;  %683 = vst [vmem:[%s1323_s24 + $0xc0] sm:$0xff] %v1371_v0  ;;  %v739_v13 = vmul.f32 %v1029_v63, %v1029_v63 }
 0x102   : > { %v550_v5 = vpop.f32.mrf.mxu0  ;;  %v1376_v6 = vpop.f32.mrf.mxu1  ;;  %v752_v62 = vmul.f32 %v1371_v0, %v1371_v0 }
 0x103   : > { %669 = vst [vmem:[%s1323_s24 + $0x50] sm:$0xff] %v550_v5  ;;  %v700_v8 = vadd.f32 %v699_v3, %v550_v5  ;;  %v738_v9 = vmul.f32 %v550_v5, %v550_v5  ;;  %v768_v10 = vadd.f32 %v767_v2, %v737_v1  ;;  %686 = vst [vmem:[%s1323_s24 + $0xd8] sm:$0xff] %v1376_v6 }
 0x104   : > { %v1032_v11 = vpop.f32.mrf.mxu0  ;;  %v630_v12 = vpop.f32.mrf.mxu1 }
 0x105   : > { %v769_v14 = vadd.f32 %v768_v10, %v738_v9  ;;  %672 = vst [vmem:[%s1323_s24 + $0x68] sm:$0xff] %v1032_v11  ;;  %v701_v15 = vadd.f32 %v1029_v63, %v700_v8  ;;  %685 = vst [vmem:[%s1323_s24 + $0xd0] sm:$0xff] %v630_v12  ;;  %v741_v21 = vmul.f32 %v1032_v11, %v1032_v11 }
 0x106   : > { %v560_v16 = vpop.f32.mrf.mxu0  ;;  %v1383_v17 = vpop.f32.mrf.mxu1  ;;  %v754_v3 = vmul.f32 %v630_v12, %v630_v12  ;;  %v755_v8 = vmul.f32 %v1376_v6, %v1376_v6 }
 0x107   : > { %671 = vst [vmem:[%s1323_s24 + $0x60] sm:$0xff] %v560_v16  ;;  %v702_v18 = vadd.f32 %v701_v15, %v560_v16  ;;  %v740_v19 = vmul.f32 %v560_v16, %v560_v16  ;;  %v770_v20 = vadd.f32 %v769_v14, %v739_v13  ;;  %688 = vst [vmem:[%s1323_s24 + $0xe8] sm:$0xff] %v1383_v17 }
 0x108   : > { %v1035_v4 = vpop.f32.mrf.mxu0  ;;  %v640_v7 = vpop.f32.mrf.mxu1  ;;  %v757_v13 = vmul.f32 %v1383_v17, %v1383_v17 }
 0x109   : > { %v771_v23 = vadd.f32 %v770_v20, %v740_v19  ;;  %674 = vst [vmem:[%s1323_s24 + $0x78] sm:$0xff] %v1035_v4  ;;  %v703_v24 = vadd.f32 %v1032_v11, %v702_v18  ;;  %687 = vst [vmem:[%s1323_s24 + $0xe0] sm:$0xff] %v640_v7  ;;  %v743_v33 = vmul.f32 %v1035_v4, %v1035_v4 }
 0x10a   : > { %v570_v26 = vpop.f32.mrf.mxu0  ;;  %v1059_v27 = vpop.f32.mrf.mxu1 }
 0x10b   : > { %673 = vst [vmem:[%s1323_s24 + $0x70] sm:$0xff] %v570_v26  ;;  %v704_v28 = vadd.f32 %v703_v24, %v570_v26  ;;  %v742_v30 = vmul.f32 %v570_v26, %v570_v26  ;;  %v772_v31 = vadd.f32 %v771_v23, %v741_v21  ;;  %690 = vst [vmem:[%s1323_s24 + $0xf8] sm:$0xff] %v1059_v27 }
 0x10c   : > { %v650_v32 = vpop.f32.mrf.mxu1  ;;  %v759_v18 = vmul.f32 %v1059_v27, %v1059_v27 }
 0x10d   : > { %v705_v35 = vadd.f32 %v1035_v4, %v704_v28  ;;  %v773_v36 = vadd.f32 %v772_v31, %v742_v30  ;;  %689 = vst [vmem:[%s1323_s24 + $0xf0] sm:$0xff] %v650_v32  ;;  %v758_v16 = vmul.f32 %v650_v32, %v650_v32 }
 0x10f   : > { %v774_v37 = vadd.f32 %v773_v36, %v743_v33  ;;  %v706_v38 = vadd.f32 %v705_v35, %v1331_v25 }
 0x111   : > { %v775_v42 = vadd.f32 %v774_v37, %v744_v40  ;;  %v707_v43 = vadd.f32 %v1326_v22, %v706_v38  ;;  %v749_v22 = vmul.f32 %v1346_v39, %v1346_v39 }
 0x113   : > { %v708_v45 = vadd.f32 %v707_v43, %v1341_v34  ;;  %v776_v47 = vadd.f32 %v775_v42, %v745_v41 }
 0x115   : > { %v777_v50 = vadd.f32 %v776_v47, %v746_v46  ;;  %v709_v51 = vadd.f32 %v1336_v29, %v708_v45  ;;  %v751_v29 = vmul.f32 %v1356_v49, %v1356_v49 }
 0x117   : > { %v710_v25 = vadd.f32 %v709_v51, %v1351_v44  ;;  %v778_v53 = vadd.f32 %v777_v50, %v747_v48 }
 0x119   : > { %v779_v55 = vadd.f32 %v778_v53, %v748_v52  ;;  %v711_v56 = vadd.f32 %v1346_v39, %v710_v25  ;;  %v753_v39 = vmul.f32 %v1366_v59, %v1366_v59 }
 0x11b   : > { %v712_v34 = vadd.f32 %v711_v56, %v1361_v54  ;;  %v780_v58 = vadd.f32 %v779_v55, %v749_v22 }
 0x11d   : > { %v781_v60 = vadd.f32 %v780_v58, %v750_v57  ;;  %v713_v61 = vadd.f32 %v1356_v49, %v712_v34 }
 0x11f   : > { %v714_v44 = vadd.f32 %v713_v61, %v1371_v0  ;;  %v782_v63 = vadd.f32 %v781_v60, %v751_v29  ;;  %v756_v0 = vmul.f32 %v640_v7, %v640_v7 }
 0x121   : > { %v783_v1 = vadd.f32 %v782_v63, %v752_v62  ;;  %v715_v2 = vadd.f32 %v1366_v59, %v714_v44 }
 0x123   : > { %v716_v54 = vadd.f32 %v715_v2, %v630_v12  ;;  %v784_v5 = vadd.f32 %v783_v1, %v753_v39 }
 0x125   : > { %v785_v49 = vadd.f32 %v784_v5, %v754_v3  ;;  %v717_v9 = vadd.f32 %v1376_v6, %v716_v54 }
 0x127   : > { %v718_v10 = vadd.f32 %v717_v9, %v640_v7  ;;  %v786_v11 = vadd.f32 %v785_v49, %v755_v8 }
 0x129   : > { %v787_v14 = vadd.f32 %v786_v11, %v756_v0  ;;  %v719_v59 = vadd.f32 %v1383_v17, %v718_v10 }
 0x12b   : > { %v720_v15 = vadd.f32 %v719_v59, %v650_v32  ;;  %v788_v12 = vadd.f32 %v787_v14, %v757_v13 }
 0x12d   : > { %v721_v19 = vadd.f32 %v1059_v27, %v720_v15  ;;  %v789_v20 = vadd.f32 %v788_v12, %v758_v16 }
 0x12f   : > { %v722_v4 = vrot.slane %v721_v19, 4  ;;  %v790_v21 = vadd.f32 %v789_v20, %v759_v18 }
 0x131   : > { %v723_v6 = vadd.f32 %v722_v4, %v721_v19  ;;  %v791_v23 = vrot.slane %v790_v21, 4 }
 0x133   : > { %v724_v7 = vrot.slane %v723_v6, 2  ;;  %v792_v24 = vadd.f32 %v791_v23, %v790_v21 }
 0x135   : > { %v725_v26 = vadd.f32 %v724_v7, %v723_v6  ;;  %v793_v28 = vrot.slane %v792_v24, 2 }
 0x137   : > { %v726_v30 = vrot.slane %v725_v26, 1  ;;  %v794_v31 = vadd.f32 %v793_v28, %v792_v24 }
 0x139   : > { %v727_v17 = vadd.f32 %v726_v30, %v725_v26  ;;  %v795_v32 = vrot.slane %v794_v31, 1 }
 0x13b   : > { %v796_v27 = vadd.f32 %v795_v32, %v794_v31  ;;  %797 = vst [vmem:[%s271_s26] sm:$0xff] %v727_v17 }
 0x13d   : > { %798 = vst [vmem:[%s275_s30] sm:$0xff] %v796_v27 }
 0x13e PF: > { %s17_s21 = sadd.s32 1, %s1106_s21  }
 0x13f   : > { %p14_p5 = scmp.ge.s32.totalorder %s17_s21, 4  }
 0x141   :  { %16 = sbr.rel (!%p14_p5) target bundleno = 1 (0x1), region = 90 }

// kernel: bottleneck_forward.7
= control target key start
LH: loop header
LB: loop body
LE: loop exit
PB: predicated region body
PF: predicated region fallthrough
CT: control target
= control target key end

     0   :  { %s585_s15 = smov 0   ;;  %s852_s0 = inlined_call_operand.vmem [shape: f32[512,128], index: 0, kind: input, shape index: {}, may-alias: {0,4}]   ;;  %s853_s1 = inlined_call_operand.vmem [shape: f32[1,128], index: 1, kind: input, shape index: {}]   ;;  %s854_s2 = inlined_call_operand.vmem [shape: f32[1,128], index: 2, kind: input, shape index: {}]   ;;  %s855_s3 = inlined_call_operand.vmem [shape: f32[512,128], index: 3, kind: input, shape index: {}]   ;;  %s856_s4 = inlined_call_operand.vmem [shape: f32[512,128], index: 4, kind: output, shape index: {}, may-alias: {0,4}]  }
   0x1 LB: > { %s529_s16 = sadd.s32 4294967295, %s558_s15   ;;  %p533_p0 = scmp.ge.s32.totalorder %s558_s15, 1  ;;  %s558_s15 = sphi %s585_s15, %s14_s15  }
   0x2   : > { %p174_p1 = scmp.lt.s32.totalorder %s558_s15, 3 }
   0x4   : > { %p175_p2 = pnand %p533_p0, %p174_p1 }
   0x5   : > { %s534_s17 = sshll.u32 (!%p175_p2), %s529_s16, 5 }
   0x6   : > { %178 = sbr.rel (%p175_p2) target bundleno = 53 (0x35), region = 36  ;;  %p206_p3 = scmp.lt.s32.totalorder (!%p175_p2), %s534_s17, 63 }
   0xb   : > { %s858_s17 = smov (!%p206_p3, %s534_s17), 63  ;;  %v598_v0 = vld [vmem:[%s853_s1] ss:$0 sm:$0xff] }
   0xc   : > { %s593_s18 = sshll.u32 %s858_s17, 3  ;;  %v609_v1 = vld [vmem:[%s854_s2] ss:$0 sm:$0xff] }
   0xd   : > { %s604_s23 = scalar_lea.vmem %s852_s0, %s593_s18  ;;  %s656_s28 = scalar_lea.vmem %s855_s3, %s593_s18 }
   0xe   : > { %v223_v2 = vld [vmem:[%s604_s23] sm:$0xff]  ;;  %v224_v3 = vld [vmem:[%s604_s23 + $0x8] sm:$0xff]  ;;  %v225_v4 = vld [vmem:[%s604_s23 + $0x10] sm:$0xff]  ;;  %s712_s5 = scalar_lea.vmem %s856_s4, %s593_s18 }
   0xf   : > { %v226_v5 = vld [vmem:[%s604_s23 + $0x18] sm:$0xff]  ;;  %v227_v6 = vld [vmem:[%s604_s23 + $0x20] sm:$0xff]  ;;  %v228_v7 = vld [vmem:[%s604_s23 + $0x28] sm:$0xff]  ;;  %v262_v8 = vmul.f32 %v598_v0, %v223_v2  ;;  %v263_v9 = vmul.f32 %v598_v0, %v224_v3  ;;  %v264_v10 = vmul.f32 %v598_v0, %v225_v4 }
  0x10   : > { %v229_v11 = vld [vmem:[%s604_s23 + $0x30] sm:$0xff]  ;;  %v230_v12 = vld [vmem:[%s604_s23 + $0x38] sm:$0xff]  ;;  %v231_v13 = vld [vmem:[%s604_s23 + $0x40] sm:$0xff]  ;;  %v265_v14 = vmul.f32 %v598_v0, %v226_v5  ;;  %v266_v15 = vmul.f32 %v598_v0, %v227_v6  ;;  %v267_v16 = vmul.f32 %v598_v0, %v228_v7 }
  0x11   : > { %v232_v17 = vld [vmem:[%s604_s23 + $0x48] sm:$0xff]  ;;  %v233_v18 = vld [vmem:[%s604_s23 + $0x50] sm:$0xff]  ;;  %v234_v19 = vld [vmem:[%s604_s23 + $0x58] sm:$0xff]  ;;  %v301_v20 = vadd.f32 %v609_v1, %v262_v8  ;;  %v302_v21 = vadd.f32 %v609_v1, %v263_v9  ;;  %v303_v22 = vadd.f32 %v609_v1, %v264_v10  ;;  %v268_v23 = vmul.f32 %v598_v0, %v229_v11 }
  0x12   : > { %v235_v24 = vld [vmem:[%s604_s23 + $0x60] sm:$0xff]  ;;  %v236_v25 = vld [vmem:[%s604_s23 + $0x68] sm:$0xff]  ;;  %v237_v26 = vld [vmem:[%s604_s23 + $0x70] sm:$0xff]  ;;  %v304_v27 = vadd.f32 %v609_v1, %v265_v14  ;;  %v305_v28 = vadd.f32 %v609_v1, %v266_v15  ;;  %v306_v29 = vadd.f32 %v609_v1, %v267_v16  ;;  %v269_v30 = vmul.f32 %v598_v0, %v230_v12 }
  0x13   : > { %v238_v31 = vld [vmem:[%s604_s23 + $0x78] sm:$0xff]  ;;  %v307_v32 = vadd.f32 %v609_v1, %v268_v23  ;;  %v270_v33 = vmul.f32 %v598_v0, %v231_v13  ;;  %v271_v34 = vmul.f32 %v598_v0, %v232_v17  ;;  %v272_v35 = vmul.f32 %v598_v0, %v233_v18  ;;  %v239_v36 = vld [vmem:[%s604_s23 + $0x80] sm:$0xff]  ;;  %v240_v37 = vld [vmem:[%s604_s23 + $0x88] sm:$0xff] }
  0x14   : > { %v241_v38 = vld [vmem:[%s604_s23 + $0x90] sm:$0xff]  ;;  %v308_v39 = vadd.f32 %v609_v1, %v269_v30  ;;  %v273_v40 = vmul.f32 %v598_v0, %v234_v19  ;;  %v274_v41 = vmul.f32 %v598_v0, %v235_v24  ;;  %v275_v42 = vmul.f32 %v598_v0, %v236_v25  ;;  %v242_v43 = vld [vmem:[%s604_s23 + $0x98] sm:$0xff]  ;;  %v243_v44 = vld [vmem:[%s604_s23 + $0xa0] sm:$0xff] }
  0x15   : > { %v244_v45 = vld [vmem:[%s604_s23 + $0xa8] sm:$0xff]  ;;  %v309_v46 = vadd.f32 %v609_v1, %v270_v33  ;;  %v663_v47 = vadd.f32 %v609_v1, %v271_v34  ;;  %v666_v48 = vadd.f32 %v609_v1, %v272_v35  ;;  %v276_v49 = vmul.f32 %v598_v0, %v237_v26  ;;  %v333_v58 = vld [vmem:[%s656_s28] sm:$0xff]  ;;  %v335_v3 = vld [vmem:[%s656_s28 + $0x10] sm:$0xff] }
  0x16   : > { %v670_v50 = vadd.f32 %v609_v1, %v273_v40  ;;  %v673_v51 = vadd.f32 %v609_v1, %v274_v41  ;;  %v676_v52 = vadd.f32 %v609_v1, %v275_v42  ;;  %v277_v53 = vmul.f32 %v598_v0, %v238_v31  ;;  %v334_v2 = vld [vmem:[%s656_s28 + $0x8] sm:$0xff]  ;;  %v336_v4 = vld [vmem:[%s656_s28 + $0x18] sm:$0xff]  ;;  %v715_v8 = vld [vmem:[%s604_s23 + $0xb0] sm:$0xff] }
  0x17   : > { %v680_v54 = vadd.f32 %v609_v1, %v276_v49  ;;  %v278_v55 = vmul.f32 %v598_v0, %v239_v36  ;;  %v279_v56 = vmul.f32 %v598_v0, %v240_v37  ;;  %v280_v57 = vmul.f32 %v598_v0, %v241_v38  ;;  %v718_v9 = vld [vmem:[%s604_s23 + $0xb8] sm:$0xff]  ;;  %v721_v10 = vld [vmem:[%s604_s23 + $0xc0] sm:$0xff]  ;;  %v724_v11 = vld [vmem:[%s604_s23 + $0xc8] sm:$0xff] }
  0x18   : > { %v687_v59 = vadd.f32 %v609_v1, %v277_v53  ;;  %v281_v60 = vmul.f32 %v598_v0, %v242_v43  ;;  %v691_v61 = vmul.f32 %v598_v0, %v243_v44  ;;  %v694_v62 = vmul.f32 %v598_v0, %v244_v45  ;;  %v727_v12 = vld [vmem:[%s604_s23 + $0xd0] sm:$0xff]  ;;  %v730_v13 = vld [vmem:[%s604_s23 + $0xd8] sm:$0xff]  ;;  %v733_v14 = vld [vmem:[%s604_s23 + $0xe0] sm:$0xff] }
  0x19   : > { %v365_v63 = vadd.f32 %v333_v58, %v301_v20  ;;  %v700_v5 = vadd.f32 %v609_v1, %v278_v55  ;;  %v703_v6 = vadd.f32 %v609_v1, %v279_v56  ;;  %v706_v7 = vadd.f32 %v609_v1, %v280_v57  ;;  %v736_v15 = vld [vmem:[%s604_s23 + $0xe8] sm:$0xff]  ;;  %v739_v16 = vld [vmem:[%s604_s23 + $0xf0] sm:$0xff]  ;;  %v742_v17 = vld [vmem:[%s604_s23 + $0xf8] sm:$0xff] }
  0x1a   : > { %v366_v18 = vadd.f32 %v334_v2, %v302_v21  ;;  %v367_v19 = vadd.f32 %v335_v3, %v303_v22  ;;  %v368_v20 = vadd.f32 %v336_v4, %v304_v27  ;;  %v337_v23 = vld [vmem:[%s656_s28 + $0x20] sm:$0xff]  ;;  %v338_v24 = vld [vmem:[%s656_s28 + $0x28] sm:$0xff]  ;;  %v339_v25 = vld [vmem:[%s656_s28 + $0x30] sm:$0xff]  ;;  %v320_v26 = vadd.f32 %v609_v1, %v281_v60 }
  0x1b   : > { %v397_v30 = vmax.f32 %v365_v63, 0.0  ;;  %v369_v31 = vadd.f32 %v337_v23, %v305_v28  ;;  %v370_v33 = vadd.f32 %v338_v24, %v306_v29  ;;  %v371_v34 = vadd.f32 %v339_v25, %v307_v32  ;;  %v340_v35 = vld [vmem:[%s656_s28 + $0x38] sm:$0xff]  ;;  %v341_v36 = vld [vmem:[%s656_s28 + $0x40] sm:$0xff]  ;;  %v342_v21 = vld [vmem:[%s656_s28 + $0x48] sm:$0xff] }
  0x1c   : > { %v398_v22 = vmax.f32 %v366_v18, 0.0  ;;  %v399_v27 = vmax.f32 %v367_v19, 0.0  ;;  %v400_v37 = vmax.f32 %v368_v20, 0.0  ;;  %v372_v38 = vadd.f32 %v340_v35, %v308_v39  ;;  %v343_v40 = vld [vmem:[%s656_s28 + $0x50] sm:$0xff]  ;;  %v344_v41 = vld [vmem:[%s656_s28 + $0x58] sm:$0xff]  ;;  %v345_v42 = vld [vmem:[%s656_s28 + $0x60] sm:$0xff] }
  0x1d   : > { %429 = vst [vmem:[%s712_s5] sm:$0xff] %v397_v30  ;;  %v401_v28 = vmax.f32 %v369_v31, 0.0  ;;  %v402_v29 = vmax.f32 %v370_v33, 0.0  ;;  %v403_v32 = vmax.f32 %v371_v34, 0.0  ;;  %v373_v43 = vadd.f32 %v341_v36, %v309_v46  ;;  %v346_v44 = vld [vmem:[%s656_s28 + $0x68] sm:$0xff]  ;;  %v347_v45 = vld [vmem:[%s656_s28 + $0x70] sm:$0xff]  ;;  %v348_v49 = vld [vmem:[%s656_s28 + $0x78] sm:$0xff] }
  0x1e   : > { %430 = vst [vmem:[%s712_s5 + $0x8] sm:$0xff] %v398_v22  ;;  %431 = vst [vmem:[%s712_s5 + $0x10] sm:$0xff] %v399_v27  ;;  %v404_v39 = vmax.f32 %v372_v38, 0.0  ;;  %v374_v53 = vadd.f32 %v342_v21, %v663_v47  ;;  %v375_v55 = vadd.f32 %v343_v40, %v666_v48  ;;  %v376_v56 = vadd.f32 %v344_v41, %v670_v50  ;;  %v349_v57 = vld [vmem:[%s656_s28 + $0x80] sm:$0xff]  ;;  %v350_v47 = vld [vmem:[%s656_s28 + $0x88] sm:$0xff] }
  0x1f   : > { %432 = vst [vmem:[%s712_s5 + $0x18] sm:$0xff] %v400_v37  ;;  %433 = vst [vmem:[%s712_s5 + $0x20] sm:$0xff] %v401_v28  ;;  %v405_v46 = vmax.f32 %v373_v43, 0.0  ;;  %v377_v58 = vadd.f32 %v345_v42, %v673_v51  ;;  %v378_v60 = vadd.f32 %v346_v44, %v676_v52  ;;  %v379_v63 = vadd.f32 %v347_v45, %v680_v54  ;;  %v351_v2 = vld [vmem:[%s656_s28 + $0x90] sm:$0xff]  ;;  %v352_v48 = vld [vmem:[%s656_s28 + $0x98] sm:$0xff] }
  0x20   : > { %434 = vst [vmem:[%s712_s5 + $0x28] sm:$0xff] %v402_v29  ;;  %435 = vst [vmem:[%s712_s5 + $0x30] sm:$0xff] %v403_v32  ;;  %v406_v50 = vmax.f32 %v374_v53, 0.0  ;;  %v407_v3 = vmax.f32 %v375_v55, 0.0  ;;  %v408_v4 = vmax.f32 %v376_v56, 0.0  ;;  %v380_v18 = vadd.f32 %v348_v49, %v687_v59  ;;  %v353_v59 = vld [vmem:[%s656_s28 + $0xa0] sm:$0xff] }
  0x21   : > { %436 = vst [vmem:[%s712_s5 + $0x38] sm:$0xff] %v404_v39  ;;  %437 = vst [vmem:[%s712_s5 + $0x40] sm:$0xff] %v405_v46  ;;  %v409_v51 = vmax.f32 %v377_v58, 0.0  ;;  %v410_v52 = vmax.f32 %v378_v60, 0.0  ;;  %v411_v19 = vmax.f32 %v379_v63, 0.0  ;;  %v381_v54 = vadd.f32 %v349_v57, %v700_v5  ;;  %v354_v30 = vld [vmem:[%s656_s28 + $0xa8] sm:$0xff] }
  0x22   : > { %438 = vst [vmem:[%s712_s5 + $0x48] sm:$0xff] %v406_v50  ;;  %439 = vst [vmem:[%s712_s5 + $0x50] sm:$0xff] %v407_v3  ;;  %v412_v20 = vmax.f32 %v380_v18, 0.0  ;;  %v382_v23 = vadd.f32 %v350_v47, %v703_v6  ;;  %v383_v24 = vadd.f32 %v351_v2, %v706_v7  ;;  %v384_v25 = vadd.f32 %v352_v48, %v320_v26  ;;  %v355_v35 = vld [vmem:[%s656_s28 + $0xb0] sm:$0xff]  ;;  %v357_v37 = vld [vmem:[%s656_s28 + $0xc0] sm:$0xff] }
  0x23   : > { %440 = vst [vmem:[%s712_s5 + $0x58] sm:$0xff] %v408_v4  ;;  %441 = vst [vmem:[%s712_s5 + $0x60] sm:$0xff] %v409_v51  ;;  %v413_v31 = vmax.f32 %v381_v54, 0.0  ;;  %v321_v5 = vadd.f32 %v609_v1, %v691_v61  ;;  %v322_v6 = vadd.f32 %v609_v1, %v694_v62  ;;  %v284_v7 = vmul.f32 %v598_v0, %v715_v8  ;;  %v356_v62 = vld [vmem:[%s656_s28 + $0xb8] sm:$0xff]  ;;  %v358_v29 = vld [vmem:[%s656_s28 + $0xc8] sm:$0xff] }
  0x24   : > { %442 = vst [vmem:[%s712_s5 + $0x68] sm:$0xff] %v410_v52  ;;  %443 = vst [vmem:[%s712_s5 + $0x70] sm:$0xff] %v411_v19  ;;  %v414_v26 = vmax.f32 %v382_v23, 0.0  ;;  %v415_v33 = vmax.f32 %v383_v24, 0.0  ;;  %v416_v34 = vmax.f32 %v384_v25, 0.0  ;;  %v285_v36 = vmul.f32 %v598_v0, %v718_v9  ;;  %v359_v32 = vld [vmem:[%s656_s28 + $0xd0] sm:$0xff] }
  0x25   : > { %444 = vst [vmem:[%s712_s5 + $0x78] sm:$0xff] %v412_v20  ;;  %445 = vst [vmem:[%s712_s5 + $0x80] sm:$0xff] %v413_v31  ;;  %v385_v21 = vadd.f32 %v353_v59, %v321_v5  ;;  %v386_v61 = vadd.f32 %v354_v30, %v322_v6  ;;  %v323_v22 = vadd.f32 %v609_v1, %v284_v7  ;;  %v360_v43 = vld [vmem:[%s656_s28 + $0xd8] sm:$0xff]  ;;  %v361_v58 = vld [vmem:[%s656_s28 + $0xe0] sm:$0xff] }
  0x26   : > { %v286_v8 = vmul.f32 %v598_v0, %v721_v10  ;;  %446 = vst [vmem:[%s712_s5 + $0x88] sm:$0xff] %v414_v26  ;;  %447 = vst [vmem:[%s712_s5 + $0x90] sm:$0xff] %v415_v33  ;;  %v324_v27 = vadd.f32 %v609_v1, %v285_v36  ;;  %v287_v9 = vmul.f32 %v598_v0, %v724_v11  ;;  %v362_v60 = vld [vmem:[%s656_s28 + $0xe8] sm:$0xff]  ;;  %v363_v3 = vld [vmem:[%s656_s28 + $0xf0] sm:$0xff] }
  0x27   : > { %448 = vst [vmem:[%s712_s5 + $0x98] sm:$0xff] %v416_v34  ;;  %v288_v38 = vmul.f32 %v598_v0, %v727_v12  ;;  %v289_v40 = vmul.f32 %v598_v0, %v730_v13  ;;  %v417_v41 = vmax.f32 %v385_v21, 0.0  ;;  %v418_v42 = vmax.f32 %v386_v61, 0.0  ;;  %v364_v19 = vld [vmem:[%s656_s28 + $0xf8] sm:$0xff] }
  0x28   : > { %v387_v10 = vadd.f32 %v355_v35, %v323_v22  ;;  %v325_v28 = vadd.f32 %v609_v1, %v286_v8  ;;  %v388_v44 = vadd.f32 %v356_v62, %v324_v27  ;;  %v326_v11 = vadd.f32 %v609_v1, %v287_v9 }
  0x29   : > { %v327_v45 = vadd.f32 %v609_v1, %v288_v38  ;;  %v328_v12 = vadd.f32 %v609_v1, %v289_v40  ;;  %449 = vst [vmem:[%s712_s5 + $0xa0] sm:$0xff] %v417_v41  ;;  %450 = vst [vmem:[%s712_s5 + $0xa8] sm:$0xff] %v418_v42  ;;  %v290_v39 = vmul.f32 %v598_v0, %v733_v14 }
  0x2a   : > { %v419_v13 = vmax.f32 %v387_v10, 0.0  ;;  %v389_v49 = vadd.f32 %v357_v37, %v325_v28  ;;  %v291_v53 = vmul.f32 %v598_v0, %v736_v15  ;;  %v420_v55 = vmax.f32 %v388_v44, 0.0 }
  0x2b   : > { %v390_v56 = vadd.f32 %v358_v29, %v326_v11  ;;  %v391_v57 = vadd.f32 %v359_v32, %v327_v45  ;;  %v392_v46 = vadd.f32 %v360_v43, %v328_v12  ;;  %v329_v47 = vadd.f32 %v609_v1, %v290_v39 }
  0x2c   : > { %451 = vst [vmem:[%s712_s5 + $0xb0] sm:$0xff] %v419_v13  ;;  %v421_v63 = vmax.f32 %v389_v49, 0.0  ;;  %v330_v14 = vadd.f32 %v609_v1, %v291_v53  ;;  %v292_v15 = vmul.f32 %v598_v0, %v739_v16  ;;  %452 = vst [vmem:[%s712_s5 + $0xb8] sm:$0xff] %v420_v55  ;;  %v293_v4 = vmul.f32 %v598_v0, %v742_v17 }
  0x2d   : > { %v422_v2 = vmax.f32 %v390_v56, 0.0  ;;  %v423_v48 = vmax.f32 %v391_v57, 0.0  ;;  %v424_v50 = vmax.f32 %v392_v46, 0.0  ;;  %v393_v18 = vadd.f32 %v361_v58, %v329_v47 }
  0x2e   : > { %453 = vst [vmem:[%s712_s5 + $0xc0] sm:$0xff] %v421_v63  ;;  %v394_v51 = vadd.f32 %v362_v60, %v330_v14  ;;  %v331_v52 = vadd.f32 %v609_v1, %v292_v15  ;;  %v332_v16 = vadd.f32 %v609_v1, %v293_v4 }
  0x2f   : > { %454 = vst [vmem:[%s712_s5 + $0xc8] sm:$0xff] %v422_v2  ;;  %455 = vst [vmem:[%s712_s5 + $0xd0] sm:$0xff] %v423_v48  ;;  %v425_v54 = vmax.f32 %v393_v18, 0.0 }
  0x30   : > { %456 = vst [vmem:[%s712_s5 + $0xd8] sm:$0xff] %v424_v50  ;;  %v426_v20 = vmax.f32 %v394_v51, 0.0  ;;  %v395_v23 = vadd.f32 %v363_v3, %v331_v52  ;;  %v396_v24 = vadd.f32 %v364_v19, %v332_v16 }
  0x31   : > { %457 = vst [vmem:[%s712_s5 + $0xe0] sm:$0xff] %v425_v54 }
  0x32   : > { %458 = vst [vmem:[%s712_s5 + $0xe8] sm:$0xff] %v426_v20  ;;  %v427_v0 = vmax.f32 %v395_v23, 0.0  ;;  %v428_v17 = vmax.f32 %v396_v24, 0.0 }
  0x34   : > { %459 = vst [vmem:[%s712_s5 + $0xf0] sm:$0xff] %v427_v0  ;;  %460 = vst [vmem:[%s712_s5 + $0xf8] sm:$0xff] %v428_v17 }
  0x35 PF: > { %s14_s15 = sadd.s32 1, %s558_s15  }
  0x36   : > { %p11_p4 = scmp.ge.s32.totalorder %s14_s15, 4  }
  0x38   :  { %13 = sbr.rel (!%p11_p4) target bundleno = 1 (0x1), region = 69 }

// kernel: bottleneck_forward.5
= control target key start
LH: loop header
LB: loop body
LE: loop exit
PB: predicated region body
PF: predicated region fallthrough
CT: control target
= control target key end

     0   :  { %s6423_s21 = smov 0   ;;  %s8401_s0 = inlined_call_operand.vmem [shape: f32[2,256,128], index: 0, kind: input, shape index: {}]   ;;  %s8402_s1 = inlined_call_operand.vmem [shape: f32[1,128], index: 1, kind: input, shape index: {}]   ;;  %s8403_s2 = inlined_call_operand.vmem [shape: f32[1,128], index: 2, kind: input, shape index: {}]   ;;  %s8404_s3 = inlined_call_operand.vmem [shape: f32[9,128,128], index: 3, kind: input, shape index: {}]   ;;  %s8405_s4 = inlined_call_operand.vmem [shape: f32[2,256,128], index: 4, kind: output, shape index: {0}]   ;;  %s8406_s5 = inlined_call_operand.vmem [shape: f32[2,8,128], index: 5, kind: output, shape index: {1}]   ;;  %s8407_s6 = inlined_call_operand.vmem [shape: f32[2,8,128], index: 6, kind: output, shape index: {2}]  }
   0x1 LB: > { %s4936_s22 = sadd.s32 4294967295, %s6385_s21   ;;  %p4940_p0 = scmp.ge.s32.totalorder %s6385_s21, 1  ;;  %s6385_s21 = sphi %s6423_s21, %s17_s21  }
   0x2   : > { %p217_p1 = scmp.lt.s32.totalorder %s6385_s21, 3 }
   0x4   : > { %p218_p2 = pnand %p4940_p0, %p217_p1 }
   0x6   : > { %221 = sbr.rel (%p218_p2) target bundleno = 563 (0x233), region = 36 }
   0xb   : > { %v1141_v0 = vld [vmem:[%s8404_s3 + $0x78] sm:$0xff]  ;;  %v1140_v1 = vld [vmem:[%s8404_s3 + $0x70] sm:$0xff]  ;;  %p255_p3 = scmp.lt.s32.totalorder %s4936_s22, 1  ;;  %v8433_v2 = vmov 0.0   ;;  %v1139_v3 = vld [vmem:[%s8404_s3 + $0x68] sm:$0xff]  ;;  %v517_v36 = vlaneseq }
   0xc   : > { %6329 = vmatprep.subr.mxu1 %v1141_v0  ;;  %5609 = vmatprep.subr.mxu0 %v1141_v0  ;;  %415 = vst [vmem:[#allocation2] sm:$0xff] %v8433_v2  ;;  %416 = vst [vmem:[#allocation2 + $0x8] sm:$0xff] %v8433_v2  ;;  %v1138_v4 = vld [vmem:[%s8404_s3 + $0x60] sm:$0xff]  ;;  %v1137_v5 = vld [vmem:[%s8404_s3 + $0x58] sm:$0xff] }
   0xd   : > { %417 = vst [vmem:[#allocation2 + $0x10] sm:$0xff] %v8433_v2  ;;  %450 = vst [vmem:[#allocation2 + $0x118] sm:$0xff] %v8433_v2  ;;  %6345 = vmatpush3.msra.mxu1 %v1141_v0  ;;  %5610 = vmatpush3.msra.mxu0 %v1141_v0  ;;  %s8834_s22 = smov (!%p255_p3, %s4936_s22), 1  ;;  %v6465_v6 = vld [vmem:[%s8402_s1] ss:$0 sm:$0xff]  ;;  %v1136_v14 = vld [vmem:[%s8404_s3 + $0x50] sm:$0xff] }
   0xe   : > { %451 = vst [vmem:[#allocation2 + $0x120] sm:$0xff] %v8433_v2  ;;  %452 = vst [vmem:[#allocation2 + $0x128] sm:$0xff] %v8433_v2  ;;  %6330 = vmatprep.subr.mxu1 %v1140_v1  ;;  %5611 = vmatprep.subr.mxu0 %v1140_v1  ;;  %s5175_s7 = sshll.u32 %s8834_s22, 8  ;;  %v6470_v7 = vld [vmem:[%s8403_s2] ss:$0 sm:$0xff]  ;;  %v1135_v21 = vld [vmem:[%s8404_s3 + $0x48] sm:$0xff] }
   0xf   : > { %6346 = vmatpush3.msra.mxu1 %v1140_v1  ;;  %5612 = vmatpush3.msra.mxu0 %v1140_v1  ;;  %s6460_s12 = scalar_lea.vmem %s8401_s0, %s5175_s7  ;;  %v1134_v31 = vld [vmem:[%s8404_s3 + $0x40] sm:$0xff]  ;;  %v1133_v42 = vld [vmem:[%s8404_s3 + $0x38] sm:$0xff]  ;;  %v1132_v51 = vld [vmem:[%s8404_s3 + $0x30] sm:$0xff]  ;;  %v6550_v57 = vshrl.u32 %v517_v36, 7  ;;  %s8273_s30 = scalar_lea.vmem %s8405_s4, %s5175_s7 }
  0x10   : > { %6331 = vmatprep.subr.mxu1 %v1139_v3  ;;  %5613 = vmatprep.subr.mxu0 %v1139_v3  ;;  %v286_v8 = vld [vmem:[%s6460_s12 + $0x68] sm:$0xff]  ;;  %v287_v9 = vld [vmem:[%s6460_s12 + $0x70] sm:$0xff]  ;;  %v288_v10 = vld [vmem:[%s6460_s12 + $0x78] sm:$0xff]  ;;  %s4945_s7 = sshll.u32 %s8834_s22, 3 }
  0x11   : > { %6347 = vmatpush3.msra.mxu1 %v1139_v3  ;;  %5614 = vmatpush3.msra.mxu0 %v1139_v3  ;;  %v325_v11 = vmul.f32 %v6465_v6, %v286_v8  ;;  %v326_v12 = vmul.f32 %v6465_v6, %v287_v9  ;;  %v327_v13 = vmul.f32 %v6465_v6, %v288_v10  ;;  %v289_v15 = vld [vmem:[%s6460_s12 + $0x80] sm:$0xff]  ;;  %v290_v20 = vld [vmem:[%s6460_s12 + $0x88] sm:$0xff]  ;;  %v291_v30 = vld [vmem:[%s6460_s12 + $0x90] sm:$0xff]  ;;  %s268_s10 = scalar_lea.vmem %s8406_s5, %s4945_s7  ;;  %s272_s13 = scalar_lea.vmem %s8407_s6, %s4945_s7 }
  0x12   : > { %6332 = vmatprep.subr.mxu1 %v1138_v4  ;;  %5615 = vmatprep.subr.mxu0 %v1138_v4  ;;  %v273_v19 = vld [vmem:[%s6460_s12] sm:$0xff]  ;;  %v328_v22 = vmul.f32 %v6465_v6, %v289_v15  ;;  %v329_v24 = vmul.f32 %v6465_v6, %v290_v20  ;;  %v274_v25 = vld [vmem:[%s6460_s12 + $0x8] sm:$0xff]  ;;  %v275_v35 = vld [vmem:[%s6460_s12 + $0x10] sm:$0xff]  ;;  %v330_v38 = vmul.f32 %v6465_v6, %v291_v30 }
  0x13   : > { %6348 = vmatpush3.msra.mxu1 %v1138_v4  ;;  %5616 = vmatpush3.msra.mxu0 %v1138_v4  ;;  %v6483_v16 = vadd.f32 %v6470_v7, %v325_v11  ;;  %v365_v17 = vadd.f32 %v6470_v7, %v326_v12  ;;  %v366_v18 = vadd.f32 %v6470_v7, %v327_v13  ;;  %v292_v40 = vld [vmem:[%s6460_s12 + $0x98] sm:$0xff]  ;;  %v293_v46 = vld [vmem:[%s6460_s12 + $0xa0] sm:$0xff]  ;;  %v294_v55 = vld [vmem:[%s6460_s12 + $0xa8] sm:$0xff] }
  0x14   : > { %6333 = vmatprep.subr.mxu1 %v1137_v5  ;;  %5617 = vmatprep.subr.mxu0 %v1137_v5  ;;  %v312_v23 = vmul.f32 %v6465_v6, %v273_v19  ;;  %v313_v29 = vmul.f32 %v6465_v6, %v274_v25  ;;  %v6503_v32 = vadd.f32 %v6470_v7, %v328_v22  ;;  %v276_v41 = vld [vmem:[%s6460_s12 + $0x18] sm:$0xff]  ;;  %v277_v50 = vld [vmem:[%s6460_s12 + $0x20] sm:$0xff]  ;;  %v278_v56 = vld [vmem:[%s6460_s12 + $0x28] sm:$0xff] }
  0x15   : > { %6349 = vmatpush3.msra.mxu1 %v1137_v5  ;;  %5618 = vmatpush3.msra.mxu0 %v1137_v5  ;;  %v8422_v26 = vmax.f32 %v6483_v16, 0.0  ;;  %v397_v27 = vmax.f32 %v365_v17, 0.0  ;;  %v398_v28 = vmax.f32 %v366_v18, 0.0  ;;  %v6509_v34 = vadd.f32 %v6470_v7, %v329_v24  ;;  %v1131_v61 = vld [vmem:[%s8404_s3 + $0x28] sm:$0xff]  ;;  %v295_v5 = vld [vmem:[%s6460_s12 + $0xb0] sm:$0xff]  ;;  %v1130_v9 = vld [vmem:[%s8404_s3 + $0x20] sm:$0xff] }
  0x16   : > { %6334 = vmatprep.subr.mxu1 %v1136_v14  ;;  %5619 = vmatprep.subr.mxu0 %v1136_v14  ;;  %v6506_v33 = vadd.f32 %v6470_v7, %v312_v23  ;;  %v6515_v37 = vadd.f32 %v6470_v7, %v313_v29  ;;  %v314_v39 = vmul.f32 %v6465_v6, %v275_v35  ;;  %v8421_v43 = vmax.f32 %v6503_v32, 0.0  ;;  %v279_v8 = vld [vmem:[%s6460_s12 + $0x30] sm:$0xff]  ;;  %v296_v13 = vld [vmem:[%s6460_s12 + $0xb8] sm:$0xff]  ;;  %v297_v23 = vld [vmem:[%s6460_s12 + $0xc0] sm:$0xff] }
  0x17   : > { %6350 = vmatpush3.msra.mxu1 %v1136_v14  ;;  %5620 = vmatpush3.msra.mxu0 %v1136_v14  ;;  %466 = vst [vmem:[#allocation2 + $0x80] sm:$0xff] %v8422_v26  ;;  %467 = vst [vmem:[#allocation2 + $0x88] sm:$0xff] %v397_v27  ;;  %v8417_v45 = vmax.f32 %v6509_v34, 0.0  ;;  %v6530_v48 = vadd.f32 %v6470_v7, %v330_v38  ;;  %v331_v52 = vmul.f32 %v6465_v6, %v292_v40  ;;  %v1129_v19 = vld [vmem:[%s8404_s3 + $0x18] sm:$0xff]  ;;  %v281_v40 = vld [vmem:[%s6460_s12 + $0x40] sm:$0xff] }
  0x18   : > { %6335 = vmatprep.subr.mxu1 %v1135_v21  ;;  %5621 = vmatprep.subr.mxu0 %v1135_v21  ;;  %468 = vst [vmem:[#allocation2 + $0x90] sm:$0xff] %v398_v28  ;;  %v8432_v44 = vmax.f32 %v6506_v33, 0.0  ;;  %v8431_v47 = vmax.f32 %v6515_v37, 0.0  ;;  %v6533_v49 = vadd.f32 %v6470_v7, %v314_v39  ;;  %469 = vst [vmem:[#allocation2 + $0x98] sm:$0xff] %v8421_v43  ;;  %v6588_v14 = vadd.s32 128, %v6550_v57  ;;  %v280_v22 = vld [vmem:[%s6460_s12 + $0x38] sm:$0xff] }
  0x19   : > { %6351 = vmatpush3.msra.mxu1 %v1135_v21  ;;  %5622 = vmatpush3.msra.mxu0 %v1135_v21  ;;  %470 = vst [vmem:[#allocation2 + $0xa0] sm:$0xff] %v8417_v45  ;;  %v315_v53 = vmul.f32 %v6465_v6, %v276_v41  ;;  %v332_v54 = vmul.f32 %v6465_v6, %v293_v46  ;;  %v8415_v58 = vmax.f32 %v6530_v48, 0.0  ;;  %v1128_v28 = vld [vmem:[%s8404_s3 + $0x10] sm:$0xff]  ;;  %v554_v29 = vand.u32 15, %v6550_v57  ;;  %v298_v41 = vld [vmem:[%s6460_s12 + $0xc8] sm:$0xff]  ;;  %v5145_v45 = vld [vmem:[%s8404_s3 + $0x420] sm:$0xff] }
  0x1a   : > { %6336 = vmatprep.subr.mxu1 %v1134_v31  ;;  %5623 = vmatprep.subr.mxu0 %v1134_v31  ;;  %453 = vst [vmem:[#allocation2 + $0x18] sm:$0xff] %v8432_v44  ;;  %454 = vst [vmem:[#allocation2 + $0x20] sm:$0xff] %v8431_v47  ;;  %v8430_v59 = vmax.f32 %v6533_v49, 0.0  ;;  %v316_v60 = vmul.f32 %v6465_v6, %v277_v50  ;;  %v6561_v62 = vadd.f32 %v6470_v7, %v331_v52  ;;  %v1127_v46 = vld [vmem:[%s8404_s3 + $0x8] sm:$0xff] }
  0x1b   : > { %6352 = vmatpush3.msra.mxu1 %v1134_v31  ;;  %5624 = vmatpush3.msra.mxu0 %v1134_v31  ;;  %v6564_v63 = vadd.f32 %v6470_v7, %v315_v53  ;;  %v6567_v0 = vadd.f32 %v6470_v7, %v332_v54  ;;  %471 = vst [vmem:[#allocation2 + $0xa8] sm:$0xff] %v8415_v58  ;;  %v666_v35 = vand.u32 15, %v6588_v14  ;;  %v6642_v50 = vadd.s32 144, %v6550_v57  ;;  %v299_v53 = vld [vmem:[%s6460_s12 + $0xd0] sm:$0xff] }
  0x1c   : > { %6337 = vmatprep.subr.mxu1 %v1133_v42  ;;  %5625 = vmatprep.subr.mxu0 %v1133_v42  ;;  %455 = vst [vmem:[#allocation2 + $0x28] sm:$0xff] %v8430_v59  ;;  %v6574_v1 = vadd.f32 %v6470_v7, %v316_v60  ;;  %v333_v3 = vmul.f32 %v6465_v6, %v294_v55  ;;  %v8413_v10 = vmax.f32 %v6561_v62, 0.0  ;;  %v6648_v54 = vadd.s32 16, %v6550_v57  ;;  %v5147_v14 = vld [vmem:[%s8404_s3 + $0x430] sm:$0xff] }
  0x1d   : > { %6353 = vmatpush3.msra.mxu1 %v1133_v42  ;;  %5626 = vmatpush3.msra.mxu0 %v1133_v42  ;;  %v317_v4 = vmul.f32 %v6465_v6, %v278_v56  ;;  %v8429_v11 = vmax.f32 %v6564_v63, 0.0  ;;  %v8412_v12 = vmax.f32 %v6567_v0, 0.0  ;;  %v334_v20 = vmul.f32 %v6465_v6, %v295_v5  ;;  %v282_v42 = vld [vmem:[%s6460_s12 + $0x48] sm:$0xff] }
  0x1e   : > { %6338 = vmatprep.subr.mxu1 %v1132_v51  ;;  %5627 = vmatprep.subr.mxu0 %v1132_v51  ;;  %v8428_v15 = vmax.f32 %v6574_v1, 0.0  ;;  %v6592_v17 = vadd.f32 %v6470_v7, %v333_v3  ;;  %472 = vst [vmem:[#allocation2 + $0xb0] sm:$0xff] %v8413_v10  ;;  %v318_v21 = vmul.f32 %v6465_v6, %v279_v8  ;;  %vm6660_vm0 = vcmp.ge.s32.totalorder %v554_v29, 1  ;;  %v5155_v3 = vld [vmem:[%s8404_s3 + $0x470] sm:$0xff]  ;;  %v5154_v10 = vld [vmem:[%s8404_s3 + $0x468] sm:$0xff] }
  0x1f   : > { %6354 = vmatpush3.msra.mxu1 %v1132_v51  ;;  %5628 = vmatpush3.msra.mxu0 %v1132_v51  ;;  %v6595_v18 = vadd.f32 %v6470_v7, %v317_v4  ;;  %456 = vst [vmem:[#allocation2 + $0x30] sm:$0xff] %v8429_v11  ;;  %473 = vst [vmem:[#allocation2 + $0xb8] sm:$0xff] %v8412_v12  ;;  %v335_v27 = vmul.f32 %v6465_v6, %v296_v13  ;;  %v950_v13 = vld [vmem:[#allocation2 + $0x87] sm:$0xff]  ;;  %vm6672_vm1 = vcmp.ge.s32.totalorder %v666_v35, 1 }
  0x20   : > { %6339 = vmatprep.subr.mxu1 %v1131_v61  ;;  %5629 = vmatprep.subr.mxu0 %v1131_v61  ;;  %457 = vst [vmem:[#allocation2 + $0x38] sm:$0xff] %v8428_v15  ;;  %v8411_v24 = vmax.f32 %v6592_v17, 0.0  ;;  %v6620_v30 = vadd.f32 %v6470_v7, %v334_v20  ;;  %v6623_v31 = vadd.f32 %v6470_v7, %v318_v21  ;;  %v302_v12 = vld [vmem:[%s6460_s12 + $0xe8] sm:$0xff]  ;;  %v548_v59 = vadd.s32 240, %v6550_v57 }
  0x21   : > { %6355 = vmatpush3.msra.mxu1 %v1131_v61  ;;  %5630 = vmatpush3.msra.mxu0 %v1131_v61  ;;  %v8427_v25 = vmax.f32 %v6595_v18, 0.0  ;;  %v6631_v36 = vadd.f32 %v6470_v7, %v335_v27  ;;  %v319_v38 = vmul.f32 %v6465_v6, %v280_v22  ;;  %v336_v39 = vmul.f32 %v6465_v6, %v297_v23  ;;  %v1126_v61 = vld [vmem:[%s8404_s3] sm:$0xff]  ;;  %v951_v23 = vld [vmem:[#allocation2 + $0x8f] sm:$0xff]  ;;  %v4980_v27 = vld [vmem:[%s8404_s3 + $0xf8] sm:$0xff] }
  0x22   : > { %6340 = vmatprep.subr.mxu1 %v1130_v9  ;;  %5631 = vmatprep.subr.mxu0 %v1130_v9  ;;  %474 = vst [vmem:[#allocation2 + $0xc0] sm:$0xff] %v8411_v24  ;;  %v8410_v51 = vmax.f32 %v6620_v30, 0.0  ;;  %v8426_v52 = vmax.f32 %v6623_v31, 0.0  ;;  %v320_v4 = vmul.f32 %v6465_v6, %v281_v40  ;;  %v337_v5 = vmul.f32 %v6465_v6, %v298_v41  ;;  %v934_v22 = vld [vmem:[#allocation2 + $0x7] sm:$0xff] }
  0x23   : > { %6356 = vmatpush3.msra.mxu1 %v1130_v9  ;;  %5632 = vmatpush3.msra.mxu0 %v1130_v9  ;;  %458 = vst [vmem:[#allocation2 + $0x40] sm:$0xff] %v8427_v25  ;;  %v8409_v55 = vmax.f32 %v6631_v36, 0.0  ;;  %v6652_v56 = vadd.f32 %v6470_v7, %v319_v38  ;;  %v6655_v60 = vadd.f32 %v6470_v7, %v336_v39  ;;  %v283_v9 = vld [vmem:[%s6460_s12 + $0x50] sm:$0xff]  ;;  %v568_v39 = vand.u32 15, %v6648_v54 }
  0x24   : > { %6341 = vmatprep.subr.mxu1 %v1129_v19  ;;  %5633 = vmatprep.subr.mxu0 %v1129_v19  ;;  %475 = vst [vmem:[#allocation2 + $0xc8] sm:$0xff] %v8410_v51  ;;  %459 = vst [vmem:[#allocation2 + $0x48] sm:$0xff] %v8426_v52  ;;  %v321_v8 = vmul.f32 %v6465_v6, %v282_v42  ;;  %v338_v21 = vmul.f32 %v6465_v6, %v299_v53  ;;  %v300_v42 = vld [vmem:[%s6460_s12 + $0xd8] sm:$0xff]  ;;  %v935_v53 = vld [vmem:[#allocation2 + $0xf] sm:$0xff]  ;;  %v538_v54 = vadd.s32 160, %v6550_v57 }
  0x25   : > { %6357 = vmatpush3.msra.mxu1 %v1129_v19  ;;  %5634 = vmatpush3.msra.mxu0 %v1129_v19  ;;  %476 = vst [vmem:[#allocation2 + $0xd0] sm:$0xff] %v8409_v55  ;;  %v8425_v19 = vmax.f32 %v6652_v56, 0.0  ;;  %v8408_v20 = vmax.f32 %v6655_v60, 0.0  ;;  %v6686_v29 = vadd.f32 %v6470_v7, %v320_v4  ;;  %v6689_v35 = vadd.f32 %v6470_v7, %v337_v5  ;;  %v303_v25 = vld [vmem:[%s6460_s12 + $0xf0] sm:$0xff] }
  0x26   : > { %6342 = vmatprep.subr.mxu1 %v1128_v28  ;;  %5635 = vmatprep.subr.mxu0 %v1128_v28  ;;  %v6692_v38 = vadd.f32 %v6470_v7, %v321_v8  ;;  %v6700_v40 = vadd.f32 %v6470_v7, %v338_v21  ;;  %v322_v41 = vmul.f32 %v6465_v6, %v283_v9  ;;  %v285_v21 = vld [vmem:[%s6460_s12 + $0x60] sm:$0xff]  ;;  %v4996_v9 = vld [vmem:[%s8404_s3 + $0x178] sm:$0xff]  ;;  %vm6743_vm3 = vcmp.ge.s32.totalorder %v568_v39, 1 }
  0x27   : > { %6358 = vmatpush3.msra.mxu1 %v1128_v28  ;;  %5636 = vmatpush3.msra.mxu0 %v1128_v28  ;;  %v680_v28 = vand.u32 15, %v6642_v50  ;;  %460 = vst [vmem:[#allocation2 + $0x50] sm:$0xff] %v8425_v19  ;;  %477 = vst [vmem:[#allocation2 + $0xd8] sm:$0xff] %v8408_v20  ;;  %v301_v50 = vld [vmem:[%s6460_s12 + $0xe0] sm:$0xff]  ;;  %v8424_v4 = vmax.f32 %v6686_v29, 0.0  ;;  %v8414_v5 = vmax.f32 %v6689_v35, 0.0  ;;  %v339_v24 = vmul.f32 %v6465_v6, %v300_v42 }
  0x28   : > { %6343 = vmatprep.subr.mxu1 %v1127_v46  ;;  %5637 = vmatprep.subr.mxu0 %v1127_v46  ;;  %v8423_v8 = vmax.f32 %v6692_v38, 0.0  ;;  %v6722_v20 = vadd.s32 32, %v6550_v57  ;;  %v8416_v55 = vmax.f32 %v6700_v40, 0.0  ;;  %v361_v51 = vadd.f32 %v6470_v7, %v322_v41 }
  0x29   : > { %6359 = vmatpush3.msra.mxu1 %v1127_v46  ;;  %5638 = vmatpush3.msra.mxu0 %v1127_v46  ;;  %v284_v46 = vld [vmem:[%s6460_s12 + $0x58] sm:$0xff]  ;;  %vm6726_vm2 = vcmp.ge.s32.totalorder %v680_v28, 1  ;;  %461 = vst [vmem:[#allocation2 + $0x58] sm:$0xff] %v8424_v4  ;;  %478 = vst [vmem:[#allocation2 + $0xe0] sm:$0xff] %v8414_v5  ;;  %v4995_v28 = vld [vmem:[%s8404_s3 + $0x170] sm:$0xff]  ;;  %v324_v42 = vmul.f32 %v6465_v6, %v285_v21  ;;  %v342_v15 = vmul.f32 %v6465_v6, %v303_v25 }
  0x2a   : > { %6344 = vmatprep.subr.mxu1 %v1126_v61  ;;  %5639 = vmatprep.subr.mxu0 %v1126_v61  ;;  %462 = vst [vmem:[#allocation2 + $0x60] sm:$0xff] %v8423_v8  ;;  %v323_v41 = vmul.f32 %v6465_v6, %v284_v46  ;;  %479 = vst [vmem:[#allocation2 + $0xe8] sm:$0xff] %v8416_v55  ;;  %v6749_v5 = vmax.f32 %v361_v51, 0.0  ;;  %v936_v46 = vld [vmem:[#allocation2 + $0x17] sm:$0xff]  ;;  %v4978_v51 = vld [vmem:[%s8404_s3 + $0xe8] sm:$0xff]  ;;  %v582_v21 = vand.u32 15, %v6722_v20 }
  0x2b   : > { %6360 = vmatpush3.msra.mxu1 %v1126_v61  ;;  %5665 = vmatprep.mubr.msk.f32.mxu1 %vm6672_vm1, %v950_v13  ;;  %v4979_v13 = vld [vmem:[%s8404_s3 + $0xf0] sm:$0xff]  ;;  %v4994_v20 = vld [vmem:[%s8404_s3 + $0x168] sm:$0xff]  ;;  %v4969_v25 = vld [vmem:[%s8404_s3 + $0xa0] sm:$0xff]  ;;  %v764_v44 = vand.u32 15, %v548_v59 }
  0x2c   : > { %5640 = vmatpush3.msra.mxu0 %v1126_v61  ;;  %5641 = vmatprep.mubr.msk.f32.mxu0 %vm6660_vm0, %v934_v22  ;;  %v952_v61 = vld [vmem:[#allocation2 + $0x97] sm:$0xff]  ;;  %v362_v39 = vadd.f32 %v6470_v7, %v323_v41  ;;  %463 = vst [vmem:[#allocation2 + $0x68] sm:$0xff] %v6749_v5  ;;  %v937_v41 = vld [vmem:[#allocation2 + $0x1f] sm:$0xff]  ;;  %vm6801_vm5 = vcmp.ge.s32.totalorder %v582_v21, 1  ;;  %v5146_v22 = vld [vmem:[%s8404_s3 + $0x428] sm:$0xff] }
  0x2d   : > { %5666 = vmatmul.mubr.f32.vlgmr.msra.gmra.mxu1 %v951_v23  ;;  %5689 = vmatprep.subr.mxu1 %v4980_v27  ;;  %v340_v23 = vmul.f32 %v6465_v6, %v301_v50  ;;  %v953_v50 = vld [vmem:[#allocation2 + $0x9f] sm:$0xff]  ;;  %vm6954_vm14 = vcmp.ge.s32.totalorder %v764_v44, 1  ;;  %v519_v44 = vadd.s32 8, %v6550_v57 }
  0x2e   : > { %5642 = vmatmul.mubr.f32.vlgmr.msra.gmra.mxu0 %v935_v53  ;;  %5690 = vmatpush3.msra.mxu1 %v4980_v27  ;;  %v694_v27 = vand.u32 15, %v538_v54  ;;  %v6753_v53 = vadd.f32 %v6470_v7, %v339_v24  ;;  %v363_v24 = vadd.f32 %v6470_v7, %v324_v42  ;;  %v341_v54 = vmul.f32 %v6465_v6, %v302_v12  ;;  %v4977_v12 = vld [vmem:[%s8404_s3 + $0xe0] sm:$0xff]  ;;  %v6869_v8 = vld [vmem:[#allocation2 + $0x4f] sm:$0xff]  ;;  %v4984_v59 = vld [vmem:[%s8404_s3 + $0x118] sm:$0xff] }
  0x2f   : > { %5769 = vmatprep.subr.mxu0 %v4996_v9  ;;  %5691 = vmatprep.subr.mxu1 %v4979_v13  ;;  %v6757_v58 = vadd.f32 %v6470_v7, %v340_v23 }
  0x30   : > { %5770 = vmatpush3.msra.mxu0 %v4996_v9  ;;  %5668 = vmatprep.mubr.msk.f32.mxu1 %vm6726_vm2, %v952_v61  ;;  %v540_v9 = vadd.s32 176, %v6550_v57  ;;  %v8418_v23 = vmax.f32 %v6753_v53, 0.0  ;;  %v6770_v61 = vmax.f32 %v362_v39, 0.0  ;;  %v6784_v42 = vadd.f32 %v6470_v7, %v341_v54  ;;  %v954_v39 = vld [vmem:[#allocation2 + $0xa7] sm:$0xff]  ;;  %v955_v54 = vld [vmem:[#allocation2 + $0xaf] sm:$0xff]  ;;  %v6890_v19 = vld [vmem:[#allocation2 + $0x57] sm:$0xff] }
  0x31   : > { %5692 = vmatpush3.msra.mxu1 %v4979_v13  ;;  %5771 = vmatprep.subr.mxu0 %v4995_v28  ;;  %v8419_v55 = vmax.f32 %v6757_v58, 0.0  ;;  %v6781_v13 = vmax.f32 %v363_v24, 0.0  ;;  %vm6786_vm4 = vcmp.ge.s32.totalorder %v694_v27, 1  ;;  %v938_v27 = vld [vmem:[#allocation2 + $0x27] sm:$0xff]  ;;  %v6903_v11 = vld [vmem:[#allocation2 + $0x5f] sm:$0xff] }
  0x32   : > { %5644 = vmatprep.mubr.msk.f32.mxu0 %vm6743_vm3, %v936_v46  ;;  %5669 = vmatmul.mubr.f32.gmra.mxu1 %v953_v50  ;;  %v524_v46 = vadd.s32 48, %v6550_v57  ;;  %480 = vst [vmem:[#allocation2 + $0xf0] sm:$0xff] %v8418_v23  ;;  %464 = vst [vmem:[#allocation2 + $0x70] sm:$0xff] %v6770_v61  ;;  %v8420_v50 = vmax.f32 %v6784_v42, 0.0  ;;  %v708_v23 = vand.u32 15, %v540_v9  ;;  %v4992_v9 = vld [vmem:[%s8404_s3 + $0x158] sm:$0xff] }
  0x33   : > { %5693 = vmatprep.subr.mxu1 %v4978_v51  ;;  %5772 = vmatpush3.msra.mxu0 %v4995_v28  ;;  %481 = vst [vmem:[#allocation2 + $0xf8] sm:$0xff] %v8419_v55  ;;  %v4993_v28 = vld [vmem:[%s8404_s3 + $0x160] sm:$0xff]  ;;  %465 = vst [vmem:[#allocation2 + $0x78] sm:$0xff] %v6781_v13  ;;  %v542_v55 = vadd.s32 192, %v6550_v57 }
  0x34   : > { %5645 = vmatmul.mubr.f32.gmra.mxu0 %v937_v41  ;;  %5694 = vmatpush3.msra.mxu1 %v4978_v51  ;;  %v4976_v51 = vld [vmem:[%s8404_s3 + $0xd8] sm:$0xff]  ;;  %482 = vst [vmem:[#allocation2 + $0x100] sm:$0xff] %v8420_v50  ;;  %v939_v41 = vld [vmem:[#allocation2 + $0x2f] sm:$0xff]  ;;  %v596_v21 = vand.u32 15, %v524_v46  ;;  %vm6821_vm6 = vcmp.ge.s32.totalorder %v708_v23, 1  ;;  %v526_v46 = vadd.s32 64, %v6550_v57 }
  0x35   : > { %5773 = vmatprep.subr.mxu0 %v4994_v20  ;;  %5695 = vmatprep.subr.mxu1 %v4977_v12  ;;  %v722_v23 = vand.u32 15, %v542_v55  ;;  %v4990_v55 = vld [vmem:[%s8404_s3 + $0x148] sm:$0xff]  ;;  %v5153_v24 = vld [vmem:[%s8404_s3 + $0x460] sm:$0xff]  ;;  %v5152_v50 = vld [vmem:[%s8404_s3 + $0x458] sm:$0xff] }
  0x36   : > { %5774 = vmatpush3.msra.mxu0 %v4994_v20  ;;  %5671 = vmatprep.mubr.msk.f32.mxu1 %vm6786_vm4, %v954_v39  ;;  %v4975_v20 = vld [vmem:[%s8404_s3 + $0xd0] sm:$0xff]  ;;  %v8551_v39 = vmov 0  ;;  %vm6829_vm7 = vcmp.ge.s32.totalorder %v596_v21, 1  ;;  %v610_v43 = vand.u32 15, %v526_v46  ;;  %v544_v21 = vadd.s32 208, %v6550_v57 }
  0x37   : > { %5696 = vmatpush3.msra.mxu1 %v4977_v12  ;;  %5775 = vmatprep.subr.mxu0 %v4993_v28  ;;  %v956_v12 = vld [vmem:[#allocation2 + $0xb7] sm:$0xff]  ;;  %v8552_v39 = vsel %vm6821_vm6, 4294967295, %v8551_v39  ;;  %vm6849_vm8 = vcmp.ge.s32.totalorder %v722_v23, 1  ;;  %v528_v46 = vadd.s32 80, %v6550_v57  ;;  %v959_v23 = vld [vmem:[#allocation2 + $0xcf] sm:$0xff] }
  0x38   : > { %5647 = vmatprep.mubr.msk.f32.mxu0 %vm6801_vm5, %v938_v27  ;;  %5672 = vmatmul.mubr.f32.gmra.mxu1 %v955_v54  ;;  %8553 = vst [vmem:[#allocation4_spill] sm:$0xff] %v8552_v39  ;;  %v4991_v27 = vld [vmem:[%s8404_s3 + $0x150] sm:$0xff]  ;;  %vm6860_vm9 = vcmp.ge.s32.totalorder %v610_v43, 1  ;;  %v736_v26 = vand.u32 15, %v544_v21  ;;  %v546_v43 = vadd.s32 224, %v6550_v57  ;;  %v4988_v21 = vld [vmem:[%s8404_s3 + $0x138] sm:$0xff] }
  0x39   : > { %5697 = vmatprep.subr.mxu1 %v4976_v51  ;;  %5776 = vmatpush3.msra.mxu0 %v4993_v28  ;;  %v940_v54 = vld [vmem:[#allocation2 + $0x37] sm:$0xff]  ;;  %v957_v28 = vld [vmem:[#allocation2 + $0xbf] sm:$0xff]  ;;  %v624_v4 = vand.u32 15, %v528_v46  ;;  %v530_v46 = vadd.s32 96, %v6550_v57  ;;  %v6941_v2 = vld [vmem:[#allocation2 + $0x6f] sm:$0xff] }
  0x3a   : > { %5648 = vmatmul.mubr.f32.gmra.mxu0 %v939_v41  ;;  %5698 = vmatpush3.msra.mxu1 %v4976_v51  ;;  %v4974_v51 = vld [vmem:[%s8404_s3 + $0xc8] sm:$0xff]  ;;  %v6838_v41 = vld [vmem:[#allocation2 + $0x3f] sm:$0xff]  ;;  %vm6881_vm10 = vcmp.ge.s32.totalorder %v736_v26, 1  ;;  %v750_v52 = vand.u32 15, %v546_v43 }
  0x3b   : > { %5777 = vmatprep.subr.mxu0 %v4992_v9  ;;  %5699 = vmatprep.subr.mxu1 %v4975_v20  ;;  %vm6892_vm11 = vcmp.ge.s32.totalorder %v624_v4, 1  ;;  %v961_v26 = vld [vmem:[#allocation2 + $0xdf] sm:$0xff]  ;;  %v638_v4 = vand.u32 15, %v530_v46  ;;  %v4986_v43 = vld [vmem:[%s8404_s3 + $0x128] sm:$0xff]  ;;  %v532_v46 = vadd.s32 112, %v6550_v57 }
  0x3c   : > { %5778 = vmatpush3.msra.mxu0 %v4992_v9  ;;  %5674 = vmatprep.mubr.msk.f32.mxu1 %vm6821_vm6, %v956_v12  ;;  %v4973_v9 = vld [vmem:[%s8404_s3 + $0xc0] sm:$0xff]  ;;  %v8556_v12 = vmov 0  ;;  %vm6918_vm12 = vcmp.ge.s32.totalorder %v750_v52, 1  ;;  %v304_v39 = vld [vmem:[%s6460_s12 + $0xf8] sm:$0xff] }
  0x3d   : > { %5700 = vmatpush3.msra.mxu1 %v4975_v20  ;;  %5779 = vmatprep.subr.mxu0 %v4991_v27  ;;  %v958_v20 = vld [vmem:[#allocation2 + $0xc7] sm:$0xff]  ;;  %v8557_v12 = vsel %vm6849_vm8, 4294967295, %v8556_v12  ;;  %vm6930_vm13 = vcmp.ge.s32.totalorder %v638_v4, 1  ;;  %v652_v4 = vand.u32 15, %v532_v46  ;;  %v4983_v46 = vld [vmem:[%s8404_s3 + $0x110] sm:$0xff] }
  0x3e   : > { %5650 = vmatprep.mubr.msk.f32.mxu0 %vm6829_vm7, %v940_v54  ;;  %5675 = vmatmul.mubr.f32.gmra.mxu1 %v957_v28  ;;  %8558 = vst [vmem:[#allocation5_spill] sm:$0xff] %v8557_v12  ;;  %v4989_v54 = vld [vmem:[%s8404_s3 + $0x140] sm:$0xff]  ;;  %v523_v12 = vadd.s32 40, %v6550_v57 }
  0x3f   : > { %5701 = vmatprep.subr.mxu1 %v4974_v51  ;;  %5780 = vmatpush3.msra.mxu0 %v4991_v27  ;;  %v6858_v28 = vld [vmem:[#allocation2 + $0x47] sm:$0xff]  ;;  %vm6964_vm15 = vcmp.ge.s32.totalorder %v652_v4, 1 }
  0x40   : > { %5651 = vmatmul.mubr.f32.gmra.mxu0 %v6838_v41  ;;  %5702 = vmatpush3.msra.mxu1 %v4974_v51  ;;  %v4972_v51 = vld [vmem:[%s8404_s3 + $0xb8] sm:$0xff]  ;;  %v4982_v4 = vld [vmem:[%s8404_s3 + $0x108] sm:$0xff]  ;;  %v5149_v52 = vld [vmem:[%s8404_s3 + $0x440] sm:$0xff] }
  0x41   : > { %5781 = vmatprep.subr.mxu0 %v4990_v55  ;;  %5703 = vmatprep.subr.mxu1 %v4973_v9 }
  0x42   : > { %5782 = vmatpush3.msra.mxu0 %v4990_v55  ;;  %5677 = vmatprep.mubr.msk.f32.mxu1 %vm6849_vm8, %v958_v20  ;;  %v4971_v55 = vld [vmem:[%s8404_s3 + $0xb0] sm:$0xff]  ;;  %v8561_v20 = vmov 0 }
  0x43   : > { %5704 = vmatpush3.msra.mxu1 %v4973_v9  ;;  %5783 = vmatprep.subr.mxu0 %v4989_v54  ;;  %v960_v9 = vld [vmem:[#allocation2 + $0xd7] sm:$0xff]  ;;  %v8562_v20 = vsel %vm6881_vm10, 4294967295, %v8561_v20 }
  0x44   : > { %5653 = vmatprep.mubr.msk.f32.mxu0 %vm6860_vm9, %v6858_v28  ;;  %5678 = vmatmul.mubr.f32.gmra.mxu1 %v959_v23  ;;  %8563 = vst [vmem:[#allocation6_spill] sm:$0xff] %v8562_v20  ;;  %v4987_v23 = vld [vmem:[%s8404_s3 + $0x130] sm:$0xff]  ;;  %v8580_v20 = vmov 0 }
  0x45   : > { %5705 = vmatprep.subr.mxu1 %v4972_v51  ;;  %5784 = vmatpush3.msra.mxu0 %v4989_v54  ;;  %v5150_v54 = vld [vmem:[%s8404_s3 + $0x448] sm:$0xff] }
  0x46   : > { %5654 = vmatmul.mubr.f32.gmra.mxu0 %v6869_v8  ;;  %5706 = vmatpush3.msra.mxu1 %v4972_v51  ;;  %v4970_v51 = vld [vmem:[%s8404_s3 + $0xa8] sm:$0xff] }
  0x47   : > { %5785 = vmatprep.subr.mxu0 %v4988_v21  ;;  %5707 = vmatprep.subr.mxu1 %v4971_v55 }
  0x48   : > { %5786 = vmatpush3.msra.mxu0 %v4988_v21  ;;  %5680 = vmatprep.mubr.msk.f32.mxu1 %vm6881_vm10, %v960_v9  ;;  %v6916_v21 = vadd.f32 %v6470_v7, %v342_v15  ;;  %v8567_v9 = vmov 0  ;;  %v6928_v15 = vld [vmem:[#allocation2 + $0x67] sm:$0xff] }
  0x49   : > { %5708 = vmatpush3.msra.mxu1 %v4971_v55  ;;  %5787 = vmatprep.subr.mxu0 %v4987_v23  ;;  %v962_v55 = vld [vmem:[#allocation2 + $0xe7] sm:$0xff]  ;;  %v8568_v9 = vsel %vm6918_vm12, 4294967295, %v8567_v9 }
  0x4a   : > { %5656 = vmatprep.mubr.msk.f32.mxu0 %vm6892_vm11, %v6890_v19  ;;  %5681 = vmatmul.mubr.f32.gmra.mxu1 %v961_v26  ;;  %8566 = vst [vmem:[#allocation7_spill] sm:$0xff] %v6916_v21  ;;  %8569 = vst [vmem:[#allocation8_spill] sm:$0xff] %v8568_v9  ;;  %v4985_v26 = vld [vmem:[%s8404_s3 + $0x120] sm:$0xff]  ;;  %v8435_v47 = vmax.f32 %v6916_v21, 0.0  ;;  %v1801_v9 = vld [vmem:[#allocation2 + $0x9] sm:$0xff] }
  0x4b   : > { %5709 = vmatprep.subr.mxu1 %v4970_v51  ;;  %5788 = vmatpush3.msra.mxu0 %v4987_v23  ;;  %v963_v23 = vld [vmem:[#allocation2 + $0xef] sm:$0xff]  ;;  %v6977_v21 = vld [vmem:[#allocation2 + $0x7f] sm:$0xff] }
  0x4c   : > { %5657 = vmatmul.mubr.f32.gmra.mxu0 %v6903_v11  ;;  %5710 = vmatpush3.msra.mxu1 %v4970_v51  ;;  %v4968_v51 = vld [vmem:[%s8404_s3 + $0x98] sm:$0xff]  ;;  %483 = vst [vmem:[#allocation2 + $0x108] sm:$0xff] %v8435_v47 }
  0x4d   : > { %5789 = vmatprep.subr.mxu0 %v4986_v43  ;;  %5711 = vmatprep.subr.mxu1 %v4969_v25  ;;  %v5148_v47 = vld [vmem:[%s8404_s3 + $0x438] sm:$0xff] }
  0x4e   : > { %5790 = vmatpush3.msra.mxu0 %v4986_v43  ;;  %5683 = vmatprep.mubr.msk.f32.mxu1 %vm6918_vm12, %v962_v55  ;;  %v4967_v43 = vld [vmem:[%s8404_s3 + $0x90] sm:$0xff]  ;;  %v8573_v55 = vmov 0 }
  0x4f   : > { %5712 = vmatpush3.msra.mxu1 %v4969_v25  ;;  %5791 = vmatprep.subr.mxu0 %v4985_v26  ;;  %v6952_v25 = vld [vmem:[#allocation2 + $0xf7] sm:$0xff]  ;;  %v8574_v55 = vsel %vm6954_vm14, 4294967295, %v8573_v55 }
  0x50   : > { %5659 = vmatprep.mubr.msk.f32.mxu0 %vm6930_vm13, %v6928_v15  ;;  %5684 = vmatmul.mubr.f32.gmra.mxu1 %v963_v23  ;;  %8572 = vst [vmem:[#allocation9_spill] sm:$0xff] %v6952_v25  ;;  %8575 = vst [vmem:[#allocation10_spill] sm:$0xff] %v8574_v55  ;;  %v6962_v23 = vld [vmem:[#allocation2 + $0x77] sm:$0xff]  ;;  %v521_v55 = vadd.s32 24, %v6550_v57 }
  0x51   : > { %5713 = vmatprep.subr.mxu1 %v4968_v51  ;;  %5792 = vmatpush3.msra.mxu0 %v4985_v26  ;;  %v6968_v26 = vld [vmem:[#allocation2 + $0xff] sm:$0xff] }
  0x52   : > { %5660 = vmatmul.mubr.f32.gmra.mxu0 %v6941_v2  ;;  %5714 = vmatpush3.msra.mxu1 %v4968_v51  ;;  %8578 = vst [vmem:[#allocation11_spill] sm:$0xff] %v6968_v26  ;;  %v4966_v51 = vld [vmem:[%s8404_s3 + $0x88] sm:$0xff] }
  0x53   : > { %5793 = vmatprep.subr.mxu0 %v4984_v59  ;;  %5715 = vmatprep.subr.mxu1 %v4967_v43 }
  0x54   : > { %5794 = vmatpush3.msra.mxu0 %v4984_v59  ;;  %5686 = vmatprep.mubr.msk.f32.mxu1 %vm6954_vm14, %v6952_v25  ;;  %v4965_v59 = vld [vmem:[%s8404_s3 + $0x80] sm:$0xff]  ;;  %v5028_v25 = vld [vmem:[%s8404_s3 + $0x1f8] sm:$0xff] }
  0x55   : > { %5716 = vmatpush3.msra.mxu1 %v4967_v43  ;;  %5795 = vmatprep.subr.mxu0 %v4983_v46  ;;  %v561_v43 = vand.u32 15, %v519_v44  ;;  %v1802_v44 = vld [vmem:[#allocation2 + $0x11] sm:$0xff] }
  0x56   : > { %5662 = vmatprep.mubr.msk.f32.mxu0 %vm6964_vm15, %v6962_v23  ;;  %5687 = vmatmul.mubr.f32.gmra.mxu1 %v6968_v26  ;;  %v4981_v26 = vld [vmem:[%s8404_s3 + $0x100] sm:$0xff] }
  0x57   : > { %5717 = vmatprep.subr.mxu1 %v4966_v51  ;;  %5796 = vmatpush3.msra.mxu0 %v4983_v46  ;;  %v8579_v46 = vmov 0.0   ;;  %vm6998_vm14 = vcmp.le.s32.totalorder %v561_v43, 14  ;;  %v7016_v43 = vld [vmem:[#allocation2 + $0x21] sm:$0xff] }
  0x58   : > { %5663 = vmatmul.mubr.f32.gmra.mxu0 %v6977_v21  ;;  %5718 = vmatpush3.msra.mxu1 %v4966_v51  ;;  %v8581_v20 = vsel %vm6998_vm14, 4294967295, %v8580_v20  ;;  %v575_v51 = vand.u32 15, %v521_v55  ;;  %v5027_v55 = vld [vmem:[%s8404_s3 + $0x1f0] sm:$0xff] }
  0x59   : > { %5797 = vmatprep.subr.mxu0 %v4982_v4  ;;  %5719 = vmatprep.subr.mxu1 %v4965_v59  ;;  %8582 = vst [vmem:[#allocation12_spill] sm:$0xff] %v8581_v20  ;;  %v5059_v20 = vld [vmem:[%s8404_s3 + $0x270] sm:$0xff] }
  0x5a   : > { %5798 = vmatpush3.msra.mxu0 %v4982_v4  ;;  %5720 = vmatpush3.msra.mxu1 %v4965_v59  ;;  %v5060_v4 = vld [vmem:[%s8404_s3 + $0x278] sm:$0xff]  ;;  %vm7018_vm12 = vcmp.le.s32.totalorder %v575_v51, 14  ;;  %v8587_v51 = vmax.f32 %v6533_v49, 0.0  ;;  %v5058_v49 = vld [vmem:[%s8404_s3 + $0x268] sm:$0xff] }
  0x5b   : > { %5721 = vmatprep.mubr.f32.mxu1 %v8579_v46  ;;  %5799 = vmatprep.subr.mxu0 %v4981_v26  ;;  %v7009_v59 = vld [vmem:[#allocation2 + $0x19] sm:$0xff] }
  0x5c   : > { %5722 = vmatmul.mubr.f32.vlgmr.msra.gmra.mxu1 %v8579_v46  ;;  %5800 = vmatpush3.msra.mxu0 %v4981_v26  ;;  %v8583_v26 = vmax.f32 %v6506_v33, 0.0  ;;  %v8584_v46 = vmov 0  ;;  %v343_v33 = vmul.f32 %v6465_v6, %v304_v39  ;;  %v527_v39 = vadd.s32 72, %v6550_v57 }
  0x5d   : > { %5801 = vmatprep.mubr.f32.mxu0 %v1801_v9  ;;  %5849 = vmatprep.subr.mxu1 %v5028_v25  ;;  %v8585_v46 = vsel %vm7018_vm12, 4294967295, %v8584_v46  ;;  %v589_v9 = vand.u32 15, %v523_v12  ;;  %v7034_v12 = vld [vmem:[#allocation2 + $0x29] sm:$0xff] }
  0x5e   : > { %5802 = vmatmul.mubr.msk.f32.vlgmr.msra.gmra.mxu0 %vm6998_vm14, %v1802_v44  ;;  %5850 = vmatpush3.msra.mxu1 %v5028_v25  ;;  %v525_v44 = vadd.s32 56, %v6550_v57  ;;  %v8586_v25 = vmax.f32 %v6515_v37, 0.0  ;;  %v5026_v37 = vld [vmem:[%s8404_s3 + $0x1e8] sm:$0xff] }
  0x5f   : > { %5929 = vmatprep.subr.mxu0 %v5060_v4  ;;  %5724 = vmatprep.mubr.f32.mxu1 %v8583_v26  ;;  %vm7043_vm14 = vcmp.le.s32.totalorder %v589_v9, 14  ;;  %v8588_v26 = vmov 0 }
  0x60   : > { %5930 = vmatpush3.msra.mxu0 %v5060_v4  ;;  %5725 = vmatmul.mubr.f32.gmra.mxu1 %v8586_v25  ;;  %v7041_v4 = vld [vmem:[#allocation2 + $0x31] sm:$0xff]  ;;  %v8589_v26 = vsel %vm7043_vm14, 4294967295, %v8588_v26  ;;  %v603_v6 = vand.u32 15, %v525_v44  ;;  %v8590_v25 = vmax.f32 %v6564_v63, 0.0  ;;  %v5025_v63 = vld [vmem:[%s8404_s3 + $0x1e0] sm:$0xff] }
  0x61   : > { %5804 = vmatprep.mubr.f32.mxu0 %v7009_v59  ;;  %5851 = vmatprep.subr.mxu1 %v5027_v55  ;;  %v7068_v44 = vld [vmem:[#allocation2 + $0x41] sm:$0xff] }
  0x62   : > { %5805 = vmatmul.mubr.msk.f32.gmra.mxu0 %vm7018_vm12, %v7016_v43  ;;  %5852 = vmatpush3.msra.mxu1 %v5027_v55  ;;  %v7049_v55 = vadd.f32 %v6470_v7, %v343_v33  ;;  %v7061_v7 = vld [vmem:[#allocation2 + $0x39] sm:$0xff]  ;;  %vm7070_vm12 = vcmp.le.s32.totalorder %v603_v6, 14  ;;  %v8592_v33 = vmov 0  ;;  %v7086_v6 = vld [vmem:[#allocation2 + $0x49] sm:$0xff] }
  0x63   : > { %5931 = vmatprep.subr.mxu0 %v5059_v20  ;;  %5727 = vmatprep.mubr.f32.mxu1 %v8587_v51  ;;  %v8593_v33 = vsel %vm7070_vm12, 4294967295, %v8592_v33  ;;  %v617_v51 = vand.u32 15, %v527_v39  ;;  %v5024_v39 = vld [vmem:[%s8404_s3 + $0x1d8] sm:$0xff] }
  0x64   : > { %5932 = vmatpush3.msra.mxu0 %v5059_v20  ;;  %5728 = vmatmul.mubr.f32.gmra.mxu1 %v8590_v25  ;;  %v8461_v9 = vmax.f32 %v7049_v55, 0.0  ;;  %v8591_v20 = vmax.f32 %v6574_v1, 0.0  ;;  %8594 = vst [vmem:[#allocation13_spill] sm:$0xff] %v8593_v33  ;;  %v529_v25 = vadd.s32 88, %v6550_v57  ;;  %v5057_v1 = vld [vmem:[%s8404_s3 + $0x260] sm:$0xff]  ;;  %v5056_v33 = vld [vmem:[%s8404_s3 + $0x258] sm:$0xff] }
  0x65   : > { %5807 = vmatprep.mubr.f32.mxu0 %v7034_v12  ;;  %5853 = vmatprep.subr.mxu1 %v5026_v37 }
  0x66   : > { %5808 = vmatmul.mubr.msk.f32.gmra.mxu0 %vm7043_vm14, %v7041_v4  ;;  %5854 = vmatpush3.msra.mxu1 %v5026_v37  ;;  %484 = vst [vmem:[#allocation2 + $0x110] sm:$0xff] %v8461_v9  ;;  %v8595_v37 = vmax.f32 %v6595_v18, 0.0  ;;  %v8596_v18 = vmax.f32 %v6623_v31, 0.0  ;;  %vm7095_vm14 = vcmp.le.s32.totalorder %v617_v51, 14  ;;  %v531_v9 = vadd.s32 104, %v6550_v57  ;;  %v7109_v31 = vld [vmem:[#allocation2 + $0x59] sm:$0xff] }
  0x67   : > { %5933 = vmatprep.subr.mxu0 %v5058_v49  ;;  %5730 = vmatprep.mubr.f32.mxu1 %v8591_v20  ;;  %v8597_v20 = vmov 0  ;;  %v5023_v51 = vld [vmem:[%s8404_s3 + $0x1d0] sm:$0xff] }
  0x68   : > { %5934 = vmatpush3.msra.mxu0 %v5058_v49  ;;  %5731 = vmatmul.mubr.f32.gmra.mxu1 %v8595_v37  ;;  %v7093_v49 = vld [vmem:[#allocation2 + $0x51] sm:$0xff]  ;;  %v8598_v20 = vsel %vm7095_vm14, 4294967295, %v8597_v20  ;;  %v631_v37 = vand.u32 15, %v529_v25  ;;  %v7116_v25 = vld [vmem:[#allocation2 + $0x61] sm:$0xff] }
  0x69   : > { %5810 = vmatprep.mubr.f32.mxu0 %v7061_v7  ;;  %5855 = vmatprep.subr.mxu1 %v5025_v63  ;;  %8599 = vst [vmem:[#allocation14_spill] sm:$0xff] %v8598_v20  ;;  %v5055_v20 = vld [vmem:[%s8404_s3 + $0x250] sm:$0xff] }
  0x6a   : > { %5811 = vmatmul.mubr.msk.f32.gmra.mxu0 %vm7070_vm12, %v7068_v44  ;;  %5856 = vmatpush3.msra.mxu1 %v5025_v63  ;;  %v8600_v63 = vmax.f32 %v6652_v56, 0.0  ;;  %v8601_v56 = vmax.f32 %v6686_v29, 0.0  ;;  %vm7118_vm12 = vcmp.le.s32.totalorder %v631_v37, 14  ;;  %v7132_v29 = vld [vmem:[#allocation2 + $0x69] sm:$0xff] }
  0x6b   : > { %5935 = vmatprep.subr.mxu0 %v5057_v1  ;;  %5733 = vmatprep.mubr.f32.mxu1 %v8596_v18  ;;  %v645_v18 = vand.u32 15, %v531_v9  ;;  %8606 = vst [vmem:[#allocation16_spill] sm:$0xff] %v7132_v29  ;;  %v5022_v9 = vld [vmem:[%s8404_s3 + $0x1c8] sm:$0xff] }
  0x6c   : > { %5936 = vmatpush3.msra.mxu0 %v5057_v1  ;;  %5734 = vmatmul.mubr.f32.gmra.mxu1 %v8600_v63  ;;  %v8602_v1 = vmov 0  ;;  %v533_v63 = vadd.s32 120, %v6550_v57 }
  0x6d   : > { %5813 = vmatprep.mubr.f32.mxu0 %v7086_v6  ;;  %5857 = vmatprep.subr.mxu1 %v5024_v39  ;;  %v8603_v1 = vsel %vm7118_vm12, 4294967295, %v8602_v1 }
  0x6e   : > { %5814 = vmatmul.mubr.msk.f32.gmra.mxu0 %vm7095_vm14, %v7093_v49  ;;  %5858 = vmatpush3.msra.mxu1 %v5024_v39  ;;  %8604 = vst [vmem:[#allocation15_spill] sm:$0xff] %v8603_v1  ;;  %v8605_v39 = vmax.f32 %v6692_v38, 0.0  ;;  %v7138_v38 = vld [vmem:[#allocation2 + $0x71] sm:$0xff]  ;;  %vm7140_vm14 = vcmp.le.s32.totalorder %v645_v18, 14  ;;  %v659_v37 = vand.u32 15, %v533_v63  ;;  %v7153_v18 = vld [vmem:[#allocation2 + $0x79] sm:$0xff] }
  0x6f   : > { %5937 = vmatprep.subr.mxu0 %v5056_v33  ;;  %5736 = vmatprep.mubr.f32.mxu1 %v8601_v56  ;;  %8607 = vst [vmem:[#allocation17_spill] sm:$0xff] %v7138_v38  ;;  %v535_v56 = vadd.s32 136, %v6550_v57  ;;  %8611 = vst [vmem:[#allocation19_spill] sm:$0xff] %v7153_v18  ;;  %v7159_v63 = vld [vmem:[#allocation2 + $0x81] sm:$0xff] }
  0x70   : > { %5938 = vmatpush3.msra.mxu0 %v5056_v33  ;;  %5737 = vmatmul.mubr.f32.gmra.mxu1 %v8605_v39  ;;  %v8608_v33 = vmov 0  ;;  %8612 = vst [vmem:[#allocation20_spill] sm:$0xff] %v7159_v63  ;;  %v8613_v39 = vmov 0 }
  0x71   : > { %5816 = vmatprep.mubr.f32.mxu0 %v7109_v31  ;;  %5859 = vmatprep.subr.mxu1 %v5023_v51  ;;  %v8609_v33 = vsel %vm7140_vm14, 4294967295, %v8608_v33  ;;  %v673_v1 = vand.u32 15, %v535_v56  ;;  %v7183_v56 = vld [vmem:[#allocation2 + $0x91] sm:$0xff] }
  0x72   : > { %5817 = vmatmul.mubr.msk.f32.gmra.mxu0 %vm7118_vm12, %v7116_v25  ;;  %5860 = vmatpush3.msra.mxu1 %v5023_v51  ;;  %8610 = vst [vmem:[#allocation18_spill] sm:$0xff] %v8609_v33  ;;  %v5054_v51 = vld [vmem:[%s8404_s3 + $0x248] sm:$0xff]  ;;  %vm7161_vm12 = vcmp.le.s32.totalorder %v659_v37, 14  ;;  %v537_v33 = vadd.s32 152, %v6550_v57  ;;  %8618 = vst [vmem:[#allocation23_spill] sm:$0xff] %v7183_v56 }
  0x73   : > { %5939 = vmatprep.subr.mxu0 %v5055_v20  ;;  %5739 = vmatprep.mubr.f32.mxu1 %v6749_v5  ;;  %v8614_v39 = vsel %vm7161_vm12, 4294967295, %v8613_v39  ;;  %v7177_v37 = vld [vmem:[#allocation2 + $0x89] sm:$0xff] }
  0x74   : > { %5940 = vmatpush3.msra.mxu0 %v5055_v20  ;;  %5740 = vmatmul.mubr.f32.gmra.mxu1 %v6770_v61  ;;  %v5021_v20 = vld [vmem:[%s8404_s3 + $0x1c0] sm:$0xff]  ;;  %8615 = vst [vmem:[#allocation21_spill] sm:$0xff] %v8614_v39  ;;  %8617 = vst [vmem:[#allocation22_spill] sm:$0xff] %v7177_v37  ;;  %v539_v39 = vadd.s32 168, %v6550_v57 }
  0x75   : > { %5819 = vmatprep.mubr.f32.mxu0 %v7132_v29  ;;  %5861 = vmatprep.subr.mxu1 %v5022_v9  ;;  %v7171_v29 = vld [vmem:[#allocation2 + $0x88] sm:$0xff] }
  0x76   : > { %5820 = vmatmul.mubr.msk.f32.gmra.mxu0 %vm7140_vm14, %v7138_v38  ;;  %5862 = vmatpush3.msra.mxu1 %v5022_v9  ;;  %v8616_v9 = vmax.f32 %v6483_v16, 0.0  ;;  %v5053_v38 = vld [vmem:[%s8404_s3 + $0x240] sm:$0xff]  ;;  %v5020_v16 = vld [vmem:[%s8404_s3 + $0x1b8] sm:$0xff]  ;;  %vm7185_vm14 = vcmp.le.s32.totalorder %v673_v1, 14 }
  0x77   : > { %5941 = vmatprep.subr.mxu0 %v5054_v51  ;;  %5742 = vmatprep.mubr.f32.mxu1 %v6781_v13  ;;  %v7197_v1 = vld [vmem:[#allocation2 + $0x99] sm:$0xff] }
  0x78   : > { %5942 = vmatpush3.msra.mxu0 %v5054_v51  ;;  %5743 = vmatmul.mubr.f32.gmra.mxu1 %v8616_v9  ;;  %v8619_v51 = vmov 0  ;;  %v687_v9 = vand.u32 15, %v537_v33  ;;  %v8622_v33 = vmax.f32 %v6503_v32, 0.0  ;;  %v7220_v32 = vld [vmem:[#allocation2 + $0xa9] sm:$0xff]  ;;  %v8699_v27 = vld [vmem:[#allocation17_spill] sm:$0xff] }
  0x79   : > { %5822 = vmatprep.mubr.f32.mxu0 %v7153_v18  ;;  %5863 = vmatprep.subr.mxu1 %v5021_v20  ;;  %v8620_v51 = vsel %vm7185_vm14, 4294967295, %v8619_v51  ;;  %v701_v18 = vand.u32 15, %v539_v39  ;;  %v7227_v39 = vld [vmem:[#allocation2 + $0xb1] sm:$0xff] }
  0x7a   : > { %5823 = vmatmul.mubr.msk.f32.gmra.mxu0 %vm7161_vm12, %v7159_v63  ;;  %5864 = vmatpush3.msra.mxu1 %v5021_v20  ;;  %8621 = vst [vmem:[#allocation24_spill] sm:$0xff] %v8620_v51  ;;  %v6370_v20 = vld [vmem:[#allocation2 + $0x90] sm:$0xff]  ;;  %v5052_v63 = vld [vmem:[%s8404_s3 + $0x238] sm:$0xff]  ;;  %vm7206_vm12 = vcmp.le.s32.totalorder %v687_v9, 14  ;;  %v541_v51 = vadd.s32 184, %v6550_v57  ;;  %v8628_v9 = vmov 0 }
  0x7b   : > { %5943 = vmatprep.subr.mxu0 %v5053_v38  ;;  %5745 = vmatprep.mubr.f32.mxu1 %v7171_v29 }
  0x7c   : > { %5944 = vmatpush3.msra.mxu0 %v5053_v38  ;;  %5746 = vmatmul.mubr.f32.gmra.mxu1 %v6370_v20  ;;  %v5019_v38 = vld [vmem:[%s8404_s3 + $0x1b0] sm:$0xff]  ;;  %v7204_v20 = vld [vmem:[#allocation2 + $0xa1] sm:$0xff] }
  0x7d   : > { %5825 = vmatprep.mubr.f32.mxu0 %v7177_v37  ;;  %5865 = vmatprep.subr.mxu1 %v5020_v16  ;;  %v8623_v37 = vmov 0 }
  0x7e   : > { %5826 = vmatmul.mubr.msk.f32.gmra.mxu0 %vm7185_vm14, %v7183_v56  ;;  %5866 = vmatpush3.msra.mxu1 %v5020_v16  ;;  %v8624_v37 = vsel %vm7206_vm12, 4294967295, %v8623_v37  ;;  %v8626_v16 = vmax.f32 %v6509_v34, 0.0  ;;  %v5051_v56 = vld [vmem:[%s8404_s3 + $0x230] sm:$0xff]  ;;  %v8627_v34 = vmax.f32 %v6530_v48, 0.0  ;;  %vm7229_vm14 = vcmp.le.s32.totalorder %v701_v18, 14  ;;  %v7243_v48 = vld [vmem:[#allocation2 + $0xb9] sm:$0xff] }
  0x7f   : > { %5945 = vmatprep.subr.mxu0 %v5052_v63  ;;  %5748 = vmatprep.mubr.f32.mxu1 %v8622_v33  ;;  %8625 = vst [vmem:[#allocation25_spill] sm:$0xff] %v8624_v37  ;;  %v8629_v9 = vsel %vm7229_vm14, 4294967295, %v8628_v9  ;;  %v715_v33 = vand.u32 15, %v541_v51  ;;  %v5050_v37 = vld [vmem:[%s8404_s3 + $0x228] sm:$0xff]  ;;  %v5017_v18 = vld [vmem:[%s8404_s3 + $0x1a0] sm:$0xff]  ;;  %v8633_v51 = vmov 0 }
  0x80   : > { %5946 = vmatpush3.msra.mxu0 %v5052_v63  ;;  %5749 = vmatmul.mubr.f32.gmra.mxu1 %v8626_v16  ;;  %v5018_v63 = vld [vmem:[%s8404_s3 + $0x1a8] sm:$0xff]  ;;  %8630 = vst [vmem:[#allocation26_spill] sm:$0xff] %v8629_v9  ;;  %v543_v16 = vadd.s32 200, %v6550_v57  ;;  %v5049_v9 = vld [vmem:[%s8404_s3 + $0x220] sm:$0xff] }
  0x81   : > { %5828 = vmatprep.mubr.f32.mxu0 %v7197_v1  ;;  %5867 = vmatprep.subr.mxu1 %v5019_v38 }
  0x82   : > { %5829 = vmatmul.mubr.msk.f32.gmra.mxu0 %vm7206_vm12, %v7204_v20  ;;  %5868 = vmatpush3.msra.mxu1 %v5019_v38  ;;  %v8631_v38 = vmax.f32 %v6561_v62, 0.0  ;;  %v8632_v62 = vmax.f32 %v6567_v0, 0.0  ;;  %vm7252_vm12 = vcmp.le.s32.totalorder %v715_v33, 14  ;;  %v7266_v0 = vld [vmem:[#allocation2 + $0xc9] sm:$0xff]  ;;  %v7273_v33 = vld [vmem:[#allocation2 + $0xd1] sm:$0xff] }
  0x83   : > { %5947 = vmatprep.subr.mxu0 %v5051_v56  ;;  %5751 = vmatprep.mubr.f32.mxu1 %v8627_v34  ;;  %v8634_v51 = vsel %vm7252_vm12, 4294967295, %v8633_v51  ;;  %v729_v34 = vand.u32 15, %v543_v16  ;;  %v8638_v16 = vmov 0 }
  0x84   : > { %5948 = vmatpush3.msra.mxu0 %v5051_v56  ;;  %5752 = vmatmul.mubr.f32.gmra.mxu1 %v8631_v38  ;;  %v7250_v56 = vld [vmem:[#allocation2 + $0xc1] sm:$0xff]  ;;  %8635 = vst [vmem:[#allocation27_spill] sm:$0xff] %v8634_v51  ;;  %v545_v38 = vadd.s32 216, %v6550_v57  ;;  %v5048_v51 = vld [vmem:[%s8404_s3 + $0x218] sm:$0xff] }
  0x85   : > { %5831 = vmatprep.mubr.f32.mxu0 %v7220_v32  ;;  %5869 = vmatprep.subr.mxu1 %v5018_v63 }
  0x86   : > { %5832 = vmatmul.mubr.msk.f32.gmra.mxu0 %vm7229_vm14, %v7227_v39  ;;  %5870 = vmatpush3.msra.mxu1 %v5018_v63  ;;  %v8636_v63 = vmax.f32 %v6592_v17, 0.0  ;;  %v8637_v17 = vmax.f32 %v6620_v30, 0.0  ;;  %vm7275_vm14 = vcmp.le.s32.totalorder %v729_v34, 14  ;;  %v7289_v30 = vld [vmem:[#allocation2 + $0xd9] sm:$0xff]  ;;  %v7296_v34 = vld [vmem:[#allocation2 + $0xe1] sm:$0xff] }
  0x87   : > { %5949 = vmatprep.subr.mxu0 %v5050_v37  ;;  %5754 = vmatprep.mubr.f32.mxu1 %v8632_v62  ;;  %v8639_v16 = vsel %vm7275_vm14, 4294967295, %v8638_v16  ;;  %v743_v62 = vand.u32 15, %v545_v38  ;;  %v8643_v38 = vmov 0 }
  0x88   : > { %5950 = vmatpush3.msra.mxu0 %v5050_v37  ;;  %5755 = vmatmul.mubr.f32.gmra.mxu1 %v8636_v63  ;;  %v5016_v37 = vld [vmem:[%s8404_s3 + $0x198] sm:$0xff]  ;;  %8640 = vst [vmem:[#allocation28_spill] sm:$0xff] %v8639_v16  ;;  %v547_v63 = vadd.s32 232, %v6550_v57  ;;  %v5047_v16 = vld [vmem:[%s8404_s3 + $0x210] sm:$0xff] }
  0x89   : > { %5834 = vmatprep.mubr.f32.mxu0 %v7243_v48  ;;  %5871 = vmatprep.subr.mxu1 %v5017_v18 }
  0x8a   : > { %5835 = vmatmul.mubr.msk.f32.gmra.mxu0 %vm7252_vm12, %v7250_v56  ;;  %5872 = vmatpush3.msra.mxu1 %v5017_v18  ;;  %v8641_v18 = vmax.f32 %v6631_v36, 0.0  ;;  %v8642_v36 = vmax.f32 %v6655_v60, 0.0  ;;  %vm7298_vm12 = vcmp.le.s32.totalorder %v743_v62, 14  ;;  %v7312_v60 = vld [vmem:[#allocation2 + $0xe9] sm:$0xff]  ;;  %v8649_v62 = vmov 0 }
  0x8b   : > { %5951 = vmatprep.subr.mxu0 %v5049_v9  ;;  %5757 = vmatprep.mubr.f32.mxu1 %v8637_v17  ;;  %v8644_v38 = vsel %vm7298_vm12, 4294967295, %v8643_v38  ;;  %v757_v17 = vand.u32 15, %v547_v63 }
  0x8c   : > { %5952 = vmatpush3.msra.mxu0 %v5049_v9  ;;  %5758 = vmatmul.mubr.f32.gmra.mxu1 %v8641_v18  ;;  %v5015_v9 = vld [vmem:[%s8404_s3 + $0x190] sm:$0xff]  ;;  %8645 = vst [vmem:[#allocation29_spill] sm:$0xff] %v8644_v38  ;;  %v549_v18 = vadd.s32 248, %v6550_v57  ;;  %v5014_v57 = vld [vmem:[%s8404_s3 + $0x188] sm:$0xff] }
  0x8d   : > { %5837 = vmatprep.mubr.f32.mxu0 %v7266_v0  ;;  %5873 = vmatprep.subr.mxu1 %v5016_v37  ;;  %v8684_v38 = vld [vmem:[#allocation11_spill] sm:$0xff] }
  0x8e   : > { %5838 = vmatmul.mubr.msk.f32.gmra.mxu0 %vm7275_vm14, %v7273_v33  ;;  %5874 = vmatpush3.msra.mxu1 %v5016_v37  ;;  %v8646_v37 = vmax.f32 %v6689_v35, 0.0  ;;  %v8647_v35 = vmax.f32 %v6700_v40, 0.0  ;;  %vm7321_vm14 = vcmp.le.s32.totalorder %v757_v17, 14  ;;  %v771_v63 = vand.u32 15, %v549_v18  ;;  %v7334_v40 = vld [vmem:[#allocation2 + $0xf9] sm:$0xff]  ;;  %v7341_v17 = vld [vmem:[#allocation2 + $0x101] sm:$0xff] }
  0x8f   : > { %5953 = vmatprep.subr.mxu0 %v5048_v51  ;;  %5760 = vmatprep.mubr.f32.mxu1 %v8642_v36  ;;  %v8650_v62 = vsel %vm7321_vm14, 4294967295, %v8649_v62  ;;  %v5046_v36 = vld [vmem:[%s8404_s3 + $0x208] sm:$0xff]  ;;  %8653 = vst [vmem:[#allocation32_spill] sm:$0xff] %v7334_v40  ;;  %8655 = vst [vmem:[#allocation33_spill] sm:$0xff] %v7341_v17  ;;  %v8656_v18 = vmov 0 }
  0x90   : > { %5954 = vmatpush3.msra.mxu0 %v5048_v51  ;;  %5761 = vmatmul.mubr.f32.gmra.mxu1 %v8646_v37  ;;  %v7319_v51 = vld [vmem:[#allocation2 + $0xf1] sm:$0xff]  ;;  %8651 = vst [vmem:[#allocation31_spill] sm:$0xff] %v8650_v62  ;;  %v8659_v37 = vmax.f32 %v6784_v42, 0.0  ;;  %v7567_v62 = vld [vmem:[#allocation2 + $0xe8] sm:$0xff] }
  0x91   : > { %5840 = vmatprep.mubr.f32.mxu0 %v7289_v30  ;;  %5875 = vmatprep.subr.mxu1 %v5015_v9  ;;  %8648 = vst [vmem:[#allocation30_spill] sm:$0xff] %v7319_v51  ;;  %v5076_v42 = vld [vmem:[%s8404_s3 + $0x2f8] sm:$0xff]  ;;  %8677 = vst [vmem:[#allocation48_spill] sm:$0xff] %v7567_v62 }
  0x92   : > { %5841 = vmatmul.mubr.msk.f32.gmra.mxu0 %vm7298_vm12, %v7296_v34  ;;  %5876 = vmatpush3.msra.mxu1 %v5015_v9  ;;  %v8652_v9 = vmax.f32 %v6753_v53, 0.0  ;;  %v8654_v53 = vmax.f32 %v6757_v58, 0.0  ;;  %vm7343_vm12 = vcmp.le.s32.totalorder %v771_v63, 14  ;;  %v2300_v58 = vld [vmem:[#allocation2 + $0x1f] sm:$0xff] }
  0x93   : > { %5955 = vmatprep.subr.mxu0 %v5047_v16  ;;  %5763 = vmatprep.mubr.f32.mxu1 %v8647_v35  ;;  %v8657_v18 = vsel %vm7343_vm12, 4294967295, %v8656_v18  ;;  %v2299_v35 = vld [vmem:[#allocation2 + $0x17] sm:$0xff] }
  0x94   : > { %5956 = vmatpush3.msra.mxu0 %v5047_v16  ;;  %5764 = vmatmul.mubr.f32.gmra.mxu1 %v8652_v9  ;;  %v5013_v16 = vld [vmem:[%s8404_s3 + $0x180] sm:$0xff]  ;;  %8658 = vst [vmem:[#allocation34_spill] sm:$0xff] %v8657_v18  ;;  %v2701_v63 = vld [vmem:[#allocation2 + $0x18] sm:$0xff] }
  0x95   : > { %5843 = vmatprep.mubr.f32.mxu0 %v7312_v60  ;;  %5877 = vmatprep.subr.mxu1 %v5014_v57  ;;  %v2702_v9 = vld [vmem:[#allocation2 + $0x20] sm:$0xff] }
  0x96   : > { %5844 = vmatmul.mubr.msk.f32.gmra.mxu0 %vm7321_vm14, %v7319_v51  ;;  %5878 = vmatpush3.msra.mxu1 %v5014_v57  ;;  %v5045_v57 = vld [vmem:[%s8404_s3 + $0x200] sm:$0xff] }
  0x97   : > { %5957 = vmatprep.subr.mxu0 %v5046_v36  ;;  %5766 = vmatprep.mubr.f32.mxu1 %v8654_v53  ;;  %v7364_v53 = vld [vmem:[#allocation2 + $0x27] sm:$0xff] }
  0x98   : > { %5958 = vmatpush3.msra.mxu0 %v5046_v36  ;;  %5767 = vmatmul.mubr.f32.gmra.mxu1 %v8659_v37  ;;  %v5108_v36 = vld [vmem:[%s8404_s3 + $0x378] sm:$0xff]  ;;  %v7368_v37 = vld [vmem:[#allocation2 + $0x28] sm:$0xff]  ;;  %v7555_v18 = vld [vmem:[#allocation2 + $0xe0] sm:$0xff] }
  0x99   : > { %5846 = vmatprep.mubr.f32.mxu0 %v7334_v40  ;;  %5879 = vmatprep.subr.mxu1 %v5013_v16  ;;  %8660 = vst [vmem:[#allocation35_spill] sm:$0xff] %v7368_v37  ;;  %8676 = vst [vmem:[#allocation5_spill] sm:$0xff] %v7555_v18  ;;  %v7575_v40 = vld [vmem:[#allocation2 + $0xf0] sm:$0xff]  ;;  %v6376_v51 = vld [vmem:[#allocation2 + $0x100] sm:$0xff] }
  0x9a   : > { %5847 = vmatmul.mubr.msk.f32.gmra.mxu0 %vm7343_vm12, %v7341_v17  ;;  %5880 = vmatpush3.msra.mxu1 %v5013_v16  ;;  %v7366_v16 = vld [vmem:[#allocation2 + $0x2f] sm:$0xff]  ;;  %8679 = vst [vmem:[#allocation49_spill] sm:$0xff] %v7575_v40 }
  0x9b   : > { %5959 = vmatprep.subr.mxu0 %v5045_v57  ;;  %5881 = vmatprep.mubr.msk.f32.mxu1 %vm6660_vm0, %v2299_v35  ;;  %v5075_v35 = vld [vmem:[%s8404_s3 + $0x2f0] sm:$0xff] }
  0x9c   : > { %5960 = vmatpush3.msra.mxu0 %v5045_v57  ;;  %5882 = vmatmul.mubr.f32.vlgmr.msra.gmra.mxu1 %v2300_v58  ;;  %v7376_v57 = vld [vmem:[#allocation2 + $0x30] sm:$0xff] }
  0x9d   : > { %5961 = vmatprep.mubr.f32.mxu0 %v2701_v63  ;;  %6009 = vmatprep.subr.mxu1 %v5076_v42  ;;  %8661 = vst [vmem:[#allocation36_spill] sm:$0xff] %v7376_v57  ;;  %v5107_v58 = vld [vmem:[%s8404_s3 + $0x370] sm:$0xff] }
  0x9e   : > { %5962 = vmatmul.mubr.f32.vlgmr.msra.gmra.mxu0 %v2702_v9  ;;  %6010 = vmatpush3.msra.mxu1 %v5076_v42  ;;  %v7382_v63 = vld [vmem:[#allocation2 + $0x37] sm:$0xff]  ;;  %v5074_v9 = vld [vmem:[%s8404_s3 + $0x2e8] sm:$0xff] }
  0x9f   : > { %6089 = vmatprep.subr.mxu0 %v5108_v36  ;;  %5884 = vmatprep.mubr.msk.f32.mxu1 %vm6743_vm3, %v7364_v53  ;;  %v7386_v42 = vld [vmem:[#allocation2 + $0x38] sm:$0xff]  ;;  %v8682_v17 = vld [vmem:[#allocation8_spill] sm:$0xff] }
  0xa0   : > { %6090 = vmatpush3.msra.mxu0 %v5108_v36  ;;  %5885 = vmatmul.mubr.f32.gmra.mxu1 %v7366_v16  ;;  %8662 = vst [vmem:[#allocation37_spill] sm:$0xff] %v7386_v42  ;;  %v5106_v36 = vld [vmem:[%s8404_s3 + $0x368] sm:$0xff]  ;;  %vm8683_vm12 = vnez %v8682_v17 }
  0xa1   : > { %5964 = vmatprep.mubr.f32.mxu0 %v7368_v37  ;;  %6011 = vmatprep.subr.mxu1 %v5075_v35  ;;  %v5143_v37 = vld [vmem:[%s8404_s3 + $0x410] sm:$0xff] }
  0xa2   : > { %5965 = vmatmul.mubr.f32.gmra.mxu0 %v7376_v57  ;;  %6012 = vmatpush3.msra.mxu1 %v5075_v35  ;;  %v6371_v35 = vld [vmem:[#allocation2 + $0x40] sm:$0xff] }
  0xa3   : > { %6091 = vmatprep.subr.mxu0 %v5107_v58  ;;  %5887 = vmatprep.mubr.msk.f32.mxu1 %vm6801_vm5, %v7382_v63  ;;  %v5073_v57 = vld [vmem:[%s8404_s3 + $0x2e0] sm:$0xff] }
  0xa4   : > { %6092 = vmatpush3.msra.mxu0 %v5107_v58  ;;  %5888 = vmatmul.mubr.f32.gmra.mxu1 %v6838_v41  ;;  %v5105_v41 = vld [vmem:[%s8404_s3 + $0x360] sm:$0xff]  ;;  %v6372_v58 = vld [vmem:[#allocation2 + $0x48] sm:$0xff] }
  0xa5   : > { %5967 = vmatprep.mubr.f32.mxu0 %v7386_v42  ;;  %6013 = vmatprep.subr.mxu1 %v5074_v9  ;;  %v7547_v42 = vld [vmem:[#allocation2 + $0xd8] sm:$0xff] }
  0xa6   : > { %5968 = vmatmul.mubr.f32.gmra.mxu0 %v6371_v35  ;;  %6014 = vmatpush3.msra.mxu1 %v5074_v9  ;;  %v6373_v9 = vld [vmem:[#allocation2 + $0x50] sm:$0xff]  ;;  %v5072_v35 = vld [vmem:[%s8404_s3 + $0x2d8] sm:$0xff]  ;;  %8674 = vst [vmem:[#allocation47_spill] sm:$0xff] %v7547_v42 }
  0xa7   : > { %6093 = vmatprep.subr.mxu0 %v5106_v36  ;;  %5890 = vmatprep.mubr.msk.f32.mxu1 %vm6829_vm7, %v6858_v28  ;;  %v6374_v28 = vld [vmem:[#allocation2 + $0x58] sm:$0xff] }
  0xa8   : > { %6094 = vmatpush3.msra.mxu0 %v5106_v36  ;;  %5891 = vmatmul.mubr.f32.gmra.mxu1 %v6869_v8  ;;  %v5104_v8 = vld [vmem:[%s8404_s3 + $0x358] sm:$0xff]  ;;  %v5071_v36 = vld [vmem:[%s8404_s3 + $0x2d0] sm:$0xff] }
  0xa9   : > { %5970 = vmatprep.mubr.f32.mxu0 %v6372_v58  ;;  %6015 = vmatprep.subr.mxu1 %v5073_v57  ;;  %v7464_v58 = vld [vmem:[#allocation2 + $0x9f] sm:$0xff] }
  0xaa   : > { %5971 = vmatmul.mubr.f32.gmra.mxu0 %v6373_v9  ;;  %6016 = vmatpush3.msra.mxu1 %v5073_v57  ;;  %v6375_v57 = vld [vmem:[#allocation2 + $0x60] sm:$0xff]  ;;  %v7467_v9 = vld [vmem:[#allocation2 + $0x98] sm:$0xff] }
  0xab   : > { %6095 = vmatprep.subr.mxu0 %v5105_v41  ;;  %5893 = vmatprep.mubr.msk.f32.mxu1 %vm6860_vm9, %v6890_v19  ;;  %v5070_v19 = vld [vmem:[%s8404_s3 + $0x2c8] sm:$0xff]  ;;  %8665 = vst [vmem:[#allocation40_spill] sm:$0xff] %v7467_v9 }
  0xac   : > { %6096 = vmatpush3.msra.mxu0 %v5105_v41  ;;  %5894 = vmatmul.mubr.f32.gmra.mxu1 %v6903_v11  ;;  %v5103_v11 = vld [vmem:[%s8404_s3 + $0x350] sm:$0xff] }
  0xad   : > { %5973 = vmatprep.mubr.f32.mxu0 %v6374_v28  ;;  %6017 = vmatprep.subr.mxu1 %v5072_v35  ;;  %v7461_v41 = vld [vmem:[#allocation2 + $0x97] sm:$0xff]  ;;  %v7481_v28 = vld [vmem:[#allocation2 + $0xa7] sm:$0xff] }
  0xae   : > { %5974 = vmatmul.mubr.f32.gmra.mxu0 %v6375_v57  ;;  %6018 = vmatpush3.msra.mxu1 %v5072_v35  ;;  %v5068_v35 = vld [vmem:[%s8404_s3 + $0x2b8] sm:$0xff]  ;;  %v7484_v57 = vld [vmem:[#allocation2 + $0xaf] sm:$0xff] }
  0xaf   : > { %6097 = vmatprep.subr.mxu0 %v5104_v8  ;;  %5896 = vmatprep.mubr.msk.f32.mxu1 %vm6892_vm11, %v6928_v15  ;;  %v7446_v15 = vld [vmem:[#allocation2 + $0x8f] sm:$0xff] }
  0xb0   : > { %6098 = vmatpush3.msra.mxu0 %v5104_v8  ;;  %5897 = vmatmul.mubr.f32.gmra.mxu1 %v6941_v2  ;;  %v7437_v2 = vld [vmem:[#allocation2 + $0x80] sm:$0xff] }
  0xb1   : > { %5976 = vmatprep.mubr.f32.mxu0 %v6749_v5  ;;  %6019 = vmatprep.subr.mxu1 %v5071_v36  ;;  %8663 = vst [vmem:[#allocation38_spill] sm:$0xff] %v7437_v2  ;;  %v5102_v5 = vld [vmem:[%s8404_s3 + $0x348] sm:$0xff]  ;;  %v7475_v8 = vld [vmem:[#allocation2 + $0xa0] sm:$0xff] }
  0xb2   : > { %5977 = vmatmul.mubr.f32.gmra.mxu0 %v6770_v61  ;;  %6020 = vmatpush3.msra.mxu1 %v5071_v36  ;;  %v7443_v61 = vld [vmem:[#allocation2 + $0x87] sm:$0xff]  ;;  %8666 = vst [vmem:[#allocation41_spill] sm:$0xff] %v7475_v8 }
  0xb3   : > { %6099 = vmatprep.subr.mxu0 %v5103_v11  ;;  %5899 = vmatprep.mubr.msk.f32.mxu1 %vm6930_vm13, %v6962_v23  ;;  %v5069_v23 = vld [vmem:[%s8404_s3 + $0x2c0] sm:$0xff]  ;;  %v7487_v36 = vld [vmem:[#allocation2 + $0xa8] sm:$0xff] }
  0xb4   : > { %6100 = vmatpush3.msra.mxu0 %v5103_v11  ;;  %5900 = vmatmul.mubr.f32.gmra.mxu1 %v6977_v21  ;;  %v7455_v21 = vld [vmem:[#allocation2 + $0x90] sm:$0xff]  ;;  %8667 = vst [vmem:[#allocation42_spill] sm:$0xff] %v7487_v36 }
  0xb5   : > { %5979 = vmatprep.mubr.f32.mxu0 %v6781_v13  ;;  %6021 = vmatprep.subr.mxu1 %v5070_v19  ;;  %8664 = vst [vmem:[#allocation39_spill] sm:$0xff] %v7455_v21  ;;  %v5101_v13 = vld [vmem:[%s8404_s3 + $0x340] sm:$0xff]  ;;  %v5067_v11 = vld [vmem:[%s8404_s3 + $0x2b0] sm:$0xff] }
  0xb6   : > { %5980 = vmatmul.mubr.f32.gmra.mxu0 %v7437_v2  ;;  %6022 = vmatpush3.msra.mxu1 %v5070_v19  ;;  %v7495_v19 = vld [vmem:[#allocation2 + $0xb0] sm:$0xff] }
  0xb7   : > { %6101 = vmatprep.subr.mxu0 %v5102_v5  ;;  %5902 = vmatprep.mubr.msk.f32.mxu1 %vm6964_vm15, %v7443_v61  ;;  %8668 = vst [vmem:[#allocation43_spill] sm:$0xff] %v7495_v19  ;;  %v7535_v2 = vld [vmem:[#allocation2 + $0xd0] sm:$0xff] }
  0xb8   : > { %6102 = vmatpush3.msra.mxu0 %v5102_v5  ;;  %5903 = vmatmul.mubr.f32.gmra.mxu1 %v7446_v15  ;;  %v5099_v5 = vld [vmem:[%s8404_s3 + $0x330] sm:$0xff]  ;;  %8673 = vst [vmem:[#allocation4_spill] sm:$0xff] %v7535_v2 }
  0xb9   : > { %5982 = vmatprep.mubr.f32.mxu0 %v7171_v29  ;;  %6023 = vmatprep.subr.mxu1 %v5069_v23  ;;  %v5100_v29 = vld [vmem:[%s8404_s3 + $0x338] sm:$0xff] }
  0xba   : > { %5983 = vmatmul.mubr.f32.gmra.mxu0 %v7455_v21  ;;  %6024 = vmatpush3.msra.mxu1 %v5069_v23  ;;  %v7501_v23 = vld [vmem:[#allocation2 + $0xb7] sm:$0xff] }
  0xbb   : > { %6103 = vmatprep.subr.mxu0 %v5101_v13  ;;  %5905 = vmatprep.mubr.msk.f32.mxu1 %vm6672_vm1, %v7461_v41  ;;  %v5144_v21 = vld [vmem:[%s8404_s3 + $0x418] sm:$0xff] }
  0xbc   : > { %6104 = vmatpush3.msra.mxu0 %v5101_v13  ;;  %5906 = vmatmul.mubr.f32.gmra.mxu1 %v7464_v58  ;;  %v7504_v13 = vld [vmem:[#allocation2 + $0xbf] sm:$0xff] }
  0xbd   : > { %5985 = vmatprep.mubr.f32.mxu0 %v7467_v9  ;;  %6025 = vmatprep.subr.mxu1 %v5068_v35  ;;  %v7527_v9 = vld [vmem:[#allocation2 + $0xc8] sm:$0xff] }
  0xbe   : > { %5986 = vmatmul.mubr.f32.gmra.mxu0 %v7475_v8  ;;  %6026 = vmatpush3.msra.mxu1 %v5068_v35  ;;  %v7507_v35 = vld [vmem:[#allocation2 + $0xb8] sm:$0xff]  ;;  %v7515_v8 = vld [vmem:[#allocation2 + $0xc0] sm:$0xff]  ;;  %8671 = vst [vmem:[#allocation46_spill] sm:$0xff] %v7527_v9 }
  0xbf   : > { %6105 = vmatprep.subr.mxu0 %v5100_v29  ;;  %5908 = vmatprep.mubr.msk.f32.mxu1 %vm6726_vm2, %v7481_v28  ;;  %8669 = vst [vmem:[#allocation44_spill] sm:$0xff] %v7507_v35  ;;  %8670 = vst [vmem:[#allocation45_spill] sm:$0xff] %v7515_v8 }
  0xc0   : > { %6106 = vmatpush3.msra.mxu0 %v5100_v29  ;;  %5909 = vmatmul.mubr.f32.gmra.mxu1 %v7484_v57  ;;  %v5066_v29 = vld [vmem:[%s8404_s3 + $0x2a8] sm:$0xff] }
  0xc1   : > { %5988 = vmatprep.mubr.f32.mxu0 %v7487_v36  ;;  %6027 = vmatprep.subr.mxu1 %v5067_v11  ;;  %v7524_v36 = vld [vmem:[#allocation2 + $0xcf] sm:$0xff] }
  0xc2   : > { %5989 = vmatmul.mubr.f32.gmra.mxu0 %v7495_v19  ;;  %6028 = vmatpush3.msra.mxu1 %v5067_v11  ;;  %v5098_v11 = vld [vmem:[%s8404_s3 + $0x328] sm:$0xff] }
  0xc3   : > { %6107 = vmatprep.subr.mxu0 %v5099_v5  ;;  %5911 = vmatprep.mubr.msk.f32.mxu1 %vm6786_vm4, %v7501_v23  ;;  %v7521_v19 = vld [vmem:[#allocation2 + $0xc7] sm:$0xff] }
  0xc4   : > { %6108 = vmatpush3.msra.mxu0 %v5099_v5  ;;  %5912 = vmatmul.mubr.f32.gmra.mxu1 %v7504_v13  ;;  %v5065_v5 = vld [vmem:[%s8404_s3 + $0x2a0] sm:$0xff] }
  0xc5   : > { %5991 = vmatprep.mubr.f32.mxu0 %v7507_v35  ;;  %6029 = vmatprep.subr.mxu1 %v5066_v29  ;;  %v7544_v35 = vld [vmem:[#allocation2 + $0xdf] sm:$0xff] }
  0xc6   : > { %5992 = vmatmul.mubr.f32.gmra.mxu0 %v7515_v8  ;;  %6030 = vmatpush3.msra.mxu1 %v5066_v29  ;;  %v5097_v29 = vld [vmem:[%s8404_s3 + $0x320] sm:$0xff]  ;;  %v7541_v8 = vld [vmem:[#allocation2 + $0xd7] sm:$0xff] }
  0xc7   : > { %6109 = vmatprep.subr.mxu0 %v5098_v11  ;;  %5914 = vmatprep.mubr.msk.f32.mxu1 %vm6821_vm6, %v7521_v19 }
  0xc8   : > { %6110 = vmatpush3.msra.mxu0 %v5098_v11  ;;  %5915 = vmatmul.mubr.f32.gmra.mxu1 %v7524_v36  ;;  %v5064_v11 = vld [vmem:[%s8404_s3 + $0x298] sm:$0xff] }
  0xc9   : > { %5994 = vmatprep.mubr.f32.mxu0 %v7527_v9  ;;  %6031 = vmatprep.subr.mxu1 %v5065_v5  ;;  %v7564_v9 = vld [vmem:[#allocation2 + $0xef] sm:$0xff] }
  0xca   : > { %5995 = vmatmul.mubr.f32.gmra.mxu0 %v7535_v2  ;;  %6032 = vmatpush3.msra.mxu1 %v5065_v5  ;;  %v5096_v5 = vld [vmem:[%s8404_s3 + $0x318] sm:$0xff]  ;;  %v7561_v2 = vld [vmem:[#allocation2 + $0xe7] sm:$0xff] }
  0xcb   : > { %6111 = vmatprep.subr.mxu0 %v5097_v29  ;;  %5917 = vmatprep.mubr.msk.f32.mxu1 %vm6849_vm8, %v7541_v8 }
  0xcc   : > { %6112 = vmatpush3.msra.mxu0 %v5097_v29  ;;  %5918 = vmatmul.mubr.f32.gmra.mxu1 %v7544_v35  ;;  %v5063_v29 = vld [vmem:[%s8404_s3 + $0x290] sm:$0xff] }
  0xcd   : > { %5997 = vmatprep.mubr.f32.mxu0 %v7547_v42  ;;  %6033 = vmatprep.subr.mxu1 %v5064_v11  ;;  %v5062_v42 = vld [vmem:[%s8404_s3 + $0x288] sm:$0xff] }
  0xce   : > { %5998 = vmatmul.mubr.f32.gmra.mxu0 %v7555_v18  ;;  %6034 = vmatpush3.msra.mxu1 %v5064_v11  ;;  %v5095_v11 = vld [vmem:[%s8404_s3 + $0x310] sm:$0xff]  ;;  %v7583_v18 = vld [vmem:[#allocation2 + $0xf8] sm:$0xff] }
  0xcf   : > { %6113 = vmatprep.subr.mxu0 %v5096_v5  ;;  %5920 = vmatprep.mubr.msk.f32.mxu1 %vm6881_vm10, %v7561_v2  ;;  %8680 = vst [vmem:[#allocation50_spill] sm:$0xff] %v7583_v18 }
  0xd0   : > { %6114 = vmatpush3.msra.mxu0 %v5096_v5  ;;  %5921 = vmatmul.mubr.f32.gmra.mxu1 %v7564_v9  ;;  %v8681_v5 = vld [vmem:[#allocation9_spill] sm:$0xff] }
  0xd1   : > { %6000 = vmatprep.mubr.f32.mxu0 %v7567_v62  ;;  %6035 = vmatprep.subr.mxu1 %v5063_v29  ;;  %v5094_v62 = vld [vmem:[%s8404_s3 + $0x308] sm:$0xff] }
  0xd2   : > { %6001 = vmatmul.mubr.f32.gmra.mxu0 %v7575_v40  ;;  %6036 = vmatpush3.msra.mxu1 %v5063_v29  ;;  %v7595_v40 = vld [vmem:[#allocation2 + $0x107] sm:$0xff]  ;;  %v7598_v29 = vld [vmem:[#allocation2 + $0x10f] sm:$0xff] }
  0xd3   : > { %6115 = vmatprep.subr.mxu0 %v5095_v11  ;;  %5923 = vmatprep.mubr.msk.f32.mxu1 %vm8683_vm12, %v8681_v5  ;;  %v5093_v5 = vld [vmem:[%s8404_s3 + $0x300] sm:$0xff] }
  0xd4   : > { %6116 = vmatpush3.msra.mxu0 %v5095_v11  ;;  %5924 = vmatmul.mubr.f32.gmra.mxu1 %v8684_v38  ;;  %v5061_v11 = vld [vmem:[%s8404_s3 + $0x280] sm:$0xff] }
  0xd5   : > { %6003 = vmatprep.mubr.f32.mxu0 %v7583_v18  ;;  %6037 = vmatprep.subr.mxu1 %v5062_v42  ;;  %v8685_v38 = vld [vmem:[#allocation10_spill] sm:$0xff]  ;;  %v8687_v18 = vld [vmem:[#allocation7_spill] sm:$0xff] }
  0xd6   : > { %6004 = vmatmul.mubr.f32.gmra.mxu0 %v6376_v51  ;;  %6038 = vmatpush3.msra.mxu1 %v5062_v42  ;;  %vm8686_vm12 = vnez %v8685_v38  ;;  %v8688_v17 = vmax.f32 %v8687_v18, 0.0  ;;  %v8689_v51 = vmax.f32 %v7049_v55, 0.0  ;;  %v5140_v42 = vld [vmem:[%s8404_s3 + $0x3f8] sm:$0xff]  ;;  %v3477_v55 = vld [vmem:[#allocation2 + $0x47] sm:$0xff] }
  0xd7   : > { %6117 = vmatprep.subr.mxu0 %v5094_v62  ;;  %5926 = vmatprep.mubr.msk.f32.mxu1 %vm8686_vm12, %v7595_v40  ;;  %v3479_v18 = vld [vmem:[#allocation2 + $0x57] sm:$0xff] }
  0xd8   : > { %6118 = vmatpush3.msra.mxu0 %v5094_v62  ;;  %5927 = vmatmul.mubr.f32.gmra.mxu1 %v7598_v29  ;;  %v8690_v62 = vld [vmem:[#allocation12_spill] sm:$0xff] }
  0xd9   : > { %6006 = vmatprep.mubr.f32.mxu0 %v8688_v17  ;;  %6039 = vmatprep.subr.mxu1 %v5061_v11  ;;  %vm8691_vm12 = vnez %v8690_v62  ;;  %v5156_v17 = vld [vmem:[%s8404_s3 + $0x478] sm:$0xff] }
  0xda   : > { %6007 = vmatmul.mubr.f32.gmra.mxu0 %v8689_v51  ;;  %6040 = vmatpush3.msra.mxu1 %v5061_v11 }
  0xdb   : > { %6119 = vmatprep.subr.mxu0 %v5093_v5  ;;  %6041 = vmatprep.mubr.f32.mxu1 %v7009_v59  ;;  %v5139_v59 = vld [vmem:[%s8404_s3 + $0x3f0] sm:$0xff] }
  0xdc   : > { %6120 = vmatpush3.msra.mxu0 %v5093_v5  ;;  %6042 = vmatmul.mubr.msk.f32.vlgmr.msra.gmra.mxu1 %vm8691_vm12, %v7016_v43  ;;  %v3476_v43 = vld [vmem:[#allocation2 + $0x3f] sm:$0xff]  ;;  %vm8692_vm12 = vnez %v8585_v46  ;;  %v3483_v5 = vld [vmem:[#allocation2 + $0x77] sm:$0xff] }
  0xdd   : > { %6121 = vmatprep.mubr.msk.f32.mxu0 %vm6660_vm0, %v7364_v53  ;;  %6169 = vmatprep.subr.mxu1 %v5140_v42  ;;  %vm8693_vm0 = vnez %v8589_v26  ;;  %v3480_v53 = vld [vmem:[#allocation2 + $0x5f] sm:$0xff] }
  0xde   : > { %6122 = vmatmul.mubr.f32.vlgmr.msra.gmra.mxu0 %v7366_v16  ;;  %6170 = vmatpush3.msra.mxu1 %v5140_v42  ;;  %v3481_v16 = vld [vmem:[#allocation2 + $0x67] sm:$0xff]  ;;  %v3484_v42 = vld [vmem:[#allocation2 + $0x7f] sm:$0xff] }
  0xdf   : > { %6249 = vmatprep.subr.mxu0 %v5156_v17  ;;  %6044 = vmatprep.mubr.f32.mxu1 %v7034_v12  ;;  %v5138_v12 = vld [vmem:[%s8404_s3 + $0x3e8] sm:$0xff] }
  0xe0   : > { %6250 = vmatpush3.msra.mxu0 %v5156_v17  ;;  %6045 = vmatmul.mubr.msk.f32.gmra.mxu1 %vm8692_vm12, %v7041_v4  ;;  %v3478_v4 = vld [vmem:[#allocation2 + $0x4f] sm:$0xff] }
  0xe1   : > { %6124 = vmatprep.mubr.msk.f32.mxu0 %vm6743_vm3, %v7382_v63  ;;  %6171 = vmatprep.subr.mxu1 %v5139_v59  ;;  %v3482_v63 = vld [vmem:[#allocation2 + $0x6f] sm:$0xff] }
  0xe2   : > { %6125 = vmatmul.mubr.f32.gmra.mxu0 %v3476_v43  ;;  %6172 = vmatpush3.msra.mxu1 %v5139_v59  ;;  %v8700_v59 = vld [vmem:[#allocation15_spill] sm:$0xff]  ;;  %v5151_v43 = vld [vmem:[%s8404_s3 + $0x450] sm:$0xff] }
  0xe3   : > { %6251 = vmatprep.subr.mxu0 %v5155_v3  ;;  %6047 = vmatprep.mubr.f32.mxu1 %v7061_v7  ;;  %v5137_v7 = vld [vmem:[%s8404_s3 + $0x3e0] sm:$0xff] }
  0xe4   : > { %6252 = vmatpush3.msra.mxu0 %v5155_v3  ;;  %6048 = vmatmul.mubr.msk.f32.gmra.mxu1 %vm8693_vm0, %v7068_v44  ;;  %v8694_v44 = vld [vmem:[#allocation13_spill] sm:$0xff] }
  0xe5   : > { %6127 = vmatprep.mubr.msk.f32.mxu0 %vm6801_vm5, %v3477_v55  ;;  %6173 = vmatprep.subr.mxu1 %v5138_v12  ;;  %vm8695_vm3 = vnez %v8694_v44  ;;  %v5134_v55 = vld [vmem:[%s8404_s3 + $0x3c8] sm:$0xff] }
  0xe6   : > { %6128 = vmatmul.mubr.f32.gmra.mxu0 %v3478_v4  ;;  %6174 = vmatpush3.msra.mxu1 %v5138_v12  ;;  %v8702_v4 = vld [vmem:[#allocation19_spill] sm:$0xff] }
  0xe7   : > { %6253 = vmatprep.subr.mxu0 %v5154_v10  ;;  %6050 = vmatprep.mubr.f32.mxu1 %v7086_v6  ;;  %v5136_v6 = vld [vmem:[%s8404_s3 + $0x3d8] sm:$0xff] }
  0xe8   : > { %6254 = vmatpush3.msra.mxu0 %v5154_v10  ;;  %6051 = vmatmul.mubr.msk.f32.gmra.mxu1 %vm8695_vm3, %v7093_v49  ;;  %v8696_v49 = vld [vmem:[#allocation14_spill] sm:$0xff]  ;;  %v8703_v10 = vld [vmem:[#allocation20_spill] sm:$0xff] }
  0xe9   : > { %6130 = vmatprep.mubr.msk.f32.mxu0 %vm6829_vm7, %v3479_v18  ;;  %6175 = vmatprep.subr.mxu1 %v5137_v7  ;;  %vm8697_vm5 = vnez %v8696_v49  ;;  %vm8701_vm7 = vnez %v8700_v59  ;;  %v8704_v18 = vld [vmem:[#allocation18_spill] sm:$0xff] }
  0xea   : > { %6131 = vmatmul.mubr.f32.gmra.mxu0 %v3480_v53  ;;  %6176 = vmatpush3.msra.mxu1 %v5137_v7 }
  0xeb   : > { %6255 = vmatprep.subr.mxu0 %v5153_v24  ;;  %6053 = vmatprep.mubr.f32.mxu1 %v7109_v31  ;;  %v5135_v31 = vld [vmem:[%s8404_s3 + $0x3d0] sm:$0xff] }
  0xec   : > { %6256 = vmatpush3.msra.mxu0 %v5153_v24  ;;  %6054 = vmatmul.mubr.msk.f32.gmra.mxu1 %vm8697_vm5, %v7116_v25  ;;  %v8698_v25 = vld [vmem:[#allocation16_spill] sm:$0xff]  ;;  %v5133_v24 = vld [vmem:[%s8404_s3 + $0x3c0] sm:$0xff] }
  0xed   : > { %6133 = vmatprep.mubr.msk.f32.mxu0 %vm6860_vm9, %v3481_v16  ;;  %6177 = vmatprep.subr.mxu1 %v5136_v6  ;;  %v7677_v11 = vpop.f32.mrf.mxu1  ;;  %vm8705_vm9 = vnez %v8704_v18 }
  0xee   : > { %6134 = vmatmul.mubr.f32.gmra.mxu0 %v3482_v63  ;;  %6178 = vmatpush3.msra.mxu1 %v5136_v6  ;;  %v7682_v51 = vpop.f32.mrf.mxu0  ;;  %v8706_v6 = vld [vmem:[#allocation22_spill] sm:$0xff]  ;;  %v8707_v63 = vld [vmem:[#allocation23_spill] sm:$0xff] }
  0xef   : > { %6257 = vmatprep.subr.mxu0 %v5152_v50  ;;  %6056 = vmatprep.mubr.f32.mxu1 %v8698_v25  ;;  %v7685_v17 = vpop.f32.mrf.mxu1  ;;  %v8710_v25 = vld [vmem:[#allocation24_spill] sm:$0xff] }
  0xf0   : > { %6258 = vmatpush3.msra.mxu0 %v5152_v50  ;;  %6057 = vmatmul.mubr.msk.f32.gmra.mxu1 %vm8701_vm7, %v8699_v27  ;;  %v7693_v3 = vpop.f32.mrf.mxu0  ;;  %v8708_v50 = vld [vmem:[#allocation21_spill] sm:$0xff]  ;;  %v8716_v27 = vld [vmem:[#allocation27_spill] sm:$0xff] }
  0xf1   : > { %6136 = vmatprep.mubr.msk.f32.mxu0 %vm6892_vm11, %v3483_v5  ;;  %6179 = vmatprep.subr.mxu1 %v5135_v31  ;;  %vm8709_vm11 = vnez %v8708_v50 }
  0xf2   : > { %6137 = vmatmul.mubr.f32.gmra.mxu0 %v3484_v42  ;;  %6180 = vmatpush3.msra.mxu1 %v5135_v31  ;;  %v7700_v12 = vpop.f32.mrf.mxu1  ;;  %v8714_v42 = vld [vmem:[#allocation26_spill] sm:$0xff] }
  0xf3   : > { %6259 = vmatprep.subr.mxu0 %v5151_v43  ;;  %6059 = vmatprep.mubr.f32.mxu1 %v8702_v4  ;;  %v8720_v4 = vld [vmem:[#allocation30_spill] sm:$0xff] }
  0xf4   : > { %6260 = vmatpush3.msra.mxu0 %v5151_v43  ;;  %6060 = vmatmul.mubr.msk.f32.gmra.mxu1 %vm8705_vm9, %v8703_v10  ;;  %v7709_v7 = vpop.f32.mrf.mxu0  ;;  %v7711_v53 = vpop.f32.mrf.mxu1  ;;  %v8721_v10 = vld [vmem:[#allocation29_spill] sm:$0xff] }
  0xf5   : > { %6139 = vmatprep.mubr.msk.f32.mxu0 %vm6930_vm13, %v7443_v61  ;;  %6181 = vmatprep.subr.mxu1 %v5134_v55  ;;  %vm8711_vm13 = vnez %v8710_v25 }
  0xf6   : > { %6140 = vmatmul.mubr.f32.gmra.mxu0 %v7446_v15  ;;  %6182 = vmatpush3.msra.mxu1 %v5134_v55  ;;  %v7720_v16 = vpop.f32.mrf.mxu0  ;;  %v5132_v15 = vld [vmem:[%s8404_s3 + $0x3b8] sm:$0xff] }
  0xf7   : > { %6261 = vmatprep.subr.mxu0 %v5150_v54  ;;  %6062 = vmatprep.mubr.f32.mxu1 %v8706_v6  ;;  %v3500_v55 = vld [vmem:[#allocation2 + $0xff] sm:$0xff]  ;;  %v8724_v6 = vld [vmem:[#allocation32_spill] sm:$0xff] }
  0xf8   : > { %6262 = vmatpush3.msra.mxu0 %v5150_v54  ;;  %6063 = vmatmul.mubr.msk.f32.gmra.mxu1 %vm8709_vm11, %v8707_v63  ;;  %v7729_v61 = vpop.f32.mrf.mxu1  ;;  %v8725_v63 = vld [vmem:[#allocation33_spill] sm:$0xff] }
  0xf9   : > { %6142 = vmatprep.mubr.msk.f32.mxu0 %vm6964_vm15, %v7461_v41  ;;  %6183 = vmatprep.subr.mxu1 %v5133_v24 }
  0xfa   : > { %6143 = vmatmul.mubr.f32.gmra.mxu0 %v7464_v58  ;;  %6184 = vmatpush3.msra.mxu1 %v5133_v24  ;;  %v7738_v5 = vpop.f32.mrf.mxu0  ;;  %v7740_v31 = vpop.f32.mrf.mxu1 }
  0xfb   : > { %6263 = vmatprep.subr.mxu0 %v5149_v52  ;;  %6065 = vmatprep.mubr.f32.mxu1 %v7197_v1  ;;  %v5131_v1 = vld [vmem:[%s8404_s3 + $0x3b0] sm:$0xff] }
  0xfc   : > { %6264 = vmatpush3.msra.mxu0 %v5149_v52  ;;  %6066 = vmatmul.mubr.msk.f32.gmra.mxu1 %vm8711_vm13, %v7204_v20  ;;  %v7749_v41 = vpop.f32.mrf.mxu0  ;;  %v8712_v20 = vld [vmem:[#allocation25_spill] sm:$0xff] }
  0xfd   : > { %6145 = vmatprep.mubr.msk.f32.mxu0 %vm6672_vm1, %v7481_v28  ;;  %6185 = vmatprep.subr.mxu1 %v5132_v15  ;;  %vm8713_vm15 = vnez %v8712_v20  ;;  %vm8715_vm1 = vnez %v8714_v42 }
  0xfe   : > { %6146 = vmatmul.mubr.f32.gmra.mxu0 %v7484_v57  ;;  %6186 = vmatpush3.msra.mxu1 %v5132_v15  ;;  %v7758_v58 = vpop.f32.mrf.mxu1  ;;  %v5142_v15 = vld [vmem:[%s8404_s3 + $0x408] sm:$0xff] }
  0xff   : > { %6265 = vmatprep.subr.mxu0 %v5148_v47  ;;  %6068 = vmatprep.mubr.f32.mxu1 %v7220_v32  ;;  %v5130_v32 = vld [vmem:[%s8404_s3 + $0x3a8] sm:$0xff] }
 0x100   : > { %6266 = vmatpush3.msra.mxu0 %v5148_v47  ;;  %6069 = vmatmul.mubr.msk.f32.gmra.mxu1 %vm8713_vm15, %v7227_v39  ;;  %v7767_v28 = vpop.f32.mrf.mxu0  ;;  %v7769_v57 = vpop.f32.mrf.mxu1 }
 0x101   : > { %6148 = vmatprep.mubr.msk.f32.mxu0 %vm6726_vm2, %v7501_v23  ;;  %6187 = vmatprep.subr.mxu1 %v5131_v1  ;;  %vm8717_vm2 = vnez %v8716_v27  ;;  %v3902_v27 = vld [vmem:[#allocation2 + $0x100] sm:$0xff] }
 0x102   : > { %6149 = vmatmul.mubr.f32.gmra.mxu0 %v7504_v13  ;;  %6188 = vmatpush3.msra.mxu1 %v5131_v1  ;;  %v7778_v39 = vpop.f32.mrf.mxu0  ;;  %v7865_v1 = vld [vmem:[#allocation2 + $0x109] sm:$0xff] }
 0x103   : > { %6267 = vmatprep.subr.mxu0 %v5147_v14  ;;  %6071 = vmatprep.mubr.f32.mxu1 %v7243_v48  ;;  %v5129_v48 = vld [vmem:[%s8404_s3 + $0x3a0] sm:$0xff] }
 0x104   : > { %6268 = vmatpush3.msra.mxu0 %v5147_v14  ;;  %6072 = vmatmul.mubr.msk.f32.gmra.mxu1 %vm8715_vm1, %v7250_v56  ;;  %v7787_v23 = vpop.f32.mrf.mxu1  ;;  %v8727_v14 = vld [vmem:[#allocation8_spill] sm:$0xff] }
 0x105   : > { %6151 = vmatprep.mubr.msk.f32.mxu0 %vm6786_vm4, %v7521_v19  ;;  %6189 = vmatprep.subr.mxu1 %v5130_v32 }
 0x106   : > { %6152 = vmatmul.mubr.f32.gmra.mxu0 %v7524_v36  ;;  %6190 = vmatpush3.msra.mxu1 %v5130_v32  ;;  %v7796_v13 = vpop.f32.mrf.mxu0  ;;  %v7798_v56 = vpop.f32.mrf.mxu1  ;;  %v7870_v32 = vld [vmem:[#allocation2 + $0x111] sm:$0xff] }
 0x107   : > { %6269 = vmatprep.subr.mxu0 %v5146_v22  ;;  %6074 = vmatprep.mubr.f32.mxu1 %v7266_v0  ;;  %v5128_v0 = vld [vmem:[%s8404_s3 + $0x398] sm:$0xff] }
 0x108   : > { %6270 = vmatpush3.msra.mxu0 %v5146_v22  ;;  %6075 = vmatmul.mubr.msk.f32.gmra.mxu1 %vm8717_vm2, %v7273_v33  ;;  %v7807_v36 = vpop.f32.mrf.mxu0  ;;  %v8718_v33 = vld [vmem:[#allocation28_spill] sm:$0xff] }
 0x109   : > { %6154 = vmatprep.mubr.msk.f32.mxu0 %vm6821_vm6, %v7541_v8  ;;  %6191 = vmatprep.subr.mxu1 %v5129_v48  ;;  %vm8719_vm4 = vnez %v8718_v33  ;;  %vm8722_vm6 = vnez %v8721_v10 }
 0x10a   : > { %6155 = vmatmul.mubr.f32.gmra.mxu0 %v7544_v35  ;;  %6192 = vmatpush3.msra.mxu1 %v5129_v48  ;;  %v7816_v19 = vpop.f32.mrf.mxu1  ;;  %v3503_v48 = vld [vmem:[#allocation2 + $0x117] sm:$0xff] }
 0x10b   : > { %6271 = vmatprep.subr.mxu0 %v5145_v45  ;;  %6077 = vmatprep.mubr.f32.mxu1 %v7289_v30  ;;  %v3499_v30 = vld [vmem:[#allocation2 + $0xf7] sm:$0xff] }
 0x10c   : > { %6272 = vmatpush3.msra.mxu0 %v5145_v45  ;;  %6078 = vmatmul.mubr.msk.f32.gmra.mxu1 %vm8719_vm4, %v7296_v34  ;;  %v7825_v8 = vpop.f32.mrf.mxu0  ;;  %v7827_v35 = vpop.f32.mrf.mxu1  ;;  %v5127_v34 = vld [vmem:[%s8404_s3 + $0x390] sm:$0xff]  ;;  %v5125_v45 = vld [vmem:[%s8404_s3 + $0x380] sm:$0xff] }
 0x10d   : > { %6157 = vmatprep.mubr.msk.f32.mxu0 %vm6849_vm8, %v7561_v2  ;;  %6193 = vmatprep.subr.mxu1 %v5128_v0  ;;  %vm8728_vm8 = vnez %v8727_v14 }
 0x10e   : > { %6158 = vmatmul.mubr.f32.gmra.mxu0 %v7564_v9  ;;  %6194 = vmatpush3.msra.mxu1 %v5128_v0  ;;  %v7836_v43 = vpop.f32.mrf.mxu0  ;;  %v3504_v0 = vld [vmem:[#allocation2 + $0x11f] sm:$0xff] }
 0x10f   : > { %6273 = vmatprep.subr.mxu0 %v5144_v21  ;;  %6080 = vmatprep.mubr.f32.mxu1 %v7312_v60  ;;  %v5126_v60 = vld [vmem:[%s8404_s3 + $0x388] sm:$0xff] }
 0x110   : > { %6274 = vmatpush3.msra.mxu0 %v5144_v21  ;;  %6081 = vmatmul.mubr.msk.f32.gmra.mxu1 %vm8722_vm6, %v8720_v4  ;;  %v7845_v2 = vpop.f32.mrf.mxu1  ;;  %v8733_v4 = vld [vmem:[#allocation35_spill] sm:$0xff] }
 0x111   : > { %6160 = vmatprep.mubr.msk.f32.mxu0 %vm6881_vm10, %v3499_v30  ;;  %6195 = vmatprep.subr.mxu1 %v5127_v34  ;;  %v5141_v30 = vld [vmem:[%s8404_s3 + $0x400] sm:$0xff] }
 0x112   : > { %6161 = vmatmul.mubr.f32.gmra.mxu0 %v3500_v55  ;;  %6196 = vmatpush3.msra.mxu1 %v5127_v34  ;;  %v7852_v54 = vpop.f32.mrf.mxu0  ;;  %v7854_v24 = vpop.f32.mrf.mxu1  ;;  %v4245_v55 = vld [vmem:[#allocation2 + $0x29] sm:$0xff] }
 0x113   : > { %6275 = vmatprep.subr.mxu0 %v5143_v37  ;;  %6083 = vmatprep.mubr.f32.mxu1 %v8724_v6  ;;  %v4247_v6 = vld [vmem:[#allocation2 + $0x39] sm:$0xff] }
 0x114   : > { %6276 = vmatpush3.msra.mxu0 %v5143_v37  ;;  %6084 = vmatmul.mubr.msk.f32.gmra.mxu1 %vm7321_vm14, %v8725_v63  ;;  %v7863_v47 = vpop.f32.mrf.mxu0  ;;  %v4246_v37 = vld [vmem:[#allocation2 + $0x31] sm:$0xff] }
 0x115   : > { %6163 = vmatprep.mubr.msk.f32.mxu0 %vm8728_vm8, %v7595_v40  ;;  %6197 = vmatprep.subr.mxu1 %v5126_v60  ;;  %v8729_v40 = vld [vmem:[#allocation34_spill] sm:$0xff]  ;;  %vm8732_vm8 = vnez %v8685_v38  ;;  %v8735_v38 = vld [vmem:[#allocation37_spill] sm:$0xff] }
 0x116   : > { %6164 = vmatmul.mubr.f32.gmra.mxu0 %v7598_v29  ;;  %6198 = vmatpush3.msra.mxu1 %v5126_v60  ;;  %v7873_v22 = vpop.f32.mrf.mxu1  ;;  %vm8730_vm10 = vnez %v8729_v40  ;;  %v8734_v60 = vld [vmem:[#allocation36_spill] sm:$0xff] }
 0x117   : > { %6277 = vmatprep.subr.mxu0 %v5142_v15  ;;  %6086 = vmatprep.mubr.f32.mxu1 %v7865_v1 }
 0x118   : > { %6278 = vmatpush3.msra.mxu0 %v5142_v15  ;;  %6087 = vmatmul.mubr.msk.f32.gmra.mxu1 %vm8730_vm10, %v7870_v32  ;;  %v7882_v21 = vpop.f32.mrf.mxu0  ;;  %v7884_v29 = vpop.f32.mrf.mxu1  ;;  %v3878_v15 = vld [vmem:[#allocation2 + $0x40] sm:$0xff] }
 0x119   : > { %8731 = vst [vmem:[#allocation9_spill] sm:$0xff] %v7884_v29  ;;  %6166 = vmatprep.mubr.msk.f32.mxu0 %vm8732_vm8, %v3503_v48  ;;  %6199 = vmatprep.subr.mxu1 %v5125_v45  ;;  %vm8736_vm8 = vnez %v8690_v62 }
 0x11a   : > { %6167 = vmatmul.mubr.f32.gmra.mxu0 %v3504_v0  ;;  %6200 = vmatpush3.msra.mxu1 %v5125_v45  ;;  %v7891_v34 = vpop.f32.mrf.mxu0  ;;  %v3879_v45 = vld [vmem:[#allocation2 + $0x48] sm:$0xff] }
 0x11b   : > { %6279 = vmatprep.subr.mxu0 %v5141_v30  ;;  %6201 = vmatprep.mubr.f32.mxu1 %v8733_v4  ;;  %v4248_v4 = vld [vmem:[#allocation2 + $0x41] sm:$0xff] }
 0x11c   : > { %6280 = vmatpush3.msra.mxu0 %v5141_v30  ;;  %v5723_v9 = vpop.f32.mrf.mxu1  ;;  %6202 = vmatmul.mubr.f32.vlgmr.msra.gmra.mxu1 %v8734_v60 }
 0x11d   : > { %v1738_v63 = vadd.f32 %v5723_v9, %v7682_v51  ;;  %6281 = vmatprep.mubr.f32.mxu0 %v4245_v55  ;;  %6204 = vmatprep.mubr.f32.mxu1 %v8735_v38  ;;  %v4249_v51 = vld [vmem:[#allocation2 + $0x49] sm:$0xff] }
 0x11e   : > { %v5803_v14 = vpop.f32.mrf.mxu0  ;;  %6282 = vmatmul.mubr.msk.f32.vlgmr.msra.gmra.mxu0 %vm8736_vm8, %v4246_v37  ;;  %v1578_v48 = vpop.f32.mrf.mxu1  ;;  %v3880_v38 = vld [vmem:[#allocation2 + $0x50] sm:$0xff] }
 0x11f   : > { %v7899_v0 = vadd.f32 %v5803_v14, %v1738_v63  ;;  %v1737_v30 = vadd.f32 %v1578_v48, %v7693_v3  ;;  %6284 = vmatprep.mubr.f32.mxu0 %v4247_v6  ;;  %v3881_v63 = vld [vmem:[#allocation2 + $0x58] sm:$0xff] }
 0x120   : > { %v2076_v60 = vpop.f32.mrf.mxu0  ;;  %v5726_v29 = vpop.f32.mrf.mxu1  ;;  %6205 = vmatmul.mubr.f32.gmra.mxu1 %v3878_v15  ;;  %v4250_v6 = vld [vmem:[#allocation2 + $0x51] sm:$0xff] }
 0x121   : > { %v7902_v55 = vadd.f32 %v2076_v60, %v1737_v30  ;;  %v1740_v9 = vadd.f32 %v5726_v29, %v7709_v7  ;;  %6207 = vmatprep.mubr.f32.mxu1 %v3879_v45  ;;  %v4251_v30 = vld [vmem:[#allocation2 + $0x59] sm:$0xff] }
 0x122   : > { %v5806_v62 = vpop.f32.mrf.mxu0  ;;  %6285 = vmatmul.mubr.msk.f32.gmra.mxu0 %vm8692_vm12, %v4248_v4  ;;  %v1588_v37 = vpop.f32.mrf.mxu1  ;;  %v3882_v29 = vld [vmem:[#allocation2 + $0x60] sm:$0xff]  ;;  %v3883_v4 = vld [vmem:[#allocation2 + $0x68] sm:$0xff] }
 0x123   : > { %v7907_v14 = vadd.f32 %v5806_v62, %v1740_v9  ;;  %v1739_v3 = vadd.f32 %v1588_v37, %v7720_v16  ;;  %6287 = vmatprep.mubr.f32.mxu0 %v4249_v51  ;;  %v4252_v51 = vld [vmem:[#allocation2 + $0x61] sm:$0xff]  ;;  %v4253_v37 = vld [vmem:[#allocation2 + $0x69] sm:$0xff] }
 0x124   : > { %v2086_v15 = vpop.f32.mrf.mxu0  ;;  %v5729_v48 = vpop.f32.mrf.mxu1  ;;  %6208 = vmatmul.mubr.f32.gmra.mxu1 %v3880_v38 }
 0x125   : > { %v7910_v60 = vadd.f32 %v2086_v15, %v1739_v3  ;;  %v1742_v7 = vadd.f32 %v5729_v48, %v7738_v5  ;;  %6210 = vmatprep.mubr.f32.mxu1 %v3881_v63  ;;  %v3884_v63 = vld [vmem:[#allocation2 + $0x70] sm:$0xff]  ;;  %v3885_v15 = vld [vmem:[#allocation2 + $0x78] sm:$0xff] }
 0x126   : > { %v5809_v46 = vpop.f32.mrf.mxu0  ;;  %6288 = vmatmul.mubr.msk.f32.gmra.mxu0 %vm8693_vm0, %v4250_v6  ;;  %v1598_v45 = vpop.f32.mrf.mxu1 }
 0x127   : > { %v7915_v9 = vadd.f32 %v5809_v46, %v1742_v7  ;;  %v1741_v16 = vadd.f32 %v1598_v45, %v7749_v41  ;;  %6290 = vmatprep.mubr.f32.mxu0 %v4251_v30  ;;  %v4254_v30 = vld [vmem:[#allocation2 + $0x71] sm:$0xff]  ;;  %v4255_v46 = vld [vmem:[#allocation2 + $0x79] sm:$0xff] }
 0x128   : > { %v2096_v38 = vpop.f32.mrf.mxu0  ;;  %v5732_v62 = vpop.f32.mrf.mxu1  ;;  %6211 = vmatmul.mubr.f32.gmra.mxu1 %v3882_v29 }
 0x129   : > { %v7918_v3 = vadd.f32 %v2096_v38, %v1741_v16  ;;  %v1744_v5 = vadd.f32 %v5732_v62, %v7767_v28  ;;  %6213 = vmatprep.mubr.f32.mxu1 %v3883_v4  ;;  %v3887_v16 = vld [vmem:[#allocation2 + $0x88] sm:$0xff] }
 0x12a   : > { %v5812_v26 = vpop.f32.mrf.mxu0  ;;  %6291 = vmatmul.mubr.msk.f32.gmra.mxu0 %vm8695_vm3, %v4252_v51  ;;  %v1608_v6 = vpop.f32.mrf.mxu1  ;;  %v4256_v38 = vld [vmem:[#allocation2 + $0x81] sm:$0xff] }
 0x12b   : > { %v7923_v48 = vadd.f32 %v5812_v26, %v1744_v5  ;;  %v1743_v41 = vadd.f32 %v1608_v6, %v7778_v39  ;;  %6293 = vmatprep.mubr.f32.mxu0 %v4253_v37  ;;  %v8737_v5 = vld [vmem:[#allocation38_spill] sm:$0xff] }
 0x12c   : > { %v2106_v7 = vpop.f32.mrf.mxu0  ;;  %v5735_v29 = vpop.f32.mrf.mxu1  ;;  %6214 = vmatmul.mubr.f32.gmra.mxu1 %v3884_v63  ;;  %v4257_v63 = vld [vmem:[#allocation2 + $0x89] sm:$0xff] }
 0x12d   : > { %v7926_v45 = vadd.f32 %v2106_v7, %v1743_v41  ;;  %v1746_v28 = vadd.f32 %v5735_v29, %v7796_v13  ;;  %6216 = vmatprep.mubr.f32.mxu1 %v3885_v15  ;;  %v4258_v41 = vld [vmem:[#allocation2 + $0x91] sm:$0xff]  ;;  %v8738_v29 = vld [vmem:[#allocation39_spill] sm:$0xff] }
 0x12e   : > { %v5815_v4 = vpop.f32.mrf.mxu0  ;;  %6294 = vmatmul.mubr.msk.f32.gmra.mxu0 %vm8697_vm5, %v4254_v30  ;;  %v1618_v44 = vpop.f32.mrf.mxu1 }
 0x12f   : > { %v7931_v51 = vadd.f32 %v5815_v4, %v1746_v28  ;;  %v1745_v39 = vadd.f32 %v1618_v44, %v7807_v36  ;;  %6296 = vmatprep.mubr.f32.mxu0 %v4255_v46  ;;  %v4259_v46 = vld [vmem:[#allocation2 + $0x99] sm:$0xff]  ;;  %v8739_v4 = vld [vmem:[#allocation40_spill] sm:$0xff] }
 0x130   : > { %v2116_v62 = vpop.f32.mrf.mxu0  ;;  %v5738_v37 = vpop.f32.mrf.mxu1  ;;  %6217 = vmatmul.mubr.f32.gmra.mxu1 %v8737_v5  ;;  %v4261_v5 = vld [vmem:[#allocation2 + $0xa9] sm:$0xff] }
 0x131   : > { %v7935_v26 = vadd.f32 %v2116_v62, %v1745_v39  ;;  %v1748_v13 = vadd.f32 %v5738_v37, %v7825_v8  ;;  %6219 = vmatprep.mubr.f32.mxu1 %v3887_v16  ;;  %v4260_v39 = vld [vmem:[#allocation2 + $0xa1] sm:$0xff]  ;;  %v8740_v37 = vld [vmem:[#allocation41_spill] sm:$0xff] }
 0x132   : > { %v5818_v49 = vpop.f32.mrf.mxu0  ;;  %6297 = vmatmul.mubr.msk.f32.gmra.mxu0 %vm8701_vm7, %v4256_v38  ;;  %v1628_v6 = vpop.f32.mrf.mxu1 }
 0x133   : > { %v7940_v15 = vadd.f32 %v5818_v49, %v1748_v13  ;;  %v1747_v36 = vadd.f32 %v1628_v6, %v7836_v43  ;;  %6299 = vmatprep.mubr.f32.mxu0 %v4257_v63  ;;  %v8741_v13 = vld [vmem:[#allocation42_spill] sm:$0xff] }
 0x134   : > { %v2126_v30 = vpop.f32.mrf.mxu0  ;;  %v5741_v7 = vpop.f32.mrf.mxu1  ;;  %6220 = vmatmul.mubr.f32.gmra.mxu1 %v8738_v29  ;;  %v4263_v29 = vld [vmem:[#allocation2 + $0xb9] sm:$0xff] }
 0x135   : > { %v7944_v28 = vadd.f32 %v2126_v30, %v1747_v36  ;;  %v1750_v8 = vadd.f32 %v5741_v7, %v7852_v54  ;;  %6222 = vmatprep.mubr.f32.mxu1 %v8739_v4  ;;  %v4262_v36 = vld [vmem:[#allocation2 + $0xb1] sm:$0xff]  ;;  %v8742_v7 = vld [vmem:[#allocation43_spill] sm:$0xff] }
 0x136   : > { %v5821_v59 = vpop.f32.mrf.mxu0  ;;  %6300 = vmatmul.mubr.msk.f32.gmra.mxu0 %vm8705_vm9, %v4258_v41  ;;  %v1638_v44 = vpop.f32.mrf.mxu1 }
 0x137   : > { %v7950_v16 = vadd.f32 %v5821_v59, %v1750_v8  ;;  %v1749_v43 = vadd.f32 %v1638_v44, %v7863_v47  ;;  %6302 = vmatprep.mubr.f32.mxu0 %v4259_v46  ;;  %v8743_v8 = vld [vmem:[#allocation44_spill] sm:$0xff]  ;;  %v4264_v44 = vld [vmem:[#allocation2 + $0xc1] sm:$0xff] }
 0x138   : > { %v2136_v38 = vpop.f32.mrf.mxu0  ;;  %v5744_v62 = vpop.f32.mrf.mxu1  ;;  %6223 = vmatmul.mubr.f32.gmra.mxu1 %v8740_v37 }
 0x139   : > { %v7954_v63 = vadd.f32 %v2136_v38, %v1749_v43  ;;  %v1752_v54 = vadd.f32 %v5744_v62, %v7882_v21  ;;  %6225 = vmatprep.mubr.f32.mxu1 %v8741_v13  ;;  %v8744_v38 = vld [vmem:[#allocation45_spill] sm:$0xff]  ;;  %v4265_v62 = vld [vmem:[#allocation2 + $0xc9] sm:$0xff] }
 0x13a   : > { %v5824_v18 = vpop.f32.mrf.mxu0  ;;  %6303 = vmatmul.mubr.msk.f32.gmra.mxu0 %vm8709_vm11, %v4260_v39  ;;  %v1648_v49 = vpop.f32.mrf.mxu1 }
 0x13b   : > { %v7960_v6 = vadd.f32 %v5824_v18, %v1752_v54  ;;  %v1751_v47 = vadd.f32 %v1648_v49, %v7891_v34  ;;  %6305 = vmatprep.mubr.f32.mxu0 %v4261_v5  ;;  %v8745_v5 = vld [vmem:[#allocation46_spill] sm:$0xff]  ;;  %v4266_v18 = vld [vmem:[#allocation2 + $0xd1] sm:$0xff] }
 0x13c   : > { %v2146_v41 = vpop.f32.mrf.mxu0  ;;  %v5747_v30 = vpop.f32.mrf.mxu1  ;;  %6226 = vmatmul.mubr.f32.gmra.mxu1 %v8742_v7  ;;  %v8747_v7 = vld [vmem:[#allocation47_spill] sm:$0xff] }
 0x13d   : > { %v7964_v46 = vadd.f32 %v2146_v41, %v1751_v47  ;;  %v1754_v21 = vadd.f32 %v5747_v30, %v7677_v11  ;;  %6228 = vmatprep.mubr.f32.mxu1 %v8743_v8  ;;  %v4267_v41 = vld [vmem:[#allocation2 + $0xd9] sm:$0xff]  ;;  %v4268_v8 = vld [vmem:[#allocation2 + $0xe1] sm:$0xff] }
 0x13e   : > { %v5827_v50 = vpop.f32.mrf.mxu0  ;;  %6306 = vmatmul.mubr.msk.f32.gmra.mxu0 %vm8711_vm13, %v4262_v36  ;;  %v1658_v4 = vpop.f32.mrf.mxu1  ;;  %v8746_v36 = vld [vmem:[#allocation4_spill] sm:$0xff] }
 0x13f   : > { %v7970_v59 = vadd.f32 %v5827_v50, %v1754_v21  ;;  %v1753_v34 = vadd.f32 %v1658_v4, %v7685_v17  ;;  %6308 = vmatprep.mubr.f32.mxu0 %v4263_v29 }
 0x140   : > { %v2156_v43 = vpop.f32.mrf.mxu0  ;;  %v5750_v39 = vpop.f32.mrf.mxu1  ;;  %6229 = vmatmul.mubr.f32.gmra.mxu1 %v8744_v38 }
 0x141   : > { %v7974_v37 = vadd.f32 %v2156_v43, %v1753_v34  ;;  %v1756_v11 = vadd.f32 %v5750_v39, %v7700_v12  ;;  %6231 = vmatprep.mubr.f32.mxu1 %v8745_v5  ;;  %v8748_v34 = vld [vmem:[#allocation5_spill] sm:$0xff]  ;;  %v8749_v39 = vld [vmem:[#allocation48_spill] sm:$0xff] }
 0x142   : > { %v5830_v25 = vpop.f32.mrf.mxu0  ;;  %6309 = vmatmul.mubr.msk.f32.gmra.mxu0 %vm8713_vm15, %v4264_v44  ;;  %v1668_v54 = vpop.f32.mrf.mxu1  ;;  %v4269_v44 = vld [vmem:[#allocation2 + $0xe9] sm:$0xff] }
 0x143   : > { %v7980_v13 = vadd.f32 %v5830_v25, %v1756_v11  ;;  %v1755_v17 = vadd.f32 %v1668_v54, %v7711_v53  ;;  %6311 = vmatprep.mubr.f32.mxu0 %v4265_v62  ;;  %v4270_v11 = vld [vmem:[#allocation2 + $0xf1] sm:$0xff] }
 0x144   : > { %v2166_v49 = vpop.f32.mrf.mxu0  ;;  %v5753_v47 = vpop.f32.mrf.mxu1  ;;  %6232 = vmatmul.mubr.f32.gmra.mxu1 %v8746_v36  ;;  %v8750_v54 = vld [vmem:[#allocation49_spill] sm:$0xff] }
 0x145   : > { %v7984_v30 = vadd.f32 %v2166_v49, %v1755_v17  ;;  %v1758_v12 = vadd.f32 %v5753_v47, %v7729_v61  ;;  %6234 = vmatprep.mubr.f32.mxu1 %v8747_v7  ;;  %v4271_v17 = vld [vmem:[#allocation2 + $0xf9] sm:$0xff]  ;;  %v4272_v7 = vld [vmem:[#allocation2 + $0x101] sm:$0xff] }
 0x146   : > { %v5833_v20 = vpop.f32.mrf.mxu0  ;;  %6312 = vmatmul.mubr.msk.f32.gmra.mxu0 %vm8715_vm1, %v4266_v18  ;;  %v1678_v29 = vpop.f32.mrf.mxu1  ;;  %v8751_v49 = vld [vmem:[#allocation50_spill] sm:$0xff] }
 0x147   : > { %v7990_v21 = vadd.f32 %v5833_v20, %v1758_v12  ;;  %v1757_v53 = vadd.f32 %v1678_v29, %v7740_v31  ;;  %6314 = vmatprep.mubr.f32.mxu0 %v4267_v41 }
 0x148   : > { %v2176_v50 = vpop.f32.mrf.mxu0  ;;  %v5756_v4 = vpop.f32.mrf.mxu1  ;;  %6235 = vmatmul.mubr.f32.gmra.mxu1 %v8748_v34 }
 0x149   : > { %v7994_v43 = vadd.f32 %v2176_v50, %v1757_v53  ;;  %v1760_v61 = vadd.f32 %v5756_v4, %v7758_v58  ;;  %6237 = vmatprep.mubr.f32.mxu1 %v8749_v39 }
 0x14a   : > { %v5836_v42 = vpop.f32.mrf.mxu0  ;;  %6315 = vmatmul.mubr.msk.f32.gmra.mxu0 %vm8717_vm2, %v4268_v8  ;;  %v1688_v38 = vpop.f32.mrf.mxu1 }
 0x14b   : > { %v8000_v62 = vadd.f32 %v5836_v42, %v1760_v61  ;;  %v1759_v31 = vadd.f32 %v1688_v38, %v7769_v57  ;;  %6317 = vmatprep.mubr.f32.mxu0 %v4269_v44  ;;  %v3903_v57 = vld [vmem:[#allocation2 + $0x108] sm:$0xff]  ;;  %v6377_v44 = vld [vmem:[#allocation2 + $0x110] sm:$0xff]  ;;  %v4275_v61 = vld [vmem:[#allocation2 + $0x119] sm:$0xff] }
 0x14c   : > { %v2186_v5 = vpop.f32.mrf.mxu0  ;;  %v5759_v25 = vpop.f32.mrf.mxu1  ;;  %6238 = vmatmul.mubr.f32.gmra.mxu1 %v8750_v54  ;;  %v6378_v42 = vld [vmem:[#allocation2] sm:$0xff] }
 0x14d   : > { %v8004_v18 = vadd.f32 %v2186_v5, %v1759_v31  ;;  %v1762_v58 = vadd.f32 %v5759_v25, %v7787_v23  ;;  %6240 = vmatprep.mubr.f32.mxu1 %v8751_v49  ;;  %v4276_v31 = vld [vmem:[#allocation2 + $0x121] sm:$0xff] }
 0x14e   : > { %v5839_v47 = vpop.f32.mrf.mxu0  ;;  %6318 = vmatmul.mubr.msk.f32.gmra.mxu0 %vm8719_vm4, %v4270_v11  ;;  %v1698_v36 = vpop.f32.mrf.mxu1 }
 0x14f   : > { %v8010_v41 = vadd.f32 %v5839_v47, %v1762_v58  ;;  %v1761_v12 = vadd.f32 %v1698_v36, %v7798_v56  ;;  %6320 = vmatprep.mubr.f32.mxu0 %v4271_v17  ;;  %v8752_v17 = vld [vmem:[#allocation9_spill] sm:$0xff] }
 0x150   : > { %v2196_v20 = vpop.f32.mrf.mxu0  ;;  %v5762_v29 = vpop.f32.mrf.mxu1  ;;  %6241 = vmatmul.mubr.f32.gmra.mxu1 %v3902_v27 }
 0x151   : > { %v8013_v53 = vadd.f32 %v2196_v20, %v1761_v12  ;;  %v1764_v23 = vadd.f32 %v5762_v29, %v7816_v19  ;;  %6243 = vmatprep.mubr.f32.mxu1 %v3903_v57 }
 0x152   : > { %v5842_v8 = vpop.f32.mrf.mxu0  ;;  %6321 = vmatmul.mubr.msk.f32.gmra.mxu0 %vm8722_vm6, %v4272_v7  ;;  %v1708_v33 = vpop.f32.mrf.mxu1 }
 0x153   : > { %v8018_v50 = vadd.f32 %v5842_v8, %v1764_v23  ;;  %v1763_v4 = vadd.f32 %v1708_v33, %v7827_v35  ;;  %6323 = vmatprep.mubr.f32.mxu0 %v7865_v1 }
 0x154   : > { %v2206_v56 = vpop.f32.mrf.mxu0  ;;  %v5765_v34 = vpop.f32.mrf.mxu1  ;;  %6244 = vmatmul.mubr.f32.gmra.mxu1 %v6377_v44 }
 0x155   : > { %v8022_v39 = vadd.f32 %v2206_v56, %v1763_v4  ;;  %v1766_v19 = vadd.f32 %v5765_v34, %v7845_v2  ;;  %6246 = vmatprep.mubr.f32.mxu1 %v6378_v42 }
 0x156   : > { %v5845_v10 = vpop.f32.mrf.mxu0  ;;  %6324 = vmatmul.mubr.msk.f32.gmra.mxu0 %vm7321_vm14, %v7870_v32  ;;  %v1718_v38 = vpop.f32.mrf.mxu1 }
 0x157   : > { %v8028_v35 = vadd.f32 %v5845_v10, %v1766_v19  ;;  %v1765_v1 = vadd.f32 %v1718_v38, %v7854_v24  ;;  %6326 = vmatprep.mubr.f32.mxu0 %v4275_v61 }
 0x158   : > { %v2216_v11 = vpop.f32.mrf.mxu0  ;;  %v5768_v5 = vpop.f32.mrf.mxu1  ;;  %6247 = vmatmul.mubr.f32.gmra.mxu1 %v6378_v42 }
 0x159   : > { %v8031_v25 = vadd.f32 %v2216_v11, %v1765_v1  ;;  %v1768_v2 = vadd.f32 %v5768_v5, %v7873_v22 }
 0x15a   : > { %v5848_v54 = vpop.f32.mrf.mxu0  ;;  %6327 = vmatmul.mubr.msk.f32.gmra.mxu0 %vm8730_vm10, %v4276_v31  ;;  %v1728_v52 = vpop.f32.mrf.mxu1 }
 0x15b   : > { %v8036_v32 = vadd.f32 %v5848_v54, %v1768_v2  ;;  %v1767_v58 = vadd.f32 %v1728_v52, %v8752_v17 }
 0x15c   : > { %v2226_v49 = vpop.f32.mrf.mxu0  ;;  %v5883_v24 = vpop.f32.mrf.mxu1 }
 0x15d   : > { %v8039_v27 = vadd.f32 %v2226_v49, %v1767_v58  ;;  %v2638_v47 = vadd.f32 %v5883_v24, %v7899_v0 }
 0x15e   : > { %v5963_v36 = vpop.f32.mrf.mxu0  ;;  %v2478_v57 = vpop.f32.mrf.mxu1 }
 0x15f   : > { %v8042_v12 = vadd.f32 %v5963_v36, %v2638_v47  ;;  %v2637_v22 = vadd.f32 %v2478_v57, %v7902_v55 }
 0x160   : > { %v2848_v7 = vpop.f32.mrf.mxu0  ;;  %v5886_v40 = vpop.f32.mrf.mxu1 }
 0x161   : > { %v8045_v20 = vadd.f32 %v2848_v7, %v2637_v22  ;;  %v2640_v29 = vadd.f32 %v5886_v40, %v7907_v14 }
 0x162   : > { %v5966_v23 = vpop.f32.mrf.mxu0  ;;  %v2488_v8 = vpop.f32.mrf.mxu1 }
 0x163   : > { %v8048_v33 = vadd.f32 %v5966_v23, %v2640_v29  ;;  %v2639_v4 = vadd.f32 %v2488_v8, %v7910_v60 }
 0x164   : > { %v2858_v56 = vpop.f32.mrf.mxu0  ;;  %v5889_v0 = vpop.f32.mrf.mxu1 }
 0x165   : > { %v8051_v34 = vadd.f32 %v2858_v56, %v2639_v4  ;;  %v2642_v44 = vadd.f32 %v5889_v0, %v7915_v9 }
 0x166   : > { %v5969_v61 = vpop.f32.mrf.mxu0  ;;  %v2498_v55 = vpop.f32.mrf.mxu1 }
 0x167   : > { %v8054_v19 = vadd.f32 %v5969_v61, %v2642_v44  ;;  %v2641_v42 = vadd.f32 %v2498_v55, %v7918_v3 }
 0x168   : > { %v2868_v10 = vpop.f32.mrf.mxu0  ;;  %v5892_v14 = vpop.f32.mrf.mxu1 }
 0x169   : > { %v8057_v38 = vadd.f32 %v2868_v10, %v2641_v42  ;;  %v2644_v1 = vadd.f32 %v5892_v14, %v7923_v48 }
 0x16a   : > { %v5972_v31 = vpop.f32.mrf.mxu0  ;;  %v2508_v60 = vpop.f32.mrf.mxu1 }
 0x16b   : > { %v8060_v11 = vadd.f32 %v5972_v31, %v2644_v1  ;;  %v2643_v5 = vadd.f32 %v2508_v60, %v7926_v45 }
 0x16c   : > { %v2878_v2 = vpop.f32.mrf.mxu0  ;;  %v5895_v9 = vpop.f32.mrf.mxu1 }
 0x16d   : > { %v8063_v54 = vadd.f32 %v2878_v2, %v2643_v5  ;;  %v2646_v52 = vadd.f32 %v5895_v9, %v7931_v51 }
 0x16e   : > { %v5975_v17 = vpop.f32.mrf.mxu0  ;;  %v2518_v3 = vpop.f32.mrf.mxu1 }
 0x16f   : > { %v8066_v58 = vadd.f32 %v5975_v17, %v2646_v52  ;;  %v2645_v49 = vadd.f32 %v2518_v3, %v7935_v26 }
 0x170   : > { %v2888_v24 = vpop.f32.mrf.mxu0  ;;  %v5898_v48 = vpop.f32.mrf.mxu1 }
 0x171   : > { %v8069_v47 = vadd.f32 %v2888_v24, %v2645_v49  ;;  %v2648_v36 = vadd.f32 %v5898_v48, %v7940_v15 }
 0x172   : > { %v5978_v57 = vpop.f32.mrf.mxu0  ;;  %v2528_v45 = vpop.f32.mrf.mxu1 }
 0x173   : > { %v8072_v22 = vadd.f32 %v5978_v57, %v2648_v36  ;;  %v2647_v7 = vadd.f32 %v2528_v45, %v7944_v28 }
 0x174   : > { %v2898_v40 = vpop.f32.mrf.mxu0  ;;  %v5901_v51 = vpop.f32.mrf.mxu1 }
 0x175   : > { %v8075_v29 = vadd.f32 %v2898_v40, %v2647_v7  ;;  %v2650_v23 = vadd.f32 %v5901_v51, %v7950_v16 }
 0x176   : > { %v5981_v8 = vpop.f32.mrf.mxu0  ;;  %v2538_v26 = vpop.f32.mrf.mxu1 }
 0x177   : > { %v8078_v4 = vadd.f32 %v5981_v8, %v2650_v23  ;;  %v2649_v56 = vadd.f32 %v2538_v26, %v7954_v63 }
 0x178   : > { %v2908_v0 = vpop.f32.mrf.mxu0  ;;  %v5904_v15 = vpop.f32.mrf.mxu1 }
 0x179   : > { %v8081_v44 = vadd.f32 %v2908_v0, %v2649_v56  ;;  %v2652_v61 = vadd.f32 %v5904_v15, %v7960_v6 }
 0x17a   : > { %v5984_v55 = vpop.f32.mrf.mxu0  ;;  %v2548_v28 = vpop.f32.mrf.mxu1 }
 0x17b   : > { %v8084_v42 = vadd.f32 %v5984_v55, %v2652_v61  ;;  %v2651_v10 = vadd.f32 %v2548_v28, %v7964_v46 }
 0x17c   : > { %v2918_v14 = vpop.f32.mrf.mxu0  ;;  %v5907_v16 = vpop.f32.mrf.mxu1 }
 0x17d   : > { %v8087_v1 = vadd.f32 %v2918_v14, %v2651_v10  ;;  %v2654_v31 = vadd.f32 %v5907_v16, %v7970_v59 }
 0x17e   : > { %v5987_v60 = vpop.f32.mrf.mxu0  ;;  %v2558_v63 = vpop.f32.mrf.mxu1 }
 0x17f   : > { %v8090_v5 = vadd.f32 %v5987_v60, %v2654_v31  ;;  %v2653_v2 = vadd.f32 %v2558_v63, %v7974_v37 }
 0x180   : > { %v2928_v9 = vpop.f32.mrf.mxu0  ;;  %v5910_v6 = vpop.f32.mrf.mxu1 }
 0x181   : > { %v8093_v52 = vadd.f32 %v2928_v9, %v2653_v2  ;;  %v2656_v17 = vadd.f32 %v5910_v6, %v7980_v13 }
 0x182   : > { %v5990_v3 = vpop.f32.mrf.mxu0  ;;  %v2568_v46 = vpop.f32.mrf.mxu1 }
 0x183   : > { %v8096_v49 = vadd.f32 %v5990_v3, %v2656_v17  ;;  %v2655_v24 = vadd.f32 %v2568_v46, %v7984_v30 }
 0x184   : > { %v2938_v48 = vpop.f32.mrf.mxu0  ;;  %v5913_v59 = vpop.f32.mrf.mxu1 }
 0x185   : > { %8753 = vst [vmem:[#allocation11_spill] sm:$0xff] %v8096_v49  ;;  %v8099_v36 = vadd.f32 %v2938_v48, %v2655_v24  ;;  %v2658_v57 = vadd.f32 %v5913_v59, %v7990_v21 }
 0x186   : > { %v5993_v45 = vpop.f32.mrf.mxu0  ;;  %v2578_v37 = vpop.f32.mrf.mxu1 }
 0x187   : > { %8754 = vst [vmem:[#allocation10_spill] sm:$0xff] %v8099_v36  ;;  %v8102_v7 = vadd.f32 %v5993_v45, %v2658_v57  ;;  %v2657_v40 = vadd.f32 %v2578_v37, %v7994_v43 }
 0x188   : > { %v2948_v51 = vpop.f32.mrf.mxu0  ;;  %v5916_v13 = vpop.f32.mrf.mxu1 }
 0x189   : > { %8755 = vst [vmem:[#allocation7_spill] sm:$0xff] %v8102_v7  ;;  %v8105_v23 = vadd.f32 %v2948_v51, %v2657_v40  ;;  %v2660_v8 = vadd.f32 %v5916_v13, %v8000_v62 }
 0x18a   : > { %v5996_v26 = vpop.f32.mrf.mxu0  ;;  %v2588_v30 = vpop.f32.mrf.mxu1 }
 0x18b   : > { %8756 = vst [vmem:[#allocation12_spill] sm:$0xff] %v8105_v23  ;;  %v8108_v56 = vadd.f32 %v5996_v26, %v2660_v8  ;;  %v2659_v0 = vadd.f32 %v2588_v30, %v8004_v18 }
 0x18c   : > { %v2958_v15 = vpop.f32.mrf.mxu0  ;;  %v5919_v21 = vpop.f32.mrf.mxu1 }
 0x18d   : > { %8757 = vst [vmem:[#allocation13_spill] sm:$0xff] %v8108_v56  ;;  %v8111_v61 = vadd.f32 %v2958_v15, %v2659_v0  ;;  %v2662_v55 = vadd.f32 %v5919_v21, %v8010_v41 }
 0x18e   : > { %v5999_v28 = vpop.f32.mrf.mxu0  ;;  %v2598_v43 = vpop.f32.mrf.mxu1 }
 0x18f   : > { %8758 = vst [vmem:[#allocation14_spill] sm:$0xff] %v8111_v61  ;;  %v8114_v10 = vadd.f32 %v5999_v28, %v2662_v55  ;;  %v2661_v14 = vadd.f32 %v2598_v43, %v8013_v53 }
 0x190   : > { %v2968_v16 = vpop.f32.mrf.mxu0  ;;  %v5922_v62 = vpop.f32.mrf.mxu1 }
 0x191   : > { %8759 = vst [vmem:[#allocation16_spill] sm:$0xff] %v8114_v10  ;;  %v8117_v31 = vadd.f32 %v2968_v16, %v2661_v14  ;;  %v2664_v60 = vadd.f32 %v5922_v62, %v8018_v50 }
 0x192   : > { %v6002_v63 = vpop.f32.mrf.mxu0  ;;  %v2608_v18 = vpop.f32.mrf.mxu1 }
 0x193   : > { %8760 = vst [vmem:[#allocation17_spill] sm:$0xff] %v8117_v31  ;;  %v8120_v2 = vadd.f32 %v6002_v63, %v2664_v60  ;;  %v2663_v9 = vadd.f32 %v2608_v18, %v8022_v39 }
 0x194   : > { %v2978_v6 = vpop.f32.mrf.mxu0  ;;  %v5925_v41 = vpop.f32.mrf.mxu1 }
 0x195   : > { %8761 = vst [vmem:[#allocation15_spill] sm:$0xff] %v8120_v2  ;;  %v8123_v17 = vadd.f32 %v2978_v6, %v2663_v9  ;;  %v2666_v3 = vadd.f32 %v5925_v41, %v8028_v35 }
 0x196   : > { %v6005_v46 = vpop.f32.mrf.mxu0  ;;  %v2618_v53 = vpop.f32.mrf.mxu1 }
 0x197   : > { %8762 = vst [vmem:[#allocation19_spill] sm:$0xff] %v8123_v17  ;;  %v8126_v24 = vadd.f32 %v6005_v46, %v2666_v3  ;;  %v2665_v48 = vadd.f32 %v2618_v53, %v8031_v25 }
 0x198   : > { %v2988_v59 = vpop.f32.mrf.mxu0  ;;  %v5928_v50 = vpop.f32.mrf.mxu1 }
 0x199   : > { %8763 = vst [vmem:[#allocation20_spill] sm:$0xff] %v8126_v24  ;;  %v8129_v57 = vadd.f32 %v2988_v59, %v2665_v48  ;;  %v2668_v45 = vadd.f32 %v5928_v50, %v8036_v32 }
 0x19a   : > { %v6008_v37 = vpop.f32.mrf.mxu0  ;;  %v2628_v39 = vpop.f32.mrf.mxu1 }
 0x19b   : > { %8764 = vst [vmem:[#allocation18_spill] sm:$0xff] %v8129_v57  ;;  %v8132_v40 = vadd.f32 %v6008_v37, %v2668_v45  ;;  %v2667_v51 = vadd.f32 %v2628_v39, %v8039_v27 }
 0x19c   : > { %v2998_v13 = vpop.f32.mrf.mxu0  ;;  %v6043_v35 = vpop.f32.mrf.mxu1 }
 0x19d   : > { %8765 = vst [vmem:[#allocation22_spill] sm:$0xff] %v8132_v40  ;;  %v8135_v8 = vadd.f32 %v2998_v13, %v2667_v51 }
 0x19e   : > { %v8137_v26 = vpop.f32.mrf.mxu0  ;;  %v3250_v30 = vpop.f32.mrf.mxu1 }
 0x19f   : > { %8766 = vst [vmem:[#allocation23_spill] sm:$0xff] %v8135_v8 }
 0x1a0   : > { %v8139_v25 = vpop.f32.mrf.mxu0  ;;  %v6046_v0 = vpop.f32.mrf.mxu1 }
 0x1a2   : > { %v8141_v15 = vpop.f32.mrf.mxu0  ;;  %v8143_v21 = vpop.f32.mrf.mxu1 }
 0x1a4   : > { %v8145_v32 = vpop.f32.mrf.mxu0  ;;  %v8147_v55 = vpop.f32.mrf.mxu1 }
 0x1a6   : > { %v8149_v28 = vpop.f32.mrf.mxu0  ;;  %v8151_v27 = vpop.f32.mrf.mxu1 }
 0x1a8   : > { %v8153_v43 = vpop.f32.mrf.mxu0  ;;  %v8155_v14 = vpop.f32.mrf.mxu1 }
 0x1aa   : > { %v8157_v16 = vpop.f32.mrf.mxu0  ;;  %v8159_v62 = vpop.f32.mrf.mxu1 }
 0x1ac   : > { %v8161_v60 = vpop.f32.mrf.mxu0  ;;  %v8163_v63 = vpop.f32.mrf.mxu1 }
 0x1ae   : > { %v8165_v18 = vpop.f32.mrf.mxu0  ;;  %v8167_v9 = vpop.f32.mrf.mxu1 }
 0x1b0   : > { %v8169_v6 = vpop.f32.mrf.mxu0  ;;  %v8171_v41 = vpop.f32.mrf.mxu1 }
 0x1b2   : > { %v8173_v3 = vpop.f32.mrf.mxu0  ;;  %v8175_v46 = vpop.f32.mrf.mxu1 }
 0x1b4   : > { %v8177_v53 = vpop.f32.mrf.mxu0  ;;  %v8179_v48 = vpop.f32.mrf.mxu1 }
 0x1b6   : > { %v8181_v59 = vpop.f32.mrf.mxu0  ;;  %v8183_v50 = vpop.f32.mrf.mxu1 }
 0x1b8   : > { %v8185_v45 = vpop.f32.mrf.mxu0  ;;  %v8187_v37 = vpop.f32.mrf.mxu1 }
 0x1ba   : > { %v8189_v39 = vpop.f32.mrf.mxu0  ;;  %v8191_v51 = vpop.f32.mrf.mxu1 }
 0x1bc   : > { %v8193_v13 = vpop.f32.mrf.mxu0  ;;  %v8195_v8 = vpop.f32.mrf.mxu1 }
 0x1be   : > { %v8197_v40 = vpop.f32.mrf.mxu0  ;;  %v8199_v57 = vpop.f32.mrf.mxu1 }
 0x1c0   : > { %v8201_v24 = vpop.f32.mrf.mxu0  ;;  %v8203_v17 = vpop.f32.mrf.mxu1 }
 0x1c1   : > { %8767 = vst [vmem:[#allocation21_spill] sm:$0xff] %v8201_v24  ;;  %8768 = vst [vmem:[#allocation24_spill] sm:$0xff] %v8203_v17 }
 0x1c2   : > { %v8205_v2 = vpop.f32.mrf.mxu0  ;;  %v8207_v31 = vpop.f32.mrf.mxu1 }
 0x1c3   : > { %8769 = vst [vmem:[#allocation25_spill] sm:$0xff] %v8205_v2  ;;  %8770 = vst [vmem:[#allocation26_spill] sm:$0xff] %v8207_v31 }
 0x1c4   : > { %v8209_v10 = vpop.f32.mrf.mxu0  ;;  %v8211_v61 = vpop.f32.mrf.mxu1 }
 0x1c5   : > { %8771 = vst [vmem:[#allocation27_spill] sm:$0xff] %v8209_v10  ;;  %8772 = vst [vmem:[#allocation28_spill] sm:$0xff] %v8211_v61 }
 0x1c6   : > { %v8213_v56 = vpop.f32.mrf.mxu0  ;;  %v8215_v23 = vpop.f32.mrf.mxu1 }
 0x1c7   : > { %8773 = vst [vmem:[#allocation30_spill] sm:$0xff] %v8213_v56  ;;  %8774 = vst [vmem:[#allocation29_spill] sm:$0xff] %v8215_v23 }
 0x1c8   : > { %v8217_v7 = vpop.f32.mrf.mxu0  ;;  %v8219_v36 = vpop.f32.mrf.mxu1 }
 0x1c9   : > { %8775 = vst [vmem:[#allocation6_spill] sm:$0xff] %v8217_v7  ;;  %8776 = vst [vmem:[#allocation32_spill] sm:$0xff] %v8219_v36 }
 0x1ca   : > { %v8221_v49 = vpop.f32.mrf.mxu0  ;;  %v8223_v24 = vpop.f32.mrf.mxu1 }
 0x1cb   : > { %8777 = vst [vmem:[#allocation33_spill] sm:$0xff] %v8221_v49  ;;  %8778 = vst [vmem:[#allocation31_spill] sm:$0xff] %v8223_v24 }
 0x1cc   : > { %v8225_v17 = vpop.f32.mrf.mxu0  ;;  %v8227_v2 = vpop.f32.mrf.mxu1 }
 0x1cd   : > { %8779 = vst [vmem:[#allocation8_spill] sm:$0xff] %v8225_v17  ;;  %8780 = vst [vmem:[#allocation34_spill] sm:$0xff] %v8227_v2 }
 0x1ce   : > { %v8229_v31 = vpop.f32.mrf.mxu0  ;;  %v8231_v10 = vpop.f32.mrf.mxu1 }
 0x1cf   : > { %8781 = vst [vmem:[#allocation35_spill] sm:$0xff] %v8229_v31  ;;  %8782 = vst [vmem:[#allocation36_spill] sm:$0xff] %v8231_v10  ;;  %v3410_v31 = vadd.f32 %v6043_v35, %v8042_v12  ;;  %v3411_v12 = vadd.f32 %v8143_v21, %v8051_v34 }
 0x1d0   : > { %v8233_v61 = vpop.f32.mrf.mxu0  ;;  %v8235_v56 = vpop.f32.mrf.mxu1 }
 0x1d1   : > { %8783 = vst [vmem:[#allocation37_spill] sm:$0xff] %v8233_v61  ;;  %8784 = vst [vmem:[#allocation38_spill] sm:$0xff] %v8235_v56  ;;  %v3409_v56 = vadd.f32 %v3250_v30, %v8045_v20  ;;  %v3414_v20 = vadd.f32 %v8147_v55, %v8054_v19  ;;  %v3413_v19 = vadd.f32 %v8151_v27, %v8057_v38 }
 0x1d2   : > { %v8237_v23 = vpop.f32.mrf.mxu0  ;;  %v8239_v7 = vpop.f32.mrf.mxu1  ;;  %v3415_v38 = vadd.f32 %v8159_v62, %v8063_v54 }
 0x1d3   : > { %8785 = vst [vmem:[#allocation39_spill] sm:$0xff] %v8237_v23  ;;  %8786 = vst [vmem:[#allocation40_spill] sm:$0xff] %v8239_v7  ;;  %v3816_v21 = vadd.f32 %v8149_v28, %v3414_v20 }
 0x1d4   : > { %v8241_v36 = vpop.f32.mrf.mxu0  ;;  %v8243_v49 = vpop.f32.mrf.mxu1 }
 0x1d5   : > { %8787 = vst [vmem:[#allocation41_spill] sm:$0xff] %v8241_v36  ;;  %8788 = vst [vmem:[#allocation42_spill] sm:$0xff] %v8243_v49  ;;  %v3812_v36 = vadd.f32 %v8137_v26, %v3410_v31  ;;  %v3412_v49 = vadd.f32 %v6046_v0, %v8048_v33 }
 0x1d6   : > { %v8245_v24 = vpop.f32.mrf.mxu0  ;;  %v8247_v17 = vpop.f32.mrf.mxu1 }
 0x1d7   : > { %8789 = vst [vmem:[#allocation43_spill] sm:$0xff] %v8245_v24  ;;  %8790 = vst [vmem:[#allocation44_spill] sm:$0xff] %v8247_v17  ;;  %v3811_v17 = vadd.f32 %v8139_v25, %v3409_v56  ;;  %v3814_v26 = vadd.f32 %v8141_v15, %v3412_v49 }
 0x1d8   : > { %v8250_v10 = vpop.f32.mrf.mxu0  ;;  %v8252_v61 = vpop.f32.mrf.mxu1 }
 0x1da   : > { %v8255_v23 = vpop.f32.mrf.mxu0  ;;  %v8257_v7 = vpop.f32.mrf.mxu1 }
 0x1db   : > { %8791 = vst [vmem:[#allocation45_spill] sm:$0xff] %v8255_v23 }
 0x1dc   : > { %v8261_v24 = vpop.f32.mrf.mxu0  ;;  %v6203_v2 = vpop.f32.mrf.mxu1 }
 0x1dd   : > { %8792 = vst [vmem:[#allocation46_spill] sm:$0xff] %v8261_v24  ;;  %v4182_v35 = vadd.f32 %v6203_v2, %v3812_v36  ;;  %v3813_v36 = vadd.f32 %v8145_v32, %v3411_v12  ;;  %v3416_v32 = vadd.f32 %v8155_v14, %v8060_v11 }
 0x1de   : > { %v6283_v33 = vpop.f32.mrf.mxu0  ;;  %v4022_v31 = vpop.f32.mrf.mxu1 }
 0x1df   : > { %v4584_v56 = vadd.f32 %v6283_v33, %v4182_v35  ;;  %v4181_v30 = vadd.f32 %v4022_v31, %v3811_v17  ;;  %v3815_v33 = vadd.f32 %v8153_v43, %v3413_v19  ;;  %v3818_v54 = vadd.f32 %v8157_v16, %v3416_v32 }
 0x1e0   : > { %v4424_v25 = vpop.f32.mrf.mxu0  ;;  %v6206_v34 = vpop.f32.mrf.mxu1  ;;  %v3817_v43 = vadd.f32 %v8161_v60, %v3415_v38 }
 0x1e1   : > { %4680 = vst [vmem:[%s8273_s30 + $0x8] sm:$0xff] %v4584_v56  ;;  %v4583_v2 = vadd.f32 %v4424_v25, %v4181_v30  ;;  %v4184_v0 = vadd.f32 %v6206_v34, %v3814_v26  ;;  %v4749_v55 = vmul.f32 %v4584_v56, %v4584_v56  ;;  %v3418_v26 = vadd.f32 %v8163_v63, %v8066_v58 }
 0x1e2   : > { %v6286_v24 = vpop.f32.mrf.mxu0  ;;  %v4032_v23 = vpop.f32.mrf.mxu1  ;;  %v3417_v63 = vadd.f32 %v8167_v9, %v8069_v47 }
 0x1e3   : > { %4679 = vst [vmem:[%s8273_s30] sm:$0xff] %v4583_v2  ;;  %v4711_v49 = vadd.f32 %v4584_v56, %v4583_v2  ;;  %v4748_v17 = vmul.f32 %v4583_v2, %v4583_v2  ;;  %v4586_v15 = vadd.f32 %v6286_v24, %v4184_v0  ;;  %v4183_v35 = vadd.f32 %v4032_v23, %v3813_v36 }
 0x1e4   : > { %v4434_v27 = vpop.f32.mrf.mxu0  ;;  %v6209_v12 = vpop.f32.mrf.mxu1  ;;  %v3820_v58 = vadd.f32 %v8165_v18, %v3418_v26  ;;  %v3420_v0 = vadd.f32 %v8171_v41, %v8072_v22 }
 0x1e5   : > { %v4780_v28 = vadd.f32 %v4749_v55, %v4748_v17  ;;  %4682 = vst [vmem:[%s8273_s30 + $0x18] sm:$0xff] %v4586_v15  ;;  %v4585_v20 = vadd.f32 %v4434_v27, %v4183_v35  ;;  %v4186_v31 = vadd.f32 %v6209_v12, %v3816_v21  ;;  %v4751_v34 = vmul.f32 %v4586_v15, %v4586_v15 }
 0x1e6   : > { %v6289_v24 = vpop.f32.mrf.mxu0  ;;  %v4042_v23 = vpop.f32.mrf.mxu1  ;;  %v3819_v12 = vadd.f32 %v8169_v6, %v3417_v63 }
 0x1e7   : > { %4681 = vst [vmem:[%s8273_s30 + $0x10] sm:$0xff] %v4585_v20  ;;  %v4712_v56 = vadd.f32 %v4711_v49, %v4585_v20  ;;  %v4750_v11 = vmul.f32 %v4585_v20, %v4585_v20  ;;  %v4588_v14 = vadd.f32 %v6289_v24, %v4186_v31  ;;  %v4185_v30 = vadd.f32 %v4042_v23, %v3815_v33 }
 0x1e8   : > { %v4444_v62 = vpop.f32.mrf.mxu0  ;;  %v6212_v25 = vpop.f32.mrf.mxu1  ;;  %v3822_v33 = vadd.f32 %v8173_v3, %v3420_v0 }
 0x1e9   : > { %v4781_v36 = vadd.f32 %v4780_v28, %v4750_v11  ;;  %4684 = vst [vmem:[%s8273_s30 + $0x28] sm:$0xff] %v4588_v14  ;;  %v4587_v19 = vadd.f32 %v4444_v62, %v4185_v30  ;;  %v4713_v2 = vadd.f32 %v4712_v56, %v4586_v15  ;;  %v4188_v21 = vadd.f32 %v6212_v25, %v3818_v54 }
 0x1ea   : > { %v6292_v55 = vpop.f32.mrf.mxu0  ;;  %v4052_v16 = vpop.f32.mrf.mxu1  ;;  %v3419_v15 = vadd.f32 %v8175_v46, %v8075_v29  ;;  %v4753_v18 = vmul.f32 %v4588_v14, %v4588_v14  ;;  %v3422_v28 = vadd.f32 %v8179_v48, %v8078_v4  ;;  %v3421_v56 = vadd.f32 %v8183_v50, %v8081_v44 }
 0x1eb   : > { %4683 = vst [vmem:[%s8273_s30 + $0x20] sm:$0xff] %v4587_v19  ;;  %v4714_v60 = vadd.f32 %v4713_v2, %v4587_v19  ;;  %v4752_v49 = vmul.f32 %v4587_v19, %v4587_v19  ;;  %v4782_v17 = vadd.f32 %v4781_v36, %v4751_v34  ;;  %v4187_v35 = vadd.f32 %v4052_v16, %v3817_v43 }
 0x1ec   : > { %v4590_v32 = vadd.f32 %v6292_v55, %v4188_v21  ;;  %v4454_v38 = vpop.f32.mrf.mxu0  ;;  %v6215_v47 = vpop.f32.mrf.mxu1  ;;  %v3821_v23 = vadd.f32 %v8177_v53, %v3419_v15  ;;  %v3824_v54 = vadd.f32 %v8181_v59, %v3422_v28  ;;  %v3424_v53 = vadd.f32 %v8187_v37, %v8084_v42  ;;  %v8794_v28 = vld [vmem:[#allocation24_spill] sm:$0xff] }
 0x1ed   : > { %v4783_v9 = vadd.f32 %v4782_v17, %v4752_v49  ;;  %v4589_v27 = vadd.f32 %v4454_v38, %v4187_v35  ;;  %v4715_v22 = vadd.f32 %v4714_v60, %v4588_v14  ;;  %v4190_v41 = vadd.f32 %v6215_v47, %v3820_v58 }
 0x1ee   : > { %4686 = vst [vmem:[%s8273_s30 + $0x38] sm:$0xff] %v4590_v32  ;;  %v6295_v20 = vpop.f32.mrf.mxu0  ;;  %v4062_v31 = vpop.f32.mrf.mxu1  ;;  %v4755_v14 = vmul.f32 %v4590_v32, %v4590_v32  ;;  %v3823_v63 = vadd.f32 %v8185_v45, %v3421_v56  ;;  %v3423_v59 = vadd.f32 %v8191_v51, %v8087_v1  ;;  %v3426_v42 = vadd.f32 %v8195_v8, %v8090_v5  ;;  %v8797_v56 = vld [vmem:[#allocation26_spill] sm:$0xff] }
 0x1ef   : > { %4685 = vst [vmem:[%s8273_s30 + $0x30] sm:$0xff] %v4589_v27  ;;  %v4716_v29 = vadd.f32 %v4715_v22, %v4589_v27  ;;  %v4754_v46 = vmul.f32 %v4589_v27, %v4589_v27  ;;  %v4784_v26 = vadd.f32 %v4783_v9, %v4753_v18  ;;  %v4592_v24 = vadd.f32 %v6295_v20, %v4190_v41 }
 0x1f0   : > { %v4189_v6 = vadd.f32 %v4062_v31, %v3819_v12  ;;  %v4464_v3 = vpop.f32.mrf.mxu0  ;;  %v6218_v11 = vpop.f32.mrf.mxu1  ;;  %v3826_v17 = vadd.f32 %v8189_v39, %v3424_v53  ;;  %v3825_v38 = vadd.f32 %v8193_v13, %v3423_v59  ;;  %v3425_v5 = vadd.f32 %v8199_v57, %v8093_v52  ;;  %v8800_v53 = vld [vmem:[#allocation25_spill] sm:$0xff]  ;;  %v8801_v59 = vld [vmem:[#allocation27_spill] sm:$0xff] }
 0x1f1   : > { %v4785_v4 = vadd.f32 %v4784_v26, %v4754_v46  ;;  %4688 = vst [vmem:[%s8273_s30 + $0x48] sm:$0xff] %v4592_v24  ;;  %v4717_v48 = vadd.f32 %v4716_v29, %v4590_v32  ;;  %v4192_v30 = vadd.f32 %v6218_v11, %v3822_v33  ;;  %v4757_v37 = vmul.f32 %v4592_v24, %v4592_v24  ;;  %v8793_v33 = vld [vmem:[#allocation11_spill] sm:$0xff] }
 0x1f2   : > { %v4591_v43 = vadd.f32 %v4464_v3, %v4189_v6  ;;  %v6298_v62 = vpop.f32.mrf.mxu0  ;;  %v4072_v25 = vpop.f32.mrf.mxu1  ;;  %v3828_v9 = vadd.f32 %v8197_v40, %v3426_v42  ;;  %v3428_v20 = vadd.f32 %v8794_v28, %v8793_v33  ;;  %v8803_v42 = vld [vmem:[#allocation29_spill] sm:$0xff]  ;;  %v8809_v33 = vld [vmem:[#allocation31_spill] sm:$0xff] }
 0x1f3   : > { %v4786_v34 = vadd.f32 %v4785_v4, %v4755_v14  ;;  %v4594_v44 = vadd.f32 %v6298_v62, %v4192_v30  ;;  %v4191_v50 = vadd.f32 %v4072_v25, %v3821_v23  ;;  %v8796_v23 = vld [vmem:[#allocation10_spill] sm:$0xff]  ;;  %v8798_v14 = vld [vmem:[#allocation7_spill] sm:$0xff]  ;;  %v8799_v4 = vld [vmem:[#allocation28_spill] sm:$0xff] }
 0x1f4   : > { %4687 = vst [vmem:[%s8273_s30 + $0x40] sm:$0xff] %v4591_v43  ;;  %v4718_v36 = vadd.f32 %v4717_v48, %v4591_v43  ;;  %v4756_v19 = vmul.f32 %v4591_v43, %v4591_v43  ;;  %v4474_v2 = vpop.f32.mrf.mxu0  ;;  %v6221_v58 = vpop.f32.mrf.mxu1  ;;  %v3427_v6 = vadd.f32 %v8797_v56, %v8796_v23  ;;  %v3430_v48 = vadd.f32 %v8799_v4, %v8798_v14  ;;  %v8812_v23 = vld [vmem:[#allocation33_spill] sm:$0xff] }
 0x1f5   : > { %4690 = vst [vmem:[%s8273_s30 + $0x58] sm:$0xff] %v4594_v44  ;;  %v4593_v0 = vadd.f32 %v4474_v2, %v4191_v50  ;;  %v4194_v21 = vadd.f32 %v6221_v58, %v3824_v54  ;;  %v4759_v39 = vmul.f32 %v4594_v44, %v4594_v44 }
 0x1f6   : > { %v4787_v55 = vadd.f32 %v4786_v34, %v4756_v19  ;;  %v4719_v16 = vadd.f32 %v4718_v36, %v4592_v24  ;;  %v6301_v60 = vpop.f32.mrf.mxu0  ;;  %v4082_v49 = vpop.f32.mrf.mxu1  ;;  %v8795_v24 = vld [vmem:[#allocation21_spill] sm:$0xff]  ;;  %v3830_v34 = vadd.f32 %v8800_v53, %v3428_v20 }
 0x1f7   : > { %4689 = vst [vmem:[%s8273_s30 + $0x50] sm:$0xff] %v4593_v0  ;;  %v4758_v35 = vmul.f32 %v4593_v0, %v4593_v0  ;;  %v4596_v45 = vadd.f32 %v6301_v60, %v4194_v21  ;;  %v4193_v15 = vadd.f32 %v4082_v49, %v3823_v63  ;;  %v3827_v40 = vadd.f32 %v8795_v24, %v3425_v5  ;;  %v8802_v21 = vld [vmem:[#allocation12_spill] sm:$0xff]  ;;  %v8804_v60 = vld [vmem:[#allocation30_spill] sm:$0xff] }
 0x1f8   : > { %v4720_v18 = vadd.f32 %v4719_v16, %v4593_v0  ;;  %v4788_v1 = vadd.f32 %v4787_v55, %v4757_v37  ;;  %v4484_v51 = vpop.f32.mrf.mxu0  ;;  %v6224_v32 = vpop.f32.mrf.mxu1  ;;  %v3829_v0 = vadd.f32 %v8801_v59, %v3427_v6  ;;  %v3429_v37 = vadd.f32 %v8803_v42, %v8802_v21  ;;  %v8818_v21 = vld [vmem:[#allocation38_spill] sm:$0xff] }
 0x1f9   : > { %4692 = vst [vmem:[%s8273_s30 + $0x68] sm:$0xff] %v4596_v45  ;;  %v4595_v8 = vadd.f32 %v4484_v51, %v4193_v15  ;;  %v4196_v47 = vadd.f32 %v6224_v32, %v3826_v17  ;;  %v4761_v30 = vmul.f32 %v4596_v45, %v4596_v45  ;;  %v3832_v49 = vadd.f32 %v8804_v60, %v3430_v48  ;;  %v8806_v51 = vld [vmem:[#allocation32_spill] sm:$0xff] }
 0x1fa   : > { %v4789_v27 = vadd.f32 %v4788_v1, %v4758_v35  ;;  %v4721_v22 = vadd.f32 %v4720_v18, %v4594_v44  ;;  %v6304_v41 = vpop.f32.mrf.mxu0  ;;  %v4092_v12 = vpop.f32.mrf.mxu1  ;;  %v8805_v1 = vld [vmem:[#allocation13_spill] sm:$0xff] }
 0x1fb   : > { %4691 = vst [vmem:[%s8273_s30 + $0x60] sm:$0xff] %v4595_v8  ;;  %v4760_v31 = vmul.f32 %v4595_v8, %v4595_v8  ;;  %v4598_v13 = vadd.f32 %v6304_v41, %v4196_v47  ;;  %v4195_v29 = vadd.f32 %v4092_v12, %v3825_v38  ;;  %v3432_v32 = vadd.f32 %v8806_v51, %v8805_v1  ;;  %v8808_v12 = vld [vmem:[#allocation14_spill] sm:$0xff]  ;;  %v8821_v1 = vld [vmem:[#allocation40_spill] sm:$0xff] }
 0x1fc   : > { %v4722_v46 = vadd.f32 %v4721_v22, %v4595_v8  ;;  %v4790_v52 = vadd.f32 %v4789_v27, %v4759_v39  ;;  %v4494_v57 = vpop.f32.mrf.mxu0  ;;  %v6227_v26 = vpop.f32.mrf.mxu1  ;;  %v8807_v22 = vld [vmem:[#allocation6_spill] sm:$0xff]  ;;  %v3431_v28 = vadd.f32 %v8809_v33, %v8808_v12  ;;  %v8824_v12 = vld [vmem:[#allocation39_spill] sm:$0xff] }
 0x1fd   : > { %4694 = vst [vmem:[%s8273_s30 + $0x78] sm:$0xff] %v4598_v13  ;;  %v4597_v3 = vadd.f32 %v4494_v57, %v4195_v29  ;;  %v4198_v11 = vadd.f32 %v6227_v26, %v3828_v9  ;;  %v4763_v17 = vmul.f32 %v4598_v13, %v4598_v13  ;;  %v3831_v41 = vadd.f32 %v8807_v22, %v3429_v37  ;;  %v8811_v29 = vld [vmem:[#allocation34_spill] sm:$0xff] }
 0x1fe   : > { %v4791_v54 = vadd.f32 %v4790_v52, %v4760_v31  ;;  %v4723_v43 = vadd.f32 %v4722_v46, %v4596_v45  ;;  %v6307_v62 = vpop.f32.mrf.mxu0  ;;  %v4102_v25 = vpop.f32.mrf.mxu1  ;;  %v3834_v56 = vadd.f32 %v8812_v23, %v3432_v32 }
 0x1ff   : > { %4693 = vst [vmem:[%s8273_s30 + $0x70] sm:$0xff] %v4597_v3  ;;  %v4762_v44 = vmul.f32 %v4597_v3, %v4597_v3  ;;  %v4600_v50 = vadd.f32 %v6307_v62, %v4198_v11  ;;  %v4197_v36 = vadd.f32 %v4102_v25, %v3827_v40  ;;  %v8814_v62 = vld [vmem:[#allocation17_spill] sm:$0xff]  ;;  %v8815_v25 = vld [vmem:[#allocation36_spill] sm:$0xff] }
 0x200   : > { %v4724_v19 = vadd.f32 %v4723_v43, %v4597_v3  ;;  %v4792_v2 = vadd.f32 %v4791_v54, %v4761_v30  ;;  %v4504_v58 = vpop.f32.mrf.mxu0  ;;  %v6230_v63 = vpop.f32.mrf.mxu1  ;;  %v8813_v54 = vld [vmem:[#allocation8_spill] sm:$0xff]  ;;  %v3433_v53 = vadd.f32 %v8815_v25, %v8814_v62 }
 0x201   : > { %4696 = vst [vmem:[%s8273_s30 + $0x88] sm:$0xff] %v4600_v50  ;;  %v4599_v55 = vadd.f32 %v4504_v58, %v4197_v36  ;;  %v4200_v16 = vadd.f32 %v6230_v63, %v3830_v34  ;;  %v4765_v52 = vmul.f32 %v4600_v50, %v4600_v50  ;;  %v3833_v43 = vadd.f32 %v8813_v54, %v3431_v28 }
 0x202   : > { %v4793_v35 = vadd.f32 %v4792_v2, %v4762_v44  ;;  %v4725_v45 = vadd.f32 %v4724_v19, %v4598_v13  ;;  %v6310_v15 = vpop.f32.mrf.mxu0  ;;  %v4112_v18 = vpop.f32.mrf.mxu1  ;;  %v8810_v13 = vld [vmem:[#allocation16_spill] sm:$0xff] }
 0x203   : > { %4695 = vst [vmem:[%s8273_s30 + $0x80] sm:$0xff] %v4599_v55  ;;  %v4764_v38 = vmul.f32 %v4599_v55, %v4599_v55  ;;  %v4602_v5 = vadd.f32 %v6310_v15, %v4200_v16  ;;  %v4199_v8 = vadd.f32 %v4112_v18, %v3829_v0  ;;  %v3434_v46 = vadd.f32 %v8811_v29, %v8810_v13  ;;  %v8817_v0 = vld [vmem:[#allocation15_spill] sm:$0xff] }
 0x204   : > { %v4726_v47 = vadd.f32 %v4725_v45, %v4599_v55  ;;  %v4794_v9 = vadd.f32 %v4793_v35, %v4763_v17  ;;  %v4514_v39 = vpop.f32.mrf.mxu0  ;;  %v6233_v27 = vpop.f32.mrf.mxu1  ;;  %v3436_v42 = vadd.f32 %v8818_v21, %v8817_v0  ;;  %v8819_v45 = vld [vmem:[#allocation37_spill] sm:$0xff]  ;;  %v8820_v18 = vld [vmem:[#allocation19_spill] sm:$0xff] }
 0x205   : > { %4698 = vst [vmem:[%s8273_s30 + $0x98] sm:$0xff] %v4602_v5  ;;  %v4601_v20 = vadd.f32 %v4514_v39, %v4199_v8  ;;  %v4202_v31 = vadd.f32 %v6233_v27, %v3832_v49  ;;  %v4767_v19 = vmul.f32 %v4602_v5, %v4602_v5  ;;  %v3835_v15 = vadd.f32 %v8819_v45, %v3433_v53  ;;  %v8823_v8 = vld [vmem:[#allocation42_spill] sm:$0xff] }
 0x206   : > { %v4795_v57 = vadd.f32 %v4794_v9, %v4764_v38  ;;  %v4727_v26 = vadd.f32 %v4726_v47, %v4600_v50  ;;  %v6313_v24 = vpop.f32.mrf.mxu0  ;;  %v4122_v40 = vpop.f32.mrf.mxu1  ;;  %v8816_v50 = vld [vmem:[#allocation35_spill] sm:$0xff]  ;;  %v3435_v51 = vadd.f32 %v8821_v1, %v8820_v18  ;;  %v3838_v33 = vadd.f32 %v8824_v12, %v3436_v42  ;;  %v8832_v18 = vld [vmem:[#allocation46_spill] sm:$0xff] }
 0x207   : > { %4697 = vst [vmem:[%s8273_s30 + $0x90] sm:$0xff] %v4601_v20  ;;  %v4766_v6 = vmul.f32 %v4601_v20, %v4601_v20  ;;  %v4604_v3 = vadd.f32 %v6313_v24, %v4202_v31  ;;  %v4201_v11 = vadd.f32 %v4122_v40, %v3831_v41  ;;  %v3836_v36 = vadd.f32 %v8816_v50, %v3434_v46  ;;  %v8826_v24 = vld [vmem:[#allocation18_spill] sm:$0xff]  ;;  %v8827_v40 = vld [vmem:[#allocation44_spill] sm:$0xff] }
 0x208   : > { %v4728_v14 = vadd.f32 %v4727_v26, %v4601_v20  ;;  %v4796_v4 = vadd.f32 %v4795_v57, %v4765_v52  ;;  %v4524_v48 = vpop.f32.mrf.mxu0  ;;  %v6236_v30 = vpop.f32.mrf.mxu1  ;;  %v8825_v57 = vld [vmem:[#allocation41_spill] sm:$0xff]  ;;  %v3437_v23 = vadd.f32 %v8827_v40, %v8826_v24 }
 0x209   : > { %4700 = vst [vmem:[%s8273_s30 + $0xa8] sm:$0xff] %v4604_v3  ;;  %v4603_v34 = vadd.f32 %v4524_v48, %v4201_v11  ;;  %v4204_v44 = vadd.f32 %v6236_v30, %v3834_v56  ;;  %v4769_v9 = vmul.f32 %v4604_v3, %v4604_v3  ;;  %v3837_v26 = vadd.f32 %v8825_v57, %v3435_v51 }
 0x20a   : > { %v4797_v2 = vadd.f32 %v4796_v4, %v4766_v6  ;;  %v4729_v58 = vadd.f32 %v4728_v14, %v4602_v5  ;;  %v6316_v63 = vpop.f32.mrf.mxu0  ;;  %v4132_v59 = vpop.f32.mrf.mxu1  ;;  %v8822_v5 = vld [vmem:[#allocation20_spill] sm:$0xff] }
 0x20b   : > { %4699 = vst [vmem:[%s8273_s30 + $0xa0] sm:$0xff] %v4603_v34  ;;  %v4768_v37 = vmul.f32 %v4603_v34, %v4603_v34  ;;  %v4606_v55 = vadd.f32 %v6316_v63, %v4204_v44  ;;  %v4203_v16 = vadd.f32 %v4132_v59, %v3833_v43  ;;  %v3438_v47 = vadd.f32 %v8823_v8, %v8822_v5  ;;  %v8829_v43 = vld [vmem:[#allocation22_spill] sm:$0xff] }
 0x20c   : > { %v4730_v60 = vadd.f32 %v4729_v58, %v4603_v34  ;;  %v4798_v49 = vadd.f32 %v4797_v2, %v4767_v19  ;;  %v4534_v17 = vpop.f32.mrf.mxu0  ;;  %v6239_v35 = vpop.f32.mrf.mxu1  ;;  %v3440_v62 = vadd.f32 %v8252_v61, %v8829_v43  ;;  %v3839_v2 = vadd.f32 %v8250_v10, %v3437_v23  ;;  %v8830_v58 = vld [vmem:[#allocation23_spill] sm:$0xff] }
 0x20d   : > { %4702 = vst [vmem:[%s8273_s30 + $0xb8] sm:$0xff] %v4606_v55  ;;  %v4605_v32 = vadd.f32 %v4534_v17, %v4203_v16  ;;  %v4206_v38 = vadd.f32 %v6239_v35, %v3836_v36  ;;  %v4771_v14 = vmul.f32 %v4606_v55, %v4606_v55  ;;  %v3439_v63 = vadd.f32 %v8257_v7, %v8830_v58  ;;  %v8831_v16 = vld [vmem:[#allocation45_spill] sm:$0xff] }
 0x20e   : > { %v4799_v39 = vadd.f32 %v4798_v49, %v4768_v37  ;;  %v4731_v27 = vadd.f32 %v4730_v60, %v4604_v3  ;;  %v6319_v22 = vpop.f32.mrf.mxu0  ;;  %v4142_v41 = vpop.f32.mrf.mxu1  ;;  %v8828_v3 = vld [vmem:[#allocation43_spill] sm:$0xff]  ;;  %v3842_v60 = vadd.f32 %v8831_v16, %v3440_v62 }
 0x20f   : > { %4701 = vst [vmem:[%s8273_s30 + $0xb0] sm:$0xff] %v4605_v32  ;;  %v4770_v28 = vmul.f32 %v4605_v32, %v4605_v32  ;;  %v4608_v20 = vadd.f32 %v6319_v22, %v4206_v38  ;;  %v4205_v31 = vadd.f32 %v4142_v41, %v3835_v15  ;;  %v3840_v11 = vadd.f32 %v8828_v3, %v3438_v47 }
 0x210   : > { %v4732_v13 = vadd.f32 %v4731_v27, %v4605_v32  ;;  %v4800_v29 = vadd.f32 %v4799_v39, %v4769_v9  ;;  %v4544_v46 = vpop.f32.mrf.mxu0  ;;  %v6242_v52 = vpop.f32.mrf.mxu1  ;;  %v3841_v1 = vadd.f32 %v8832_v18, %v3439_v63 }
 0x211   : > { %4704 = vst [vmem:[%s8273_s30 + $0xc8] sm:$0xff] %v4608_v20  ;;  %v4607_v56 = vadd.f32 %v4544_v46, %v4205_v31  ;;  %v4208_v6 = vadd.f32 %v6242_v52, %v3838_v33  ;;  %v4773_v21 = vmul.f32 %v4608_v20, %v4608_v20 }
 0x212   : > { %v4801_v4 = vadd.f32 %v4800_v29, %v4770_v28  ;;  %v4733_v48 = vadd.f32 %v4732_v13, %v4606_v55  ;;  %v6322_v30 = vpop.f32.mrf.mxu0  ;;  %v4152_v54 = vpop.f32.mrf.mxu1 }
 0x213   : > { %4703 = vst [vmem:[%s8273_s30 + $0xc0] sm:$0xff] %v4607_v56  ;;  %v4772_v25 = vmul.f32 %v4607_v56, %v4607_v56  ;;  %v4610_v53 = vadd.f32 %v6322_v30, %v4208_v6  ;;  %v4207_v34 = vadd.f32 %v4152_v54, %v3837_v26 }
 0x214   : > { %v4734_v44 = vadd.f32 %v4733_v48, %v4607_v56  ;;  %v4802_v50 = vadd.f32 %v4801_v4, %v4771_v14  ;;  %v4554_v36 = vpop.f32.mrf.mxu0  ;;  %v6245_v19 = vpop.f32.mrf.mxu1 }
 0x215   : > { %4706 = vst [vmem:[%s8273_s30 + $0xd8] sm:$0xff] %v4610_v53  ;;  %v4609_v59 = vadd.f32 %v4554_v36, %v4207_v34  ;;  %v4210_v0 = vadd.f32 %v6245_v19, %v3840_v11  ;;  %v4775_v38 = vmul.f32 %v4610_v53, %v4610_v53 }
 0x216   : > { %v4803_v61 = vadd.f32 %v4802_v50, %v4772_v25  ;;  %v4735_v42 = vadd.f32 %v4734_v44, %v4608_v20  ;;  %v6325_v37 = vpop.f32.mrf.mxu0  ;;  %v4162_v55 = vpop.f32.mrf.mxu1 }
 0x217   : > { %4705 = vst [vmem:[%s8273_s30 + $0xd0] sm:$0xff] %v4609_v59  ;;  %v4774_v49 = vmul.f32 %v4609_v59, %v4609_v59  ;;  %v4612_v17 = vadd.f32 %v6325_v37, %v4210_v0  ;;  %v4209_v35 = vadd.f32 %v4162_v55, %v3839_v2 }
 0x218   : > { %v4736_v10 = vadd.f32 %v4735_v42, %v4609_v59  ;;  %v4804_v45 = vadd.f32 %v4803_v61, %v4773_v21  ;;  %v4564_v15 = vpop.f32.mrf.mxu0  ;;  %v6248_v7 = vpop.f32.mrf.mxu1 }
 0x219   : > { %4708 = vst [vmem:[%s8273_s30 + $0xe8] sm:$0xff] %v4612_v17  ;;  %v4611_v51 = vadd.f32 %v4564_v15, %v4209_v35  ;;  %v4212_v32 = vadd.f32 %v6248_v7, %v3842_v60  ;;  %v4777_v20 = vmul.f32 %v4612_v17, %v4612_v17 }
 0x21a   : > { %v4805_v5 = vadd.f32 %v4804_v45, %v4774_v49  ;;  %v4737_v8 = vadd.f32 %v4736_v10, %v4610_v53  ;;  %v6328_v47 = vpop.f32.mrf.mxu0  ;;  %v4172_v9 = vpop.f32.mrf.mxu1 }
 0x21b   : > { %4707 = vst [vmem:[%s8273_s30 + $0xe0] sm:$0xff] %v4611_v51  ;;  %v4776_v39 = vmul.f32 %v4611_v51, %v4611_v51  ;;  %v4614_v27 = vadd.f32 %v6328_v47, %v4212_v32  ;;  %v4211_v22 = vadd.f32 %v4172_v9, %v3841_v1 }
 0x21c   : > { %v4738_v41 = vadd.f32 %v4737_v8, %v4611_v51  ;;  %v4806_v12 = vadd.f32 %v4805_v5, %v4775_v38  ;;  %v4574_v33 = vpop.f32.mrf.mxu0 }
 0x21d   : > { %4710 = vst [vmem:[%s8273_s30 + $0xf8] sm:$0xff] %v4614_v27  ;;  %v4613_v28 = vadd.f32 %v4574_v33, %v4211_v22  ;;  %v4779_v57 = vmul.f32 %v4614_v27, %v4614_v27 }
 0x21e   : > { %v4807_v31 = vadd.f32 %v4806_v12, %v4776_v39  ;;  %v4739_v13 = vadd.f32 %v4738_v41, %v4612_v17 }
 0x21f   : > { %4709 = vst [vmem:[%s8273_s30 + $0xf0] sm:$0xff] %v4613_v28  ;;  %v4778_v29 = vmul.f32 %v4613_v28, %v4613_v28 }
 0x220   : > { %v4740_v46 = vadd.f32 %v4739_v13, %v4613_v28  ;;  %v4808_v52 = vadd.f32 %v4807_v31, %v4777_v20 }
 0x222   : > { %v4741_v26 = vadd.f32 %v4740_v46, %v4614_v27  ;;  %v4809_v24 = vadd.f32 %v4808_v52, %v4778_v29 }
 0x224   : > { %v4742_v40 = vrot.slane %v4741_v26, 4  ;;  %v4810_v23 = vadd.f32 %v4809_v24, %v4779_v57 }
 0x226   : > { %v4743_v56 = vadd.f32 %v4742_v40, %v4741_v26  ;;  %v4811_v6 = vrot.slane %v4810_v23, 4 }
 0x228   : > { %v4744_v3 = vrot.slane %v4743_v56, 2  ;;  %v4812_v11 = vadd.f32 %v4811_v6, %v4810_v23 }
 0x22a   : > { %v4745_v14 = vadd.f32 %v4744_v3, %v4743_v56  ;;  %v4813_v4 = vrot.slane %v4812_v11, 2 }
 0x22c   : > { %v4746_v48 = vrot.slane %v4745_v14, 1  ;;  %v4814_v30 = vadd.f32 %v4813_v4, %v4812_v11 }
 0x22e   : > { %v4747_v54 = vadd.f32 %v4746_v48, %v4745_v14  ;;  %v4815_v43 = vrot.slane %v4814_v30, 1 }
 0x230   : > { %v4816_v62 = vadd.f32 %v4815_v43, %v4814_v30  ;;  %4817 = vst [vmem:[%s268_s10] sm:$0xff] %v4747_v54 }
 0x232   : > { %4818 = vst [vmem:[%s272_s13] sm:$0xff] %v4816_v62 }
 0x233 PF: > { %s17_s21 = sadd.s32 1, %s6385_s21  }
 0x234   : > { %p14_p4 = scmp.ge.s32.totalorder %s17_s21, 4  }
 0x236   :  { %16 = sbr.rel (!%p14_p4) target bundleno = 1 (0x1), region = 98 }

</bundles_post_ra>
